<compile_context>
chip_gen: v6e
topology: v6e:2x2x1
jax: 0.10.0
libtpu: 0.0.40
codegen_flags: <defaults>
</compile_context>

<pallas_src>
import functools

import jax
import jax.numpy as jnp
from jax.experimental import pallas as pl
from jax.experimental.pallas import tpu as pltpu

EPS = 1e-8


def gvp_kernel(s_ref, vt_ref, wh_ref, wss_ref, wsv_ref, wsb_ref, wv_ref,
               s_out_ref, vt_out_ref):
    # s_ref:      (tn, si)       scalar features
    # vt_ref:     (3, tn, vi)    vector features, planar (spatial axis first)
    # wh_ref:     (vi, h)        wh.weight^T
    # wss_ref:    (si, so)       ws.weight^T rows acting on the scalar half
    # wsv_ref:    (h, so)        ws.weight^T rows acting on the vector-norm half
    # wsb_ref:    (1, so)        ws.bias
    # wv_ref:     (h, vo)        wv.weight^T
    # s_out_ref:  (tn, so)
    # vt_out_ref: (3, tn, vo)
    _, tn, vi = vt_ref.shape
    h = wh_ref.shape[1]

    s = s_ref[...].astype(jnp.float32)                                 # (tn, si)
    vt = vt_ref[...].astype(jnp.float32).reshape(3 * tn, vi)           # free reshape

    # vh = wh(v): one fused MXU matmul over all three spatial components.
    vh = jnp.dot(vt, wh_ref[...], preferred_element_type=jnp.float32)  # (3*tn, h)
    vh3 = vh.reshape(3, tn, h)

    # vn = ||vh||_2 over the spatial axis (sum of squares + eps, then sqrt).
    vn = jnp.sqrt(vh3[0] * vh3[0] + vh3[1] * vh3[1] + vh3[2] * vh3[2] + EPS)

    # s = relu(ws(cat([s, vn], -1))): concatenate removed by splitting the dot.
    s_o = (jnp.dot(s, wss_ref[...], preferred_element_type=jnp.float32)
           + jnp.dot(vn, wsv_ref[...], preferred_element_type=jnp.float32)
           + wsb_ref[...])
    s_out_ref[...] = jnp.maximum(s_o, 0.0).astype(s_out_ref.dtype)

    # v = wv(vh); gate each output vector channel by sigmoid of its norm
    # (vector_gate=False path of the reference module).
    vo_all = jnp.dot(vh, wv_ref[...], preferred_element_type=jnp.float32)  # (3*tn, vo)
    vo3 = vo_all.reshape(3, tn, wv_ref.shape[1])
    nsq = vo3[0] * vo3[0] + vo3[1] * vo3[1] + vo3[2] * vo3[2]
    g = jax.nn.sigmoid(jnp.sqrt(nsq + EPS))                              # (tn, vo)
    vt_out_ref[...] = (vo3 * g[None, :, :]).astype(vt_out_ref.dtype)     # one store


def gvp_forward(s, v, params, *, tn=512, planar_io=False):
    """GVP forward (default config).

    s: (N, si).  v: (N, vi, 3) if planar_io=False (PyTorch layout), else
    (3, N, vi).  Returns (s_out, v_out) with v_out in the matching layout.
    """
    wh, wsw, wsb, wv = params["wh"], params["wsw"], params["wsb"], params["wv"]
    N, si = s.shape
    h = wh.shape[1]
    so = wsw.shape[1]
    vo = wv.shape[1]

    if planar_io:
        vt = v
        vi = v.shape[2]
    else:
        vi = v.shape[1]
        # One HBM transpose each way only to honour the PyTorch (N, vi, 3)
        # convention; chain layers with planar_io=True to avoid both passes.
        vt = jnp.transpose(v, (2, 0, 1))                                 # (3, N, vi)

    # Split ws into the scalar / vector-norm halves of the concatenation.
    wss, wsv = wsw[:si], wsw[si:]

    tn = min(tn, N)
    n_pad = (-N) % tn
    if n_pad:
        s = jnp.pad(s, ((0, n_pad), (0, 0)))
        vt = jnp.pad(vt, ((0, 0), (0, n_pad), (0, 0)))
    Np = N + n_pad

    s_out, vt_out = pl.pallas_call(
        gvp_kernel,
        out_shape=(jax.ShapeDtypeStruct((Np, so), s.dtype),
                   jax.ShapeDtypeStruct((3, Np, vo), v.dtype)),
        grid_spec=pltpu.PrefetchScalarGridSpec(
            num_scalar_prefetch=0,
            grid=(Np // tn,),
            in_specs=[
                pl.BlockSpec((tn, si), lambda i: (i, 0)),
                pl.BlockSpec((3, tn, vi), lambda i: (0, i, 0)),
                pl.BlockSpec((vi, h), lambda i: (0, 0)),
                pl.BlockSpec((si, so), lambda i: (0, 0)),
                pl.BlockSpec((h, so), lambda i: (0, 0)),
                pl.BlockSpec((1, so), lambda i: (0, 0)),
                pl.BlockSpec((h, vo), lambda i: (0, 0)),
            ],
            out_specs=[
                pl.BlockSpec((tn, so), lambda i: (i, 0)),
                pl.BlockSpec((3, tn, vo), lambda i: (0, i, 0)),
            ],
        ),
        compiler_params=pltpu.CompilerParams(
            dimension_semantics=("parallel",)),
    )(s, vt, wh, wss, wsv, wsb, wv)

    if n_pad:
        s_out = s_out[:N]
        vt_out = vt_out[:, :N, :]
    if planar_io:
        return s_out, vt_out
    return s_out, jnp.transpose(vt_out, (1, 2, 0))                       # (N, vo, 3)


def gvp_reference(s, v, params):
    """Pure-JAX reference mirroring the PyTorch forward (default config)."""
    wh, wsw, wsb, wv = params["wh"], params["wsw"], params["wsb"], params["wv"]
    vt = jnp.swapaxes(v, -1, -2)                              # (N, 3, vi)
    vh = vt @ wh                                              # (N, 3, h)
    vn = jnp.sqrt(jnp.sum(jnp.square(vh), axis=-2) + EPS)     # (N, h)
    sc = jnp.concatenate([s, vn], axis=-1)
    s_o = jax.nn.relu(sc @ wsw + wsb[0])                      # (N, so)
    vo_t = vh @ wv                                            # (N, 3, vo)
    v_o = jnp.swapaxes(vo_t, -1, -2)                          # (N, vo, 3)
    g = jax.nn.sigmoid(
        jnp.sqrt(jnp.sum(jnp.square(v_o), axis=-1, keepdims=True) + EPS))
    return s_o, v_o * g


if __name__ == "__main__":
    # Small shapes: N=1024 "nodes" (flattened leading dims), si=32, vi=16,
    # so=32, vo=16, h_dim = max(vi, vo) = 16.  tn=256 -> 4 grid steps.
    N, si, vi, so, vo = 1024, 32, 16, 32, 16
    h = max(vi, vo)

    key = jax.random.PRNGKey(0)
    k_s, k_v, k_wh, k_ws, k_wb, k_wv = jax.random.split(key, 6)

    s_in = jax.random.normal(k_s, (N, si), jnp.float32)
    v_in = jax.random.normal(k_v, (N, vi, 3), jnp.float32)

    # Deterministic synthetic parameters (stored transposed for x @ W form).
    params = {
        "wh": jax.random.normal(k_wh, (vi, h), jnp.float32) / jnp.sqrt(vi),
        "wsw": jax.random.normal(k_ws, (si + h, so), jnp.float32) / jnp.sqrt(si + h),
        "wsb": jax.random.normal(k_wb, (1, so), jnp.float32) * 0.1,
        "wv": jax.random.normal(k_wv, (h, vo), jnp.float32) / jnp.sqrt(h),
    }

    fwd = jax.jit(functools.partial(gvp_forward, tn=256))
    s_out, v_out = fwd(s_in, v_in, params)
    jax.block_until_ready((s_out, v_out))

    s_ref, v_ref = gvp_reference(s_in, v_in, params)
    assert s_out.shape == (N, so) and v_out.shape == (N, vo, 3)
    assert jnp.allclose(s_out, s_ref, rtol=1e-5, atol=1e-5)
    assert jnp.allclose(v_out, v_ref, rtol=1e-5, atol=1e-5)

    print("KERNEL_OK")
</pallas_src>

<mosaic_0001>
module attributes {stable_mosaic.version = 11 : i64} {
  func.func @gvp_kernel(%arg0: i32, %arg1: memref<256x32xf32, #tpu.memory_space<vmem>>, %arg2: memref<3x256x16xf32, #tpu.memory_space<vmem>>, %arg3: memref<16x16xf32, #tpu.memory_space<vmem>>, %arg4: memref<32x32xf32, #tpu.memory_space<vmem>>, %arg5: memref<16x32xf32, #tpu.memory_space<vmem>>, %arg6: memref<1x32xf32, #tpu.memory_space<vmem>>, %arg7: memref<16x16xf32, #tpu.memory_space<vmem>>, %arg8: memref<256x32xf32, #tpu.memory_space<vmem>>, %arg9: memref<3x256x16xf32, #tpu.memory_space<vmem>>) attributes {dimension_semantics = [#tpu.dimension_semantics<parallel>], iteration_bounds = array<i64: 4>, scalar_prefetch = 0 : i64, scratch_operands = 0 : i64, tpu.core_type = #tpu.core_type<tc>, window_params = [{transform_indices = @transform_0, window_bounds = array<i64: 256, 32>}, {transform_indices = @transform_1, window_bounds = array<i64: 3, 256, 16>}, {pipeline_mode = #tpu.pipeline_mode<synchronous>, transform_indices = @transform_2, window_bounds = array<i64: 16, 16>}, {pipeline_mode = #tpu.pipeline_mode<synchronous>, transform_indices = @transform_3, window_bounds = array<i64: 32, 32>}, {pipeline_mode = #tpu.pipeline_mode<synchronous>, transform_indices = @transform_4, window_bounds = array<i64: 16, 32>}, {pipeline_mode = #tpu.pipeline_mode<synchronous>, transform_indices = @transform_5, window_bounds = array<i64: 1, 32>}, {pipeline_mode = #tpu.pipeline_mode<synchronous>, transform_indices = @transform_6, window_bounds = array<i64: 16, 16>}, {transform_indices = @transform_7, window_bounds = array<i64: 256, 32>}, {transform_indices = @transform_8, window_bounds = array<i64: 3, 256, 16>}]} {
    %c0 = arith.constant 0 : index
    %c0_0 = arith.constant 0 : index
    %0 = vector.load %arg1[%c0, %c0_0] : memref<256x32xf32, #tpu.memory_space<vmem>>, vector<256x32xf32>
    %c0_1 = arith.constant 0 : index
    %c0_2 = arith.constant 0 : index
    %c0_3 = arith.constant 0 : index
    %1 = vector.load %arg2[%c0_1, %c0_2, %c0_3] : memref<3x256x16xf32, #tpu.memory_space<vmem>>, vector<3x256x16xf32>
    %2 = vector.shape_cast %1 : vector<3x256x16xf32> to vector<768x16xf32>
    %c0_4 = arith.constant 0 : index
    %c0_5 = arith.constant 0 : index
    %3 = vector.load %arg3[%c0_4, %c0_5] : memref<16x16xf32, #tpu.memory_space<vmem>>, vector<16x16xf32>
    %cst = arith.constant dense<0.000000e+00> : vector<768x16xf32>
    %4 = tpu.matmul %2, %3, %cst {dimension_numbers = #tpu.dot_dimension_numbers<[1], [0], [0], [1], [0, 0, 1, 1], [], []>} : vector<768x16xf32>, vector<16x16xf32>, vector<768x16xf32> -> vector<768x16xf32>
    %5 = vector.shape_cast %4 : vector<768x16xf32> to vector<3x256x16xf32>
    %6 = vector.extract_strided_slice %5 {offsets = [0, 0, 0], sizes = [1, 256, 16], strides = [1, 1, 1]} : vector<3x256x16xf32> to vector<1x256x16xf32>
    %7 = vector.shape_cast %6 : vector<1x256x16xf32> to vector<256x16xf32>
    %8 = vector.extract_strided_slice %5 {offsets = [0, 0, 0], sizes = [1, 256, 16], strides = [1, 1, 1]} : vector<3x256x16xf32> to vector<1x256x16xf32>
    %9 = vector.shape_cast %8 : vector<1x256x16xf32> to vector<256x16xf32>
    %10 = arith.mulf %7, %9 : vector<256x16xf32>
    %11 = vector.extract_strided_slice %5 {offsets = [1, 0, 0], sizes = [1, 256, 16], strides = [1, 1, 1]} : vector<3x256x16xf32> to vector<1x256x16xf32>
    %12 = vector.shape_cast %11 : vector<1x256x16xf32> to vector<256x16xf32>
    %13 = vector.extract_strided_slice %5 {offsets = [1, 0, 0], sizes = [1, 256, 16], strides = [1, 1, 1]} : vector<3x256x16xf32> to vector<1x256x16xf32>
    %14 = vector.shape_cast %13 : vector<1x256x16xf32> to vector<256x16xf32>
    %15 = arith.mulf %12, %14 : vector<256x16xf32>
    %16 = arith.addf %10, %15 : vector<256x16xf32>
    %17 = vector.extract_strided_slice %5 {offsets = [2, 0, 0], sizes = [1, 256, 16], strides = [1, 1, 1]} : vector<3x256x16xf32> to vector<1x256x16xf32>
    %18 = vector.shape_cast %17 : vector<1x256x16xf32> to vector<256x16xf32>
    %19 = vector.extract_strided_slice %5 {offsets = [2, 0, 0], sizes = [1, 256, 16], strides = [1, 1, 1]} : vector<3x256x16xf32> to vector<1x256x16xf32>
    %20 = vector.shape_cast %19 : vector<1x256x16xf32> to vector<256x16xf32>
    %21 = arith.mulf %18, %20 : vector<256x16xf32>
    %22 = arith.addf %16, %21 : vector<256x16xf32>
    %cst_6 = arith.constant 9.99999993E-9 : f32
    %23 = vector.broadcast %cst_6 : f32 to vector<256x16xf32>
    %24 = arith.addf %22, %23 : vector<256x16xf32>
    %25 = math.sqrt %24 : vector<256x16xf32>
    %c0_7 = arith.constant 0 : index
    %c0_8 = arith.constant 0 : index
    %26 = vector.load %arg4[%c0_7, %c0_8] : memref<32x32xf32, #tpu.memory_space<vmem>>, vector<32x32xf32>
    %cst_9 = arith.constant dense<0.000000e+00> : vector<256x32xf32>
    %27 = tpu.matmul %0, %26, %cst_9 {dimension_numbers = #tpu.dot_dimension_numbers<[1], [0], [0], [1], [0, 0, 1, 1], [], []>} : vector<256x32xf32>, vector<32x32xf32>, vector<256x32xf32> -> vector<256x32xf32>
    %c0_10 = arith.constant 0 : index
    %c0_11 = arith.constant 0 : index
    %28 = vector.load %arg5[%c0_10, %c0_11] : memref<16x32xf32, #tpu.memory_space<vmem>>, vector<16x32xf32>
    %cst_12 = arith.constant dense<0.000000e+00> : vector<256x32xf32>
    %29 = tpu.matmul %25, %28, %cst_12 {dimension_numbers = #tpu.dot_dimension_numbers<[1], [0], [0], [1], [0, 0, 1, 1], [], []>} : vector<256x16xf32>, vector<16x32xf32>, vector<256x32xf32> -> vector<256x32xf32>
    %30 = arith.addf %27, %29 : vector<256x32xf32>
    %c0_13 = arith.constant 0 : index
    %c0_14 = arith.constant 0 : index
    %31 = vector.load %arg6[%c0_13, %c0_14] : memref<1x32xf32, #tpu.memory_space<vmem>>, vector<1x32xf32>
    %32 = vector.broadcast %31 : vector<1x32xf32> to vector<256x32xf32>
    %33 = arith.addf %30, %32 : vector<256x32xf32>
    %cst_15 = arith.constant 0.000000e+00 : f32
    %34 = vector.broadcast %cst_15 : f32 to vector<256x32xf32>
    %35 = arith.maximumf %33, %34 : vector<256x32xf32>
    %c0_16 = arith.constant 0 : index
    %c0_17 = arith.constant 0 : index
    %36 = vector.load %arg8[%c0_16, %c0_17] : memref<256x32xf32, #tpu.memory_space<vmem>>, vector<256x32xf32>
    tpu.vector_store %arg8[%c0_16, %c0_17], %35 {strides = array<i32>} : memref<256x32xf32, #tpu.memory_space<vmem>>, vector<256x32xf32>,
    %c0_18 = arith.constant 0 : index
    %c0_19 = arith.constant 0 : index
    %37 = vector.load %arg7[%c0_18, %c0_19] : memref<16x16xf32, #tpu.memory_space<vmem>>, vector<16x16xf32>
    %cst_20 = arith.constant dense<0.000000e+00> : vector<768x16xf32>
    %38 = tpu.matmul %4, %37, %cst_20 {dimension_numbers = #tpu.dot_dimension_numbers<[1], [0], [0], [1], [0, 0, 1, 1], [], []>} : vector<768x16xf32>, vector<16x16xf32>, vector<768x16xf32> -> vector<768x16xf32>
    %39 = vector.shape_cast %38 : vector<768x16xf32> to vector<3x256x16xf32>
    %40 = vector.extract_strided_slice %39 {offsets = [0, 0, 0], sizes = [1, 256, 16], strides = [1, 1, 1]} : vector<3x256x16xf32> to vector<1x256x16xf32>
    %41 = vector.shape_cast %40 : vector<1x256x16xf32> to vector<256x16xf32>
    %42 = vector.extract_strided_slice %39 {offsets = [0, 0, 0], sizes = [1, 256, 16], strides = [1, 1, 1]} : vector<3x256x16xf32> to vector<1x256x16xf32>
    %43 = vector.shape_cast %42 : vector<1x256x16xf32> to vector<256x16xf32>
    %44 = arith.mulf %41, %43 : vector<256x16xf32>
    %45 = vector.extract_strided_slice %39 {offsets = [1, 0, 0], sizes = [1, 256, 16], strides = [1, 1, 1]} : vector<3x256x16xf32> to vector<1x256x16xf32>
    %46 = vector.shape_cast %45 : vector<1x256x16xf32> to vector<256x16xf32>
    %47 = vector.extract_strided_slice %39 {offsets = [1, 0, 0], sizes = [1, 256, 16], strides = [1, 1, 1]} : vector<3x256x16xf32> to vector<1x256x16xf32>
    %48 = vector.shape_cast %47 : vector<1x256x16xf32> to vector<256x16xf32>
    %49 = arith.mulf %46, %48 : vector<256x16xf32>
    %50 = arith.addf %44, %49 : vector<256x16xf32>
    %51 = vector.extract_strided_slice %39 {offsets = [2, 0, 0], sizes = [1, 256, 16], strides = [1, 1, 1]} : vector<3x256x16xf32> to vector<1x256x16xf32>
    %52 = vector.shape_cast %51 : vector<1x256x16xf32> to vector<256x16xf32>
    %53 = vector.extract_strided_slice %39 {offsets = [2, 0, 0], sizes = [1, 256, 16], strides = [1, 1, 1]} : vector<3x256x16xf32> to vector<1x256x16xf32>
    %54 = vector.shape_cast %53 : vector<1x256x16xf32> to vector<256x16xf32>
    %55 = arith.mulf %52, %54 : vector<256x16xf32>
    %56 = arith.addf %50, %55 : vector<256x16xf32>
    %cst_21 = arith.constant 9.99999993E-9 : f32
    %57 = vector.broadcast %cst_21 : f32 to vector<256x16xf32>
    %58 = arith.addf %56, %57 : vector<256x16xf32>
    %59 = math.sqrt %58 : vector<256x16xf32>
    %60 = arith.negf %59 : vector<256x16xf32>
    %61 = math.exp %60 : vector<256x16xf32>
    %cst_22 = arith.constant 1.000000e+00 : f32
    %62 = vector.broadcast %cst_22 : f32 to vector<256x16xf32>
    %63 = arith.addf %62, %61 : vector<256x16xf32>
    %64 = arith.divf %62, %63 : vector<256x16xf32>
    %65 = vector.shape_cast %64 : vector<256x16xf32> to vector<1x256x16xf32>
    %66 = vector.broadcast %65 : vector<1x256x16xf32> to vector<3x256x16xf32>
    %67 = arith.mulf %39, %66 : vector<3x256x16xf32>
    %c0_23 = arith.constant 0 : index
    %c0_24 = arith.constant 0 : index
    %c0_25 = arith.constant 0 : index
    %68 = vector.load %arg9[%c0_23, %c0_24, %c0_25] : memref<3x256x16xf32, #tpu.memory_space<vmem>>, vector<3x256x16xf32>
    tpu.vector_store %arg9[%c0_23, %c0_24, %c0_25], %67 {strides = array<i32>} : memref<3x256x16xf32, #tpu.memory_space<vmem>>, vector<3x256x16xf32>,
    return
  }
  func.func @transform_0(%arg0: i32) -> (i32, i32) {
    %c0_i32 = arith.constant 0 : i32
    %c0_i32_0 = arith.constant 0 : i32
    return %arg0, %c0_i32 : i32, i32
  }
  func.func @transform_1(%arg0: i32) -> (i32, i32, i32) {
    %c0_i32 = arith.constant 0 : i32
    %c0_i32_0 = arith.constant 0 : i32
    %c0_i32_1 = arith.constant 0 : i32
    return %c0_i32, %arg0, %c0_i32_0 : i32, i32, i32
  }
  func.func @transform_2(%arg0: i32) -> (i32, i32) {
    %c0_i32 = arith.constant 0 : i32
    %c0_i32_0 = arith.constant 0 : i32
    %c0_i32_1 = arith.constant 0 : i32
    return %c0_i32, %c0_i32_0 : i32, i32
  }
  func.func @transform_3(%arg0: i32) -> (i32, i32) {
    %c0_i32 = arith.constant 0 : i32
    %c0_i32_0 = arith.constant 0 : i32
    %c0_i32_1 = arith.constant 0 : i32
    return %c0_i32, %c0_i32_0 : i32, i32
  }
  func.func @transform_4(%arg0: i32) -> (i32, i32) {
    %c0_i32 = arith.constant 0 : i32
    %c0_i32_0 = arith.constant 0 : i32
    %c0_i32_1 = arith.constant 0 : i32
    return %c0_i32, %c0_i32_0 : i32, i32
  }
  func.func @transform_5(%arg0: i32) -> (i32, i32) {
    %c0_i32 = arith.constant 0 : i32
    %c0_i32_0 = arith.constant 0 : i32
    %c0_i32_1 = arith.constant 0 : i32
    return %c0_i32, %c0_i32_0 : i32, i32
  }
  func.func @transform_6(%arg0: i32) -> (i32, i32) {
    %c0_i32 = arith.constant 0 : i32
    %c0_i32_0 = arith.constant 0 : i32
    %c0_i32_1 = arith.constant 0 : i32
    return %c0_i32, %c0_i32_0 : i32, i32
  }
  func.func @transform_7(%arg0: i32) -> (i32, i32) {
    %c0_i32 = arith.constant 0 : i32
    %c0_i32_0 = arith.constant 0 : i32
    return %arg0, %c0_i32 : i32, i32
  }
  func.func @transform_8(%arg0: i32) -> (i32, i32, i32) {
    %c0_i32 = arith.constant 0 : i32
    %c0_i32_0 = arith.constant 0 : i32
    %c0_i32_1 = arith.constant 0 : i32
    return %c0_i32, %arg0, %c0_i32_0 : i32, i32, i32
  }
}

</mosaic_0001>

<bundles_post_ra>
// kernel: gvp_forward.1
= control target key start
LH: loop header
LB: loop body
LE: loop exit
PB: predicated region body
PF: predicated region fallthrough
CT: control target
= control target key end

     0   :  { %s6373_s27 = smov 0   ;;  %s6375_s28 = smov 0   ;;  %s9517_s0 = inlined_call_operand.vmem [shape: f32[1024,32], index: 0, kind: input, shape index: {}]   ;;  %s9518_s1 = inlined_call_operand.vmem [shape: f32[3,1024,16], index: 1, kind: input, shape index: {}]   ;;  %s9519_s2 = inlined_call_operand.vmem [shape: f32[16,16], index: 2, kind: input, shape index: {}]   ;;  %s9520_s3 = inlined_call_operand.vmem [shape: f32[32,32], index: 3, kind: input, shape index: {}]   ;;  %s9521_s4 = inlined_call_operand.vmem [shape: f32[16,32], index: 4, kind: input, shape index: {}]   ;;  %s9522_s5 = inlined_call_operand.vmem [shape: f32[1,32], index: 5, kind: input, shape index: {}]   ;;  %s9523_s6 = inlined_call_operand.vmem [shape: f32[16,16], index: 6, kind: input, shape index: {}]   ;;  %s9524_s7 = inlined_call_operand.vmem [shape: f32[1024,32], index: 7, kind: output, shape index: {0}]   ;;  %s9525_s8 = inlined_call_operand.vmem [shape: f32[3,1024,16], index: 8, kind: output, shape index: {1}]  }
   0x1   :  { %s6377_s29 = smov 0  }
   0x2 LB: > { %s6389_s30 = sadd.s32 4294967295, %s6326_s29   ;;  %s6392_s9 = sadd.s32 1, %s6326_s29   ;;  %s6326_s29 = sphi %s6377_s29, %s9929_s29   ;;  %s6322_s28 = sphi %s6375_s28, %s9928_s28   ;;  %s6318_s27 = sphi %s6373_s27, %s9927_s27  }
   0x3   : > { %s49_s10 = ssub.s32 %s6326_s29, %s6392_s9  ;;  %s52_s11 = sadd.s32 1, %s6322_s28 }
   0x4   : > { %p50_p0 = scmp.eq.s32.totalorder %s49_s10, 0  ;;  %p59_p1 = scmp.ne.s32.totalorder %s6322_s28, %s6318_s27 }
   0x5   : > { %p60_p2 = scmp.eq.s32.totalorder %s6326_s29, 0  ;;  %p220_p3 = scmp.eq.s32.totalorder %s6389_s30, 3 }
   0x6   : > { %s6402_s12 = scalar_select %p50_p0, %s6322_s28, %s52_s11  }
   0x7   : > { %p61_p4 = por %p60_p2, %p59_p1  ;;  %p6404_p5 = por %p220_p3, %p59_p1 }
   0x8   : > { %p5049_p6 = scmp.ge.s32.totalorder %s6326_s29, 4 }
   0xa   : > { %257 = sbr.rel (%p5049_p6) target bundleno = 68 (0x44), region = 36 }
   0xf   : > { %269 = sbr.rel (!%p61_p4) target bundleno = 68 (0x44), region = 44  ;;  %s271_s14 = sand.u32 (%p61_p4), 1, %s6322_s28  }
  0x10   : > { %s5350_s15 = sshll.u32 (%p61_p4), %s6326_s29, 8  ;;  %s6022_s16 = smul.u32 (%p61_p4), 768, %s271_s14 }
  0x11   : > { %s6414_s19 = scalar_lea.vmem (%p61_p4), %s9518_s1, %s5350_s15 }
  0x12   : > { %v495_v0 = vld [vmem:[%s6414_s19] sm:$0xff] (%p61_p4)  ;;  %v497_v1 = vld [vmem:[%s6414_s19 + $0x8] sm:$0xff] (%p61_p4)  ;;  %v499_v2 = vld [vmem:[%s6414_s19 + $0x10] sm:$0xff] (%p61_p4)  ;;  %s6422_s20 = scalar_lea.vmem (%p61_p4), [#allocation2], %s6022_s16 }
  0x13   : > { %v501_v3 = vld [vmem:[%s6414_s19 + $0x18] sm:$0xff] (%p61_p4)  ;;  %v503_v4 = vld [vmem:[%s6414_s19 + $0x20] sm:$0xff] (%p61_p4)  ;;  %v505_v5 = vld [vmem:[%s6414_s19 + $0x28] sm:$0xff] (%p61_p4)  ;;  %496 = vst [vmem:[%s6422_s20] sm:$0xff] (%p61_p4), %v495_v0 }
  0x14   : > { %498 = vst [vmem:[%s6422_s20 + $0x8] sm:$0xff] %v497_v1  ;;  %500 = vst [vmem:[%s6422_s20 + $0x10] sm:$0xff] %v499_v2  ;;  %v507_v6 = vld [vmem:[%s6414_s19 + $0x30] sm:$0xff]  ;;  %v509_v7 = vld [vmem:[%s6414_s19 + $0x38] sm:$0xff] }
  0x15   : > { %502 = vst [vmem:[%s6422_s20 + $0x18] sm:$0xff] %v501_v3  ;;  %504 = vst [vmem:[%s6422_s20 + $0x20] sm:$0xff] %v503_v4  ;;  %v511_v8 = vld [vmem:[%s6414_s19 + $0x40] sm:$0xff]  ;;  %v513_v9 = vld [vmem:[%s6414_s19 + $0x48] sm:$0xff] }
  0x16   : > { %506 = vst [vmem:[%s6422_s20 + $0x28] sm:$0xff] %v505_v5  ;;  %508 = vst [vmem:[%s6422_s20 + $0x30] sm:$0xff] %v507_v6  ;;  %v515_v10 = vld [vmem:[%s6414_s19 + $0x50] sm:$0xff]  ;;  %v517_v11 = vld [vmem:[%s6414_s19 + $0x58] sm:$0xff] }
  0x17   : > { %510 = vst [vmem:[%s6422_s20 + $0x38] sm:$0xff] %v509_v7  ;;  %512 = vst [vmem:[%s6422_s20 + $0x40] sm:$0xff] %v511_v8  ;;  %v519_v12 = vld [vmem:[%s6414_s19 + $0x60] sm:$0xff]  ;;  %v521_v13 = vld [vmem:[%s6414_s19 + $0x68] sm:$0xff] }
  0x18   : > { %514 = vst [vmem:[%s6422_s20 + $0x48] sm:$0xff] %v513_v9  ;;  %516 = vst [vmem:[%s6422_s20 + $0x50] sm:$0xff] %v515_v10  ;;  %v523_v14 = vld [vmem:[%s6414_s19 + $0x70] sm:$0xff]  ;;  %v525_v15 = vld [vmem:[%s6414_s19 + $0x78] sm:$0xff] }
  0x19   : > { %518 = vst [vmem:[%s6422_s20 + $0x58] sm:$0xff] %v517_v11  ;;  %520 = vst [vmem:[%s6422_s20 + $0x60] sm:$0xff] %v519_v12  ;;  %v527_v16 = vld [vmem:[%s6414_s19 + $0x80] sm:$0xff]  ;;  %v529_v17 = vld [vmem:[%s6414_s19 + $0x88] sm:$0xff] }
  0x1a   : > { %522 = vst [vmem:[%s6422_s20 + $0x68] sm:$0xff] %v521_v13  ;;  %524 = vst [vmem:[%s6422_s20 + $0x70] sm:$0xff] %v523_v14  ;;  %v531_v18 = vld [vmem:[%s6414_s19 + $0x90] sm:$0xff]  ;;  %v533_v19 = vld [vmem:[%s6414_s19 + $0x98] sm:$0xff] }
  0x1b   : > { %526 = vst [vmem:[%s6422_s20 + $0x78] sm:$0xff] %v525_v15  ;;  %528 = vst [vmem:[%s6422_s20 + $0x80] sm:$0xff] %v527_v16  ;;  %v535_v20 = vld [vmem:[%s6414_s19 + $0xa0] sm:$0xff]  ;;  %v537_v21 = vld [vmem:[%s6414_s19 + $0xa8] sm:$0xff] }
  0x1c   : > { %530 = vst [vmem:[%s6422_s20 + $0x88] sm:$0xff] %v529_v17  ;;  %532 = vst [vmem:[%s6422_s20 + $0x90] sm:$0xff] %v531_v18  ;;  %v539_v22 = vld [vmem:[%s6414_s19 + $0xb0] sm:$0xff]  ;;  %v541_v23 = vld [vmem:[%s6414_s19 + $0xb8] sm:$0xff] }
  0x1d   : > { %534 = vst [vmem:[%s6422_s20 + $0x98] sm:$0xff] %v533_v19  ;;  %536 = vst [vmem:[%s6422_s20 + $0xa0] sm:$0xff] %v535_v20  ;;  %v543_v24 = vld [vmem:[%s6414_s19 + $0xc0] sm:$0xff]  ;;  %v545_v25 = vld [vmem:[%s6414_s19 + $0xc8] sm:$0xff] }
  0x1e   : > { %538 = vst [vmem:[%s6422_s20 + $0xa8] sm:$0xff] %v537_v21  ;;  %540 = vst [vmem:[%s6422_s20 + $0xb0] sm:$0xff] %v539_v22  ;;  %v547_v26 = vld [vmem:[%s6414_s19 + $0xd0] sm:$0xff]  ;;  %v549_v27 = vld [vmem:[%s6414_s19 + $0xd8] sm:$0xff] }
  0x1f   : > { %542 = vst [vmem:[%s6422_s20 + $0xb8] sm:$0xff] %v541_v23  ;;  %544 = vst [vmem:[%s6422_s20 + $0xc0] sm:$0xff] %v543_v24  ;;  %v551_v28 = vld [vmem:[%s6414_s19 + $0xe0] sm:$0xff]  ;;  %v553_v29 = vld [vmem:[%s6414_s19 + $0xe8] sm:$0xff] }
  0x20   : > { %546 = vst [vmem:[%s6422_s20 + $0xc8] sm:$0xff] %v545_v25  ;;  %548 = vst [vmem:[%s6422_s20 + $0xd0] sm:$0xff] %v547_v26  ;;  %v555_v30 = vld [vmem:[%s6414_s19 + $0xf0] sm:$0xff]  ;;  %v557_v31 = vld [vmem:[%s6414_s19 + $0xf8] sm:$0xff] }
  0x21   : > { %550 = vst [vmem:[%s6422_s20 + $0xd8] sm:$0xff] %v549_v27  ;;  %552 = vst [vmem:[%s6422_s20 + $0xe0] sm:$0xff] %v551_v28  ;;  %v559_v32 = vld [vmem:[%s6414_s19 + $0x400] sm:$0xff]  ;;  %v561_v33 = vld [vmem:[%s6414_s19 + $0x408] sm:$0xff] }
  0x22   : > { %554 = vst [vmem:[%s6422_s20 + $0xe8] sm:$0xff] %v553_v29  ;;  %556 = vst [vmem:[%s6422_s20 + $0xf0] sm:$0xff] %v555_v30  ;;  %v563_v34 = vld [vmem:[%s6414_s19 + $0x410] sm:$0xff]  ;;  %v565_v35 = vld [vmem:[%s6414_s19 + $0x418] sm:$0xff] }
  0x23   : > { %558 = vst [vmem:[%s6422_s20 + $0xf8] sm:$0xff] %v557_v31  ;;  %560 = vst [vmem:[%s6422_s20 + $0x100] sm:$0xff] %v559_v32  ;;  %v567_v36 = vld [vmem:[%s6414_s19 + $0x420] sm:$0xff]  ;;  %v569_v37 = vld [vmem:[%s6414_s19 + $0x428] sm:$0xff] }
  0x24   : > { %562 = vst [vmem:[%s6422_s20 + $0x108] sm:$0xff] %v561_v33  ;;  %564 = vst [vmem:[%s6422_s20 + $0x110] sm:$0xff] %v563_v34  ;;  %v571_v38 = vld [vmem:[%s6414_s19 + $0x430] sm:$0xff]  ;;  %v573_v39 = vld [vmem:[%s6414_s19 + $0x438] sm:$0xff] }
  0x25   : > { %566 = vst [vmem:[%s6422_s20 + $0x118] sm:$0xff] %v565_v35  ;;  %568 = vst [vmem:[%s6422_s20 + $0x120] sm:$0xff] %v567_v36  ;;  %v575_v40 = vld [vmem:[%s6414_s19 + $0x440] sm:$0xff]  ;;  %v577_v41 = vld [vmem:[%s6414_s19 + $0x448] sm:$0xff] }
  0x26   : > { %570 = vst [vmem:[%s6422_s20 + $0x128] sm:$0xff] %v569_v37  ;;  %572 = vst [vmem:[%s6422_s20 + $0x130] sm:$0xff] %v571_v38  ;;  %v579_v42 = vld [vmem:[%s6414_s19 + $0x450] sm:$0xff]  ;;  %v581_v43 = vld [vmem:[%s6414_s19 + $0x458] sm:$0xff] }
  0x27   : > { %574 = vst [vmem:[%s6422_s20 + $0x138] sm:$0xff] %v573_v39  ;;  %576 = vst [vmem:[%s6422_s20 + $0x140] sm:$0xff] %v575_v40  ;;  %v583_v44 = vld [vmem:[%s6414_s19 + $0x460] sm:$0xff]  ;;  %v585_v45 = vld [vmem:[%s6414_s19 + $0x468] sm:$0xff] }
  0x28   : > { %578 = vst [vmem:[%s6422_s20 + $0x148] sm:$0xff] %v577_v41  ;;  %580 = vst [vmem:[%s6422_s20 + $0x150] sm:$0xff] %v579_v42  ;;  %v587_v46 = vld [vmem:[%s6414_s19 + $0x470] sm:$0xff]  ;;  %v589_v47 = vld [vmem:[%s6414_s19 + $0x478] sm:$0xff] }
  0x29   : > { %582 = vst [vmem:[%s6422_s20 + $0x158] sm:$0xff] %v581_v43  ;;  %584 = vst [vmem:[%s6422_s20 + $0x160] sm:$0xff] %v583_v44  ;;  %v591_v48 = vld [vmem:[%s6414_s19 + $0x480] sm:$0xff]  ;;  %v593_v49 = vld [vmem:[%s6414_s19 + $0x488] sm:$0xff] }
  0x2a   : > { %586 = vst [vmem:[%s6422_s20 + $0x168] sm:$0xff] %v585_v45  ;;  %588 = vst [vmem:[%s6422_s20 + $0x170] sm:$0xff] %v587_v46  ;;  %v595_v50 = vld [vmem:[%s6414_s19 + $0x490] sm:$0xff]  ;;  %v597_v51 = vld [vmem:[%s6414_s19 + $0x498] sm:$0xff] }
  0x2b   : > { %590 = vst [vmem:[%s6422_s20 + $0x178] sm:$0xff] %v589_v47  ;;  %592 = vst [vmem:[%s6422_s20 + $0x180] sm:$0xff] %v591_v48  ;;  %v599_v52 = vld [vmem:[%s6414_s19 + $0x4a0] sm:$0xff]  ;;  %v601_v53 = vld [vmem:[%s6414_s19 + $0x4a8] sm:$0xff] }
  0x2c   : > { %594 = vst [vmem:[%s6422_s20 + $0x188] sm:$0xff] %v593_v49  ;;  %596 = vst [vmem:[%s6422_s20 + $0x190] sm:$0xff] %v595_v50  ;;  %v603_v54 = vld [vmem:[%s6414_s19 + $0x4b0] sm:$0xff]  ;;  %v605_v55 = vld [vmem:[%s6414_s19 + $0x4b8] sm:$0xff] }
  0x2d   : > { %598 = vst [vmem:[%s6422_s20 + $0x198] sm:$0xff] %v597_v51  ;;  %600 = vst [vmem:[%s6422_s20 + $0x1a0] sm:$0xff] %v599_v52  ;;  %v607_v56 = vld [vmem:[%s6414_s19 + $0x4c0] sm:$0xff]  ;;  %v609_v57 = vld [vmem:[%s6414_s19 + $0x4c8] sm:$0xff] }
  0x2e   : > { %602 = vst [vmem:[%s6422_s20 + $0x1a8] sm:$0xff] %v601_v53  ;;  %604 = vst [vmem:[%s6422_s20 + $0x1b0] sm:$0xff] %v603_v54  ;;  %v611_v58 = vld [vmem:[%s6414_s19 + $0x4d0] sm:$0xff]  ;;  %v613_v59 = vld [vmem:[%s6414_s19 + $0x4d8] sm:$0xff] }
  0x2f   : > { %606 = vst [vmem:[%s6422_s20 + $0x1b8] sm:$0xff] %v605_v55  ;;  %608 = vst [vmem:[%s6422_s20 + $0x1c0] sm:$0xff] %v607_v56  ;;  %v615_v60 = vld [vmem:[%s6414_s19 + $0x4e0] sm:$0xff]  ;;  %v617_v61 = vld [vmem:[%s6414_s19 + $0x4e8] sm:$0xff] }
  0x30   : > { %610 = vst [vmem:[%s6422_s20 + $0x1c8] sm:$0xff] %v609_v57  ;;  %612 = vst [vmem:[%s6422_s20 + $0x1d0] sm:$0xff] %v611_v58  ;;  %v619_v62 = vld [vmem:[%s6414_s19 + $0x4f0] sm:$0xff]  ;;  %v621_v63 = vld [vmem:[%s6414_s19 + $0x4f8] sm:$0xff] }
  0x31   : > { %614 = vst [vmem:[%s6422_s20 + $0x1d8] sm:$0xff] %v613_v59  ;;  %616 = vst [vmem:[%s6422_s20 + $0x1e0] sm:$0xff] %v615_v60  ;;  %v623_v0 = vld [vmem:[%s6414_s19 + $0x800] sm:$0xff]  ;;  %v625_v1 = vld [vmem:[%s6414_s19 + $0x808] sm:$0xff] }
  0x32   : > { %618 = vst [vmem:[%s6422_s20 + $0x1e8] sm:$0xff] %v617_v61  ;;  %620 = vst [vmem:[%s6422_s20 + $0x1f0] sm:$0xff] %v619_v62  ;;  %v627_v2 = vld [vmem:[%s6414_s19 + $0x810] sm:$0xff]  ;;  %v629_v3 = vld [vmem:[%s6414_s19 + $0x818] sm:$0xff] }
  0x33   : > { %622 = vst [vmem:[%s6422_s20 + $0x1f8] sm:$0xff] %v621_v63  ;;  %624 = vst [vmem:[%s6422_s20 + $0x200] sm:$0xff] %v623_v0  ;;  %v631_v4 = vld [vmem:[%s6414_s19 + $0x820] sm:$0xff]  ;;  %v633_v5 = vld [vmem:[%s6414_s19 + $0x828] sm:$0xff] }
  0x34   : > { %626 = vst [vmem:[%s6422_s20 + $0x208] sm:$0xff] %v625_v1  ;;  %628 = vst [vmem:[%s6422_s20 + $0x210] sm:$0xff] %v627_v2  ;;  %v635_v6 = vld [vmem:[%s6414_s19 + $0x830] sm:$0xff]  ;;  %v637_v7 = vld [vmem:[%s6414_s19 + $0x838] sm:$0xff] }
  0x35   : > { %630 = vst [vmem:[%s6422_s20 + $0x218] sm:$0xff] %v629_v3  ;;  %632 = vst [vmem:[%s6422_s20 + $0x220] sm:$0xff] %v631_v4  ;;  %v639_v8 = vld [vmem:[%s6414_s19 + $0x840] sm:$0xff]  ;;  %v641_v9 = vld [vmem:[%s6414_s19 + $0x848] sm:$0xff] }
  0x36   : > { %634 = vst [vmem:[%s6422_s20 + $0x228] sm:$0xff] %v633_v5  ;;  %636 = vst [vmem:[%s6422_s20 + $0x230] sm:$0xff] %v635_v6  ;;  %v643_v10 = vld [vmem:[%s6414_s19 + $0x850] sm:$0xff]  ;;  %v645_v11 = vld [vmem:[%s6414_s19 + $0x858] sm:$0xff] }
  0x37   : > { %638 = vst [vmem:[%s6422_s20 + $0x238] sm:$0xff] %v637_v7  ;;  %640 = vst [vmem:[%s6422_s20 + $0x240] sm:$0xff] %v639_v8  ;;  %v647_v12 = vld [vmem:[%s6414_s19 + $0x860] sm:$0xff]  ;;  %v649_v13 = vld [vmem:[%s6414_s19 + $0x868] sm:$0xff] }
  0x38   : > { %642 = vst [vmem:[%s6422_s20 + $0x248] sm:$0xff] %v641_v9  ;;  %644 = vst [vmem:[%s6422_s20 + $0x250] sm:$0xff] %v643_v10  ;;  %v651_v14 = vld [vmem:[%s6414_s19 + $0x870] sm:$0xff]  ;;  %v653_v15 = vld [vmem:[%s6414_s19 + $0x878] sm:$0xff] }
  0x39   : > { %646 = vst [vmem:[%s6422_s20 + $0x258] sm:$0xff] %v645_v11  ;;  %648 = vst [vmem:[%s6422_s20 + $0x260] sm:$0xff] %v647_v12  ;;  %v655_v16 = vld [vmem:[%s6414_s19 + $0x880] sm:$0xff]  ;;  %v657_v17 = vld [vmem:[%s6414_s19 + $0x888] sm:$0xff] }
  0x3a   : > { %650 = vst [vmem:[%s6422_s20 + $0x268] sm:$0xff] %v649_v13  ;;  %652 = vst [vmem:[%s6422_s20 + $0x270] sm:$0xff] %v651_v14  ;;  %v659_v18 = vld [vmem:[%s6414_s19 + $0x890] sm:$0xff]  ;;  %v661_v19 = vld [vmem:[%s6414_s19 + $0x898] sm:$0xff] }
  0x3b   : > { %654 = vst [vmem:[%s6422_s20 + $0x278] sm:$0xff] %v653_v15  ;;  %656 = vst [vmem:[%s6422_s20 + $0x280] sm:$0xff] %v655_v16  ;;  %v663_v20 = vld [vmem:[%s6414_s19 + $0x8a0] sm:$0xff]  ;;  %v665_v21 = vld [vmem:[%s6414_s19 + $0x8a8] sm:$0xff] }
  0x3c   : > { %658 = vst [vmem:[%s6422_s20 + $0x288] sm:$0xff] %v657_v17  ;;  %660 = vst [vmem:[%s6422_s20 + $0x290] sm:$0xff] %v659_v18  ;;  %v667_v22 = vld [vmem:[%s6414_s19 + $0x8b0] sm:$0xff]  ;;  %v669_v23 = vld [vmem:[%s6414_s19 + $0x8b8] sm:$0xff] }
  0x3d   : > { %662 = vst [vmem:[%s6422_s20 + $0x298] sm:$0xff] %v661_v19  ;;  %664 = vst [vmem:[%s6422_s20 + $0x2a0] sm:$0xff] %v663_v20  ;;  %v671_v24 = vld [vmem:[%s6414_s19 + $0x8c0] sm:$0xff]  ;;  %v673_v25 = vld [vmem:[%s6414_s19 + $0x8c8] sm:$0xff] }
  0x3e   : > { %666 = vst [vmem:[%s6422_s20 + $0x2a8] sm:$0xff] %v665_v21  ;;  %668 = vst [vmem:[%s6422_s20 + $0x2b0] sm:$0xff] %v667_v22  ;;  %v675_v26 = vld [vmem:[%s6414_s19 + $0x8d0] sm:$0xff]  ;;  %v677_v27 = vld [vmem:[%s6414_s19 + $0x8d8] sm:$0xff] }
  0x3f   : > { %670 = vst [vmem:[%s6422_s20 + $0x2b8] sm:$0xff] %v669_v23  ;;  %672 = vst [vmem:[%s6422_s20 + $0x2c0] sm:$0xff] %v671_v24  ;;  %v679_v28 = vld [vmem:[%s6414_s19 + $0x8e0] sm:$0xff]  ;;  %v681_v29 = vld [vmem:[%s6414_s19 + $0x8e8] sm:$0xff] }
  0x40   : > { %674 = vst [vmem:[%s6422_s20 + $0x2c8] sm:$0xff] %v673_v25  ;;  %676 = vst [vmem:[%s6422_s20 + $0x2d0] sm:$0xff] %v675_v26  ;;  %v683_v30 = vld [vmem:[%s6414_s19 + $0x8f0] sm:$0xff]  ;;  %v685_v31 = vld [vmem:[%s6414_s19 + $0x8f8] sm:$0xff] }
  0x41   : > { %678 = vst [vmem:[%s6422_s20 + $0x2d8] sm:$0xff] %v677_v27  ;;  %680 = vst [vmem:[%s6422_s20 + $0x2e0] sm:$0xff] %v679_v28 }
  0x42   : > { %682 = vst [vmem:[%s6422_s20 + $0x2e8] sm:$0xff] %v681_v29  ;;  %684 = vst [vmem:[%s6422_s20 + $0x2f0] sm:$0xff] %v683_v30 }
  0x43   : > { %686 = vst [vmem:[%s6422_s20 + $0x2f8] sm:$0xff] %v685_v31 }
  0x44 PF: > { %p5052_p7 = scmp.ge.s32.totalorder %s6326_s29, 1  ;;  %p691_p8 = scmp.lt.s32.totalorder %s6326_s29, 5 }
  0x46   : > { %p692_p9 = pnand %p5052_p7, %p691_p8 }
  0x48   : > { %695 = sbr.rel (%p692_p9) target bundleno = 1031 (0x407), region = 82 }
  0x4d   : > { %v883_v32 = vld [vmem:[%s9519_s2 + $0x8] sm:$0xff]  ;;  %v882_v33 = vld [vmem:[%s9519_s2] sm:$0xff]  ;;  %s698_s25 = sand.u32 1, %s6318_s27   ;;  %vm884_vm0 = vcmask 130048   ;;  %s5053_s15 = sshll.u32 %s6389_s30, 5  ;;  %vm2461_vm1 = vcmask 261120  }
  0x4e   : > { %5618 = vmatprep.subr.mxu0 %v883_v32  ;;  %s6619_s26 = smul.u32 768, %s698_s25  ;;  %p741_p10 = scmp.lt.s32.totalorder %s5053_s15, 127 }
  0x4f   : > { %5619 = vmatpush3.msra.mxu0 %v883_v32 }
  0x50   : > { %5620 = vmatprep.subr.mxu0 %v882_v33  ;;  %s6622_s29 = scalar_lea.vmem [#allocation2], %s6619_s26  ;;  %s9931_s15 = smov (!%p741_p10, %s5053_s15), 127 }
  0x51   : > { %5621 = vmatpush3.msra.mxu0 %v882_v33  ;;  %v786_v34 = vld [vmem:[%s6622_s29] sm:$0xff]  ;;  %v787_v35 = vld [vmem:[%s6622_s29 + $0x8] sm:$0xff]  ;;  %v788_v36 = vld [vmem:[%s6622_s29 + $0x10] sm:$0xff]  ;;  %s5054_s24 = sshll.u32 %s9931_s15, 3  ;;  %s8751_s15 = scalar_lea.vmem [#allocation3], %s6619_s26 }
  0x52   : > { %5622 = vmatprep.mubr.msk.f32.mxu0 %vm884_vm0, %v786_v34  ;;  %v789_v37 = vld [vmem:[%s6622_s29 + $0x18] sm:$0xff]  ;;  %v790_v38 = vld [vmem:[%s6622_s29 + $0x20] sm:$0xff]  ;;  %v791_v39 = vld [vmem:[%s6622_s29 + $0x28] sm:$0xff]  ;;  %s6871_s27 = scalar_lea.vmem %s9517_s0, %s5054_s24  ;;  %s7941_s21 = scalar_lea.vmem %s9524_s7, %s5054_s24 }
  0x53   : > { %5623 = vmatmul.mubr.msk.f32.vlgmr.msra.gmra.mxu0 %vm884_vm0, %v787_v35  ;;  %v792_v40 = vld [vmem:[%s6622_s29 + $0x30] sm:$0xff]  ;;  %v793_v41 = vld [vmem:[%s6622_s29 + $0x38] sm:$0xff]  ;;  %v794_v42 = vld [vmem:[%s6622_s29 + $0x40] sm:$0xff]  ;;  %s5351_s26 = sshll.u32 (%p6404_p5), %s6389_s30, 8 }
  0x54   : > { %5625 = vmatprep.mubr.msk.f32.mxu0 %vm884_vm0, %v788_v36  ;;  %v795_v43 = vld [vmem:[%s6622_s29 + $0x48] sm:$0xff]  ;;  %v796_v44 = vld [vmem:[%s6622_s29 + $0x50] sm:$0xff]  ;;  %v797_v45 = vld [vmem:[%s6622_s29 + $0x58] sm:$0xff]  ;;  %s9316_s24 = scalar_lea.vmem (%p6404_p5), %s9525_s8, %s5351_s26 }
  0x55   : > { %v798_v46 = vld [vmem:[%s6622_s29 + $0x60] sm:$0xff]  ;;  %v799_v47 = vld [vmem:[%s6622_s29 + $0x68] sm:$0xff]  ;;  %v800_v48 = vld [vmem:[%s6622_s29 + $0x70] sm:$0xff] }
  0x56   : > { %v801_v49 = vld [vmem:[%s6622_s29 + $0x78] sm:$0xff]  ;;  %v802_v50 = vld [vmem:[%s6622_s29 + $0x80] sm:$0xff]  ;;  %v803_v51 = vld [vmem:[%s6622_s29 + $0x88] sm:$0xff] }
  0x57   : > { %5626 = vmatmul.mubr.msk.f32.gmra.mxu0 %vm884_vm0, %v789_v37  ;;  %v804_v52 = vld [vmem:[%s6622_s29 + $0x90] sm:$0xff]  ;;  %v805_v53 = vld [vmem:[%s6622_s29 + $0x98] sm:$0xff]  ;;  %v806_v54 = vld [vmem:[%s6622_s29 + $0xa0] sm:$0xff] }
  0x58   : > { %5628 = vmatprep.mubr.msk.f32.mxu0 %vm884_vm0, %v790_v38  ;;  %v807_v55 = vld [vmem:[%s6622_s29 + $0xa8] sm:$0xff]  ;;  %v808_v56 = vld [vmem:[%s6622_s29 + $0xb0] sm:$0xff]  ;;  %v809_v57 = vld [vmem:[%s6622_s29 + $0xb8] sm:$0xff] }
  0x59   : > { %v810_v58 = vld [vmem:[%s6622_s29 + $0xc0] sm:$0xff]  ;;  %v811_v59 = vld [vmem:[%s6622_s29 + $0xc8] sm:$0xff]  ;;  %v812_v60 = vld [vmem:[%s6622_s29 + $0xd0] sm:$0xff] }
  0x5a   : > { %v813_v61 = vld [vmem:[%s6622_s29 + $0xd8] sm:$0xff]  ;;  %v814_v62 = vld [vmem:[%s6622_s29 + $0xe0] sm:$0xff]  ;;  %v815_v63 = vld [vmem:[%s6622_s29 + $0xe8] sm:$0xff] }
  0x5b   : > { %5629 = vmatmul.mubr.msk.f32.gmra.mxu0 %vm884_vm0, %v791_v39  ;;  %v816_v0 = vld [vmem:[%s6622_s29 + $0xf0] sm:$0xff]  ;;  %v817_v1 = vld [vmem:[%s6622_s29 + $0xf8] sm:$0xff]  ;;  %v818_v2 = vld [vmem:[%s6622_s29 + $0x100] sm:$0xff] }
  0x5c   : > { %5631 = vmatprep.mubr.msk.f32.mxu0 %vm884_vm0, %v792_v40  ;;  %v819_v3 = vld [vmem:[%s6622_s29 + $0x108] sm:$0xff]  ;;  %v820_v4 = vld [vmem:[%s6622_s29 + $0x110] sm:$0xff]  ;;  %v821_v5 = vld [vmem:[%s6622_s29 + $0x118] sm:$0xff] }
  0x5d   : > { %v822_v6 = vld [vmem:[%s6622_s29 + $0x120] sm:$0xff]  ;;  %v823_v7 = vld [vmem:[%s6622_s29 + $0x128] sm:$0xff]  ;;  %v824_v8 = vld [vmem:[%s6622_s29 + $0x130] sm:$0xff] }
  0x5e   : > { %v825_v9 = vld [vmem:[%s6622_s29 + $0x138] sm:$0xff]  ;;  %v826_v10 = vld [vmem:[%s6622_s29 + $0x140] sm:$0xff]  ;;  %v827_v11 = vld [vmem:[%s6622_s29 + $0x148] sm:$0xff] }
  0x5f   : > { %5632 = vmatmul.mubr.msk.f32.gmra.mxu0 %vm884_vm0, %v793_v41  ;;  %v828_v12 = vld [vmem:[%s6622_s29 + $0x150] sm:$0xff]  ;;  %v829_v13 = vld [vmem:[%s6622_s29 + $0x158] sm:$0xff]  ;;  %v830_v14 = vld [vmem:[%s6622_s29 + $0x160] sm:$0xff] }
  0x60   : > { %5634 = vmatprep.mubr.msk.f32.mxu0 %vm884_vm0, %v794_v42  ;;  %v831_v15 = vld [vmem:[%s6622_s29 + $0x168] sm:$0xff]  ;;  %v832_v16 = vld [vmem:[%s6622_s29 + $0x170] sm:$0xff]  ;;  %v833_v17 = vld [vmem:[%s6622_s29 + $0x178] sm:$0xff] }
  0x61   : > { %v834_v18 = vld [vmem:[%s6622_s29 + $0x180] sm:$0xff]  ;;  %v835_v19 = vld [vmem:[%s6622_s29 + $0x188] sm:$0xff]  ;;  %v836_v20 = vld [vmem:[%s6622_s29 + $0x190] sm:$0xff] }
  0x62   : > { %v837_v21 = vld [vmem:[%s6622_s29 + $0x198] sm:$0xff]  ;;  %v838_v22 = vld [vmem:[%s6622_s29 + $0x1a0] sm:$0xff]  ;;  %v839_v23 = vld [vmem:[%s6622_s29 + $0x1a8] sm:$0xff] }
  0x63   : > { %5635 = vmatmul.mubr.msk.f32.gmra.mxu0 %vm884_vm0, %v795_v43  ;;  %v840_v24 = vld [vmem:[%s6622_s29 + $0x1b0] sm:$0xff]  ;;  %v841_v25 = vld [vmem:[%s6622_s29 + $0x1b8] sm:$0xff]  ;;  %v842_v26 = vld [vmem:[%s6622_s29 + $0x1c0] sm:$0xff] }
  0x64   : > { %5637 = vmatprep.mubr.msk.f32.mxu0 %vm884_vm0, %v796_v44  ;;  %v843_v27 = vld [vmem:[%s6622_s29 + $0x1c8] sm:$0xff]  ;;  %v844_v28 = vld [vmem:[%s6622_s29 + $0x1d0] sm:$0xff]  ;;  %v845_v29 = vld [vmem:[%s6622_s29 + $0x1d8] sm:$0xff] }
  0x65   : > { %v846_v30 = vld [vmem:[%s6622_s29 + $0x1e0] sm:$0xff]  ;;  %v847_v31 = vld [vmem:[%s6622_s29 + $0x1e8] sm:$0xff]  ;;  %v848_v32 = vld [vmem:[%s6622_s29 + $0x1f0] sm:$0xff] }
  0x66   : > { %v849_v33 = vld [vmem:[%s6622_s29 + $0x1f8] sm:$0xff]  ;;  %v850_v34 = vld [vmem:[%s6622_s29 + $0x200] sm:$0xff]  ;;  %v851_v35 = vld [vmem:[%s6622_s29 + $0x208] sm:$0xff] }
  0x67   : > { %5638 = vmatmul.mubr.msk.f32.gmra.mxu0 %vm884_vm0, %v797_v45  ;;  %v852_v36 = vld [vmem:[%s6622_s29 + $0x210] sm:$0xff]  ;;  %v853_v37 = vld [vmem:[%s6622_s29 + $0x218] sm:$0xff]  ;;  %v854_v38 = vld [vmem:[%s6622_s29 + $0x220] sm:$0xff] }
  0x68   : > { %5640 = vmatprep.mubr.msk.f32.mxu0 %vm884_vm0, %v798_v46  ;;  %v855_v39 = vld [vmem:[%s6622_s29 + $0x228] sm:$0xff]  ;;  %v856_v40 = vld [vmem:[%s6622_s29 + $0x230] sm:$0xff]  ;;  %v857_v41 = vld [vmem:[%s6622_s29 + $0x238] sm:$0xff] }
  0x69   : > { %v858_v42 = vld [vmem:[%s6622_s29 + $0x240] sm:$0xff]  ;;  %v859_v43 = vld [vmem:[%s6622_s29 + $0x248] sm:$0xff]  ;;  %v860_v44 = vld [vmem:[%s6622_s29 + $0x250] sm:$0xff] }
  0x6a   : > { %v861_v45 = vld [vmem:[%s6622_s29 + $0x258] sm:$0xff]  ;;  %v862_v46 = vld [vmem:[%s6622_s29 + $0x260] sm:$0xff] }
  0x6b   : > { %5641 = vmatmul.mubr.msk.f32.gmra.mxu0 %vm884_vm0, %v799_v47  ;;  %v863_v47 = vld [vmem:[%s6622_s29 + $0x268] sm:$0xff] }
  0x6c   : > { %5643 = vmatprep.mubr.msk.f32.mxu0 %vm884_vm0, %v800_v48  ;;  %v864_v48 = vld [vmem:[%s6622_s29 + $0x270] sm:$0xff] }
  0x6f   : > { %5644 = vmatmul.mubr.msk.f32.gmra.mxu0 %vm884_vm0, %v801_v49  ;;  %v865_v49 = vld [vmem:[%s6622_s29 + $0x278] sm:$0xff] }
  0x70   : > { %5646 = vmatprep.mubr.msk.f32.mxu0 %vm884_vm0, %v802_v50  ;;  %v866_v50 = vld [vmem:[%s6622_s29 + $0x280] sm:$0xff] }
  0x73   : > { %5647 = vmatmul.mubr.msk.f32.gmra.mxu0 %vm884_vm0, %v803_v51  ;;  %v867_v51 = vld [vmem:[%s6622_s29 + $0x288] sm:$0xff] }
  0x74   : > { %5649 = vmatprep.mubr.msk.f32.mxu0 %vm884_vm0, %v804_v52  ;;  %v868_v52 = vld [vmem:[%s6622_s29 + $0x290] sm:$0xff] }
  0x77   : > { %5650 = vmatmul.mubr.msk.f32.gmra.mxu0 %vm884_vm0, %v805_v53  ;;  %v869_v53 = vld [vmem:[%s6622_s29 + $0x298] sm:$0xff] }
  0x78   : > { %5652 = vmatprep.mubr.msk.f32.mxu0 %vm884_vm0, %v806_v54  ;;  %v870_v54 = vld [vmem:[%s6622_s29 + $0x2a0] sm:$0xff] }
  0x7b   : > { %5653 = vmatmul.mubr.msk.f32.gmra.mxu0 %vm884_vm0, %v807_v55  ;;  %v871_v55 = vld [vmem:[%s6622_s29 + $0x2a8] sm:$0xff] }
  0x7c   : > { %5655 = vmatprep.mubr.msk.f32.mxu0 %vm884_vm0, %v808_v56  ;;  %v872_v56 = vld [vmem:[%s6622_s29 + $0x2b0] sm:$0xff] }
  0x7f   : > { %5656 = vmatmul.mubr.msk.f32.gmra.mxu0 %vm884_vm0, %v809_v57  ;;  %v873_v57 = vld [vmem:[%s6622_s29 + $0x2b8] sm:$0xff] }
  0x80   : > { %5658 = vmatprep.mubr.msk.f32.mxu0 %vm884_vm0, %v810_v58  ;;  %v874_v58 = vld [vmem:[%s6622_s29 + $0x2c0] sm:$0xff] }
  0x83   : > { %5659 = vmatmul.mubr.msk.f32.gmra.mxu0 %vm884_vm0, %v811_v59  ;;  %v875_v59 = vld [vmem:[%s6622_s29 + $0x2c8] sm:$0xff] }
  0x84   : > { %5661 = vmatprep.mubr.msk.f32.mxu0 %vm884_vm0, %v812_v60  ;;  %v876_v60 = vld [vmem:[%s6622_s29 + $0x2d0] sm:$0xff] }
  0x87   : > { %5662 = vmatmul.mubr.msk.f32.gmra.mxu0 %vm884_vm0, %v813_v61  ;;  %v877_v61 = vld [vmem:[%s6622_s29 + $0x2d8] sm:$0xff] }
  0x88   : > { %5664 = vmatprep.mubr.msk.f32.mxu0 %vm884_vm0, %v814_v62  ;;  %v878_v62 = vld [vmem:[%s6622_s29 + $0x2e0] sm:$0xff] }
  0x8b   : > { %5665 = vmatmul.mubr.msk.f32.gmra.mxu0 %vm884_vm0, %v815_v63  ;;  %v879_v63 = vld [vmem:[%s6622_s29 + $0x2e8] sm:$0xff] }
  0x8c   : > { %5667 = vmatprep.mubr.msk.f32.mxu0 %vm884_vm0, %v816_v0  ;;  %v880_v0 = vld [vmem:[%s6622_s29 + $0x2f0] sm:$0xff] }
  0x8f   : > { %5668 = vmatmul.mubr.msk.f32.gmra.mxu0 %vm884_vm0, %v817_v1  ;;  %v881_v1 = vld [vmem:[%s6622_s29 + $0x2f8] sm:$0xff] }
  0x90   : > { %5670 = vmatprep.mubr.msk.f32.mxu0 %vm884_vm0, %v818_v2 }
  0x93   : > { %5671 = vmatmul.mubr.msk.f32.gmra.mxu0 %vm884_vm0, %v819_v3 }
  0x94   : > { %5673 = vmatprep.mubr.msk.f32.mxu0 %vm884_vm0, %v820_v4 }
  0x97   : > { %5674 = vmatmul.mubr.msk.f32.gmra.mxu0 %vm884_vm0, %v821_v5 }
  0x98   : > { %5676 = vmatprep.mubr.msk.f32.mxu0 %vm884_vm0, %v822_v6 }
  0x9b   : > { %5677 = vmatmul.mubr.msk.f32.gmra.mxu0 %vm884_vm0, %v823_v7 }
  0x9c   : > { %5679 = vmatprep.mubr.msk.f32.mxu0 %vm884_vm0, %v824_v8 }
  0x9f   : > { %5680 = vmatmul.mubr.msk.f32.gmra.mxu0 %vm884_vm0, %v825_v9 }
  0xa0   : > { %5682 = vmatprep.mubr.msk.f32.mxu0 %vm884_vm0, %v826_v10 }
  0xa3   : > { %5683 = vmatmul.mubr.msk.f32.gmra.mxu0 %vm884_vm0, %v827_v11 }
  0xa4   : > { %5685 = vmatprep.mubr.msk.f32.mxu0 %vm884_vm0, %v828_v12  ;;  %v2137_v12 = vld [vmem:[%s9520_s3 + $0x18] sm:$0xff] }
  0xa5   : > { %5818 = vmatprep.subr.mxu0 %v2137_v12 }
  0xa6   : > { %5819 = vmatpush3.msra.mxu0 %v2137_v12  ;;  %v774_v12 = vld [vmem:[%s6871_s27 + $0xa0] sm:$0xff] }
  0xa7   : > { %5686 = vmatmul.mubr.msk.f32.gmra.mxu0 %vm884_vm0, %v829_v13 }
  0xa8   : > { %5688 = vmatprep.mubr.msk.f32.mxu0 %vm884_vm0, %v830_v14  ;;  %v2136_v14 = vld [vmem:[%s9520_s3 + $0x10] sm:$0xff] }
  0xa9   : > { %5820 = vmatprep.subr.mxu0 %v2136_v14 }
  0xaa   : > { %5821 = vmatpush3.msra.mxu0 %v2136_v14 }
  0xab   : > { %5689 = vmatmul.mubr.msk.f32.gmra.mxu0 %vm884_vm0, %v831_v15 }
  0xac   : > { %5691 = vmatprep.mubr.msk.f32.mxu0 %vm884_vm0, %v832_v16  ;;  %v2139_v16 = vld [vmem:[%s9521_s4 + $0x8] sm:$0xff] }
  0xad   : > { %5766 = vmatprep.subr.mxu1 %v2139_v16 }
  0xae   : > { %5767 = vmatpush3.msra.mxu1 %v2139_v16  ;;  %v775_v16 = vld [vmem:[%s6871_s27 + $0xa8] sm:$0xff] }
  0xaf   : > { %5692 = vmatmul.mubr.msk.f32.gmra.mxu0 %vm884_vm0, %v833_v17  ;;  %v2135_v17 = vld [vmem:[%s9520_s3 + $0x8] sm:$0xff] }
  0xb0   : > { %5694 = vmatprep.mubr.msk.f32.mxu0 %vm884_vm0, %v834_v18  ;;  %5822 = vmatprep.subr.mxu0 %v2135_v17 }
  0xb1   : > { %5823 = vmatpush3.msra.mxu0 %v2135_v17  ;;  %v776_v17 = vld [vmem:[%s6871_s27 + $0xb0] sm:$0xff] }
  0xb3   : > { %5695 = vmatmul.mubr.msk.f32.gmra.mxu0 %vm884_vm0, %v835_v19  ;;  %v2138_v19 = vld [vmem:[%s9521_s4] sm:$0xff] }
  0xb4   : > { %5697 = vmatprep.mubr.msk.f32.mxu0 %vm884_vm0, %v836_v20  ;;  %v2134_v20 = vld [vmem:[%s9520_s3] sm:$0xff]  ;;  %5768 = vmatprep.subr.mxu1 %v2138_v19 }
  0xb5   : > { %5824 = vmatprep.subr.mxu0 %v2134_v20  ;;  %5769 = vmatpush3.msra.mxu1 %v2138_v19 }
  0xb6   : > { %5825 = vmatpush3.msra.mxu0 %v2134_v20 }
  0xb7   : > { %5698 = vmatmul.mubr.msk.f32.gmra.mxu0 %vm884_vm0, %v837_v21 }
  0xb8   : > { %5700 = vmatprep.mubr.msk.f32.mxu0 %vm884_vm0, %v838_v22 }
  0xbb   : > { %5701 = vmatmul.mubr.msk.f32.gmra.mxu0 %vm884_vm0, %v839_v23  ;;  %v754_v23 = vld [vmem:[%s6871_s27] sm:$0xff] }
  0xbc   : > { %5703 = vmatprep.mubr.msk.f32.mxu0 %vm884_vm0, %v840_v24  ;;  %v755_v24 = vld [vmem:[%s6871_s27 + $0x8] sm:$0xff] }
  0xbf   : > { %5704 = vmatmul.mubr.msk.f32.gmra.mxu0 %vm884_vm0, %v841_v25 }
  0xc0   : > { %5706 = vmatprep.mubr.msk.f32.mxu0 %vm884_vm0, %v842_v26 }
  0xc3   : > { %5707 = vmatmul.mubr.msk.f32.gmra.mxu0 %vm884_vm0, %v843_v27  ;;  %v756_v27 = vld [vmem:[%s6871_s27 + $0x10] sm:$0xff] }
  0xc4   : > { %5709 = vmatprep.mubr.msk.f32.mxu0 %vm884_vm0, %v844_v28  ;;  %v6887_v28 = vld [vmem:[%s9523_s6 + $0x8] sm:$0xff] }
  0xc5   : > { %9667 = vst [vmem:[#allocation21_spill] sm:$0xff] %v6887_v28  ;;  %5874 = vmatprep.subr.mxu1 %v6887_v28 }
  0xc7   : > { %5710 = vmatmul.mubr.msk.f32.gmra.mxu0 %vm884_vm0, %v845_v29  ;;  %v757_v29 = vld [vmem:[%s6871_s27 + $0x18] sm:$0xff] }
  0xc8   : > { %5712 = vmatprep.mubr.msk.f32.mxu0 %vm884_vm0, %v846_v30 }
  0xcb   : > { %5713 = vmatmul.mubr.msk.f32.gmra.mxu0 %vm884_vm0, %v847_v31 }
  0xcc   : > { %5715 = vmatprep.mubr.msk.f32.mxu0 %vm884_vm0, %v848_v32  ;;  %v758_v32 = vld [vmem:[%s6871_s27 + $0x20] sm:$0xff] }
  0xcf   : > { %5716 = vmatmul.mubr.msk.f32.gmra.mxu0 %vm884_vm0, %v849_v33  ;;  %v759_v33 = vld [vmem:[%s6871_s27 + $0x28] sm:$0xff] }
  0xd0   : > { %5718 = vmatprep.mubr.msk.f32.mxu0 %vm884_vm0, %v850_v34 }
  0xd3   : > { %5719 = vmatmul.mubr.msk.f32.gmra.mxu0 %vm884_vm0, %v851_v35 }
  0xd4   : > { %5721 = vmatprep.mubr.msk.f32.mxu0 %vm884_vm0, %v852_v36  ;;  %v760_v36 = vld [vmem:[%s6871_s27 + $0x30] sm:$0xff] }
  0xd7   : > { %5722 = vmatmul.mubr.msk.f32.gmra.mxu0 %vm884_vm0, %v853_v37  ;;  %v761_v37 = vld [vmem:[%s6871_s27 + $0x38] sm:$0xff] }
  0xd8   : > { %5724 = vmatprep.mubr.msk.f32.mxu0 %vm884_vm0, %v854_v38 }
  0xdb   : > { %5725 = vmatmul.mubr.msk.f32.gmra.mxu0 %vm884_vm0, %v855_v39 }
  0xdc   : > { %5727 = vmatprep.mubr.msk.f32.mxu0 %vm884_vm0, %v856_v40 }
  0xdf   : > { %5728 = vmatmul.mubr.msk.f32.gmra.mxu0 %vm884_vm0, %v857_v41  ;;  %v762_v41 = vld [vmem:[%s6871_s27 + $0x40] sm:$0xff] }
  0xe0   : > { %5730 = vmatprep.mubr.msk.f32.mxu0 %vm884_vm0, %v858_v42 }
  0xe3   : > { %5731 = vmatmul.mubr.msk.f32.gmra.mxu0 %vm884_vm0, %v859_v43 }
  0xe4   : > { %5733 = vmatprep.mubr.msk.f32.mxu0 %vm884_vm0, %v860_v44  ;;  %v763_v44 = vld [vmem:[%s6871_s27 + $0x48] sm:$0xff] }
  0xe7   : > { %5734 = vmatmul.mubr.msk.f32.gmra.mxu0 %vm884_vm0, %v861_v45 }
  0xe8   : > { %5736 = vmatprep.mubr.msk.f32.mxu0 %vm884_vm0, %v862_v46  ;;  %v764_v46 = vld [vmem:[%s6871_s27 + $0x50] sm:$0xff] }
  0xeb   : > { %5737 = vmatmul.mubr.msk.f32.gmra.mxu0 %vm884_vm0, %v863_v47 }
  0xec   : > { %5739 = vmatprep.mubr.msk.f32.mxu0 %vm884_vm0, %v864_v48  ;;  %v765_v48 = vld [vmem:[%s6871_s27 + $0x58] sm:$0xff] }
  0xef   : > { %5740 = vmatmul.mubr.msk.f32.gmra.mxu0 %vm884_vm0, %v865_v49 }
  0xf0   : > { %5742 = vmatprep.mubr.msk.f32.mxu0 %vm884_vm0, %v866_v50  ;;  %v766_v50 = vld [vmem:[%s6871_s27 + $0x60] sm:$0xff] }
  0xf3   : > { %5743 = vmatmul.mubr.msk.f32.gmra.mxu0 %vm884_vm0, %v867_v51 }
  0xf4   : > { %5745 = vmatprep.mubr.msk.f32.mxu0 %vm884_vm0, %v868_v52  ;;  %v767_v52 = vld [vmem:[%s6871_s27 + $0x68] sm:$0xff] }
  0xf7   : > { %5746 = vmatmul.mubr.msk.f32.gmra.mxu0 %vm884_vm0, %v869_v53 }
  0xf8   : > { %5748 = vmatprep.mubr.msk.f32.mxu0 %vm884_vm0, %v870_v54  ;;  %v768_v54 = vld [vmem:[%s6871_s27 + $0x70] sm:$0xff] }
  0xfb   : > { %5749 = vmatmul.mubr.msk.f32.gmra.mxu0 %vm884_vm0, %v871_v55 }
  0xfc   : > { %5751 = vmatprep.mubr.msk.f32.mxu0 %vm884_vm0, %v872_v56  ;;  %v769_v56 = vld [vmem:[%s6871_s27 + $0x78] sm:$0xff] }
  0xff   : > { %5752 = vmatmul.mubr.msk.f32.gmra.mxu0 %vm884_vm0, %v873_v57 }
 0x100   : > { %5754 = vmatprep.mubr.msk.f32.mxu0 %vm884_vm0, %v874_v58  ;;  %v770_v58 = vld [vmem:[%s6871_s27 + $0x80] sm:$0xff] }
 0x103   : > { %5755 = vmatmul.mubr.msk.f32.gmra.mxu0 %vm884_vm0, %v875_v59 }
 0x104   : > { %5757 = vmatprep.mubr.msk.f32.mxu0 %vm884_vm0, %v876_v60  ;;  %v771_v60 = vld [vmem:[%s6871_s27 + $0x88] sm:$0xff] }
 0x107   : > { %5758 = vmatmul.mubr.msk.f32.gmra.mxu0 %vm884_vm0, %v877_v61 }
 0x108   : > { %5760 = vmatprep.mubr.msk.f32.mxu0 %vm884_vm0, %v878_v62 }
 0x10b   : > { %5761 = vmatmul.mubr.msk.f32.gmra.mxu0 %vm884_vm0, %v879_v63  ;;  %v772_v63 = vld [vmem:[%s6871_s27 + $0x90] sm:$0xff] }
 0x10c   : > { %5763 = vmatprep.mubr.msk.f32.mxu0 %vm884_vm0, %v880_v0  ;;  %v773_v0 = vld [vmem:[%s6871_s27 + $0x98] sm:$0xff] }
 0x10f   : > { %5764 = vmatmul.mubr.msk.f32.gmra.mxu0 %vm884_vm0, %v881_v1 }
 0x110   : > { %5826 = vmatprep.mubr.msk.f32.mxu0 %vm2461_vm1, %v754_v23  ;;  %v777_v23 = vld [vmem:[%s6871_s27 + $0xb8] sm:$0xff] }
 0x113   : > { %v6816_v2 = vpop.f32.mrf.mxu0  ;;  %5827 = vmatmul.mubr.msk.f32.vlgmr.msra.gmra.mxu0 %vm2461_vm1, %v755_v24  ;;  %v778_v24 = vld [vmem:[%s6871_s27 + $0xc0] sm:$0xff] }
 0x114   : > { %9650 = vst [vmem:[#allocation4_spill] sm:$0xff] %v6816_v2  ;;  %5829 = vmatprep.mubr.msk.f32.mxu0 %vm2461_vm1, %v756_v27 }
 0x115   : > { %v6818_v3 = vpop.f32.mrf.mxu0 }
 0x116   : > { %9651 = vst [vmem:[#allocation5_spill] sm:$0xff] %v6818_v3 }
 0x117   : > { %v6820_v4 = vpop.f32.mrf.mxu0  ;;  %5830 = vmatmul.mubr.msk.f32.gmra.mxu0 %vm2461_vm1, %v757_v29 }
 0x118   : > { %9652 = vst [vmem:[#allocation6_spill] sm:$0xff] %v6820_v4  ;;  %5832 = vmatprep.mubr.msk.f32.mxu0 %vm2461_vm1, %v758_v32  ;;  %v779_v32 = vld [vmem:[%s6871_s27 + $0xc8] sm:$0xff] }
 0x119   : > { %v6822_v5 = vpop.f32.mrf.mxu0 }
 0x11a   : > { %9653 = vst [vmem:[#allocation7_spill] sm:$0xff] %v6822_v5 }
 0x11b   : > { %v6824_v6 = vpop.f32.mrf.mxu0  ;;  %5833 = vmatmul.mubr.msk.f32.gmra.mxu0 %vm2461_vm1, %v759_v33  ;;  %v780_v33 = vld [vmem:[%s6871_s27 + $0xd0] sm:$0xff] }
 0x11c   : > { %9654 = vst [vmem:[#allocation8_spill] sm:$0xff] %v6824_v6  ;;  %5835 = vmatprep.mubr.msk.f32.mxu0 %vm2461_vm1, %v760_v36 }
 0x11d   : > { %v6826_v7 = vpop.f32.mrf.mxu0 }
 0x11e   : > { %9655 = vst [vmem:[#allocation9_spill] sm:$0xff] %v6826_v7  ;;  %v1722_v28 = vmul.f32 %v6826_v7, %v6826_v7 }
 0x11f   : > { %v6828_v8 = vpop.f32.mrf.mxu0  ;;  %5836 = vmatmul.mubr.msk.f32.gmra.mxu0 %vm2461_vm1, %v761_v37 }
 0x120   : > { %9656 = vst [vmem:[#allocation10_spill] sm:$0xff] %v6828_v8  ;;  %5838 = vmatprep.mubr.msk.f32.mxu0 %vm2461_vm1, %v762_v41  ;;  %v781_v41 = vld [vmem:[%s6871_s27 + $0xd8] sm:$0xff] }
 0x121   : > { %v6830_v9 = vpop.f32.mrf.mxu0 }
 0x122   : > { %9657 = vst [vmem:[#allocation11_spill] sm:$0xff] %v6830_v9 }
 0x123   : > { %v6832_v10 = vpop.f32.mrf.mxu0  ;;  %5839 = vmatmul.mubr.msk.f32.gmra.mxu0 %vm2461_vm1, %v763_v44  ;;  %v782_v44 = vld [vmem:[%s6871_s27 + $0xe0] sm:$0xff] }
 0x124   : > { %9658 = vst [vmem:[#allocation12_spill] sm:$0xff] %v6832_v10  ;;  %5841 = vmatprep.mubr.msk.f32.mxu0 %vm2461_vm1, %v764_v46 }
 0x125   : > { %v6834_v11 = vpop.f32.mrf.mxu0 }
 0x126   : > { %9659 = vst [vmem:[#allocation13_spill] sm:$0xff] %v6834_v11 }
 0x127   : > { %v6839_v13 = vpop.f32.mrf.mxu0  ;;  %5842 = vmatmul.mubr.msk.f32.gmra.mxu0 %vm2461_vm1, %v765_v48 }
 0x128   : > { %9660 = vst [vmem:[#allocation14_spill] sm:$0xff] %v6839_v13  ;;  %5844 = vmatprep.mubr.msk.f32.mxu0 %vm2461_vm1, %v766_v50  ;;  %v783_v50 = vld [vmem:[%s6871_s27 + $0xe8] sm:$0xff] }
 0x129   : > { %v6845_v15 = vpop.f32.mrf.mxu0 }
 0x12a   : > { %9661 = vst [vmem:[#allocation15_spill] sm:$0xff] %v6845_v15  ;;  %v1728_v7 = vmul.f32 %v6845_v15, %v6845_v15 }
 0x12b   : > { %v6853_v18 = vpop.f32.mrf.mxu0  ;;  %5845 = vmatmul.mubr.msk.f32.gmra.mxu0 %vm2461_vm1, %v767_v52  ;;  %v784_v52 = vld [vmem:[%s6871_s27 + $0xf0] sm:$0xff] }
 0x12c   : > { %9662 = vst [vmem:[#allocation16_spill] sm:$0xff] %v6853_v18  ;;  %5847 = vmatprep.mubr.msk.f32.mxu0 %vm2461_vm1, %v768_v54 }
 0x12d   : > { %v6863_v21 = vpop.f32.mrf.mxu0 }
 0x12e   : > { %9663 = vst [vmem:[#allocation17_spill] sm:$0xff] %v6863_v21 }
 0x12f   : > { %v6873_v22 = vpop.f32.mrf.mxu0  ;;  %5848 = vmatmul.mubr.msk.f32.gmra.mxu0 %vm2461_vm1, %v769_v56 }
 0x130   : > { %9664 = vst [vmem:[#allocation18_spill] sm:$0xff] %v6873_v22  ;;  %5850 = vmatprep.mubr.msk.f32.mxu0 %vm2461_vm1, %v770_v58  ;;  %v785_v58 = vld [vmem:[%s6871_s27 + $0xf8] sm:$0xff] }
 0x131   : > { %v6878_v25 = vpop.f32.mrf.mxu0 }
 0x132   : > { %9665 = vst [vmem:[#allocation19_spill] sm:$0xff] %v6878_v25 }
 0x133   : > { %v6881_v26 = vpop.f32.mrf.mxu0  ;;  %5851 = vmatmul.mubr.msk.f32.gmra.mxu0 %vm2461_vm1, %v771_v60 }
 0x134   : > { %9666 = vst [vmem:[#allocation20_spill] sm:$0xff] %v6881_v26  ;;  %5853 = vmatprep.mubr.msk.f32.mxu0 %vm2461_vm1, %v772_v63 }
 0x135   : > { %v6891_v30 = vpop.f32.mrf.mxu0 }
 0x136   : > { %9668 = vst [vmem:[#allocation22_spill] sm:$0xff] %v6891_v30  ;;  %v7075_v15 = vmul.f32 %v6891_v30, %v6891_v30 }
 0x137   : > { %v6895_v31 = vpop.f32.mrf.mxu0  ;;  %5854 = vmatmul.mubr.msk.f32.gmra.mxu0 %vm2461_vm1, %v773_v0 }
 0x138   : > { %9669 = vst [vmem:[#allocation23_spill] sm:$0xff] %v6895_v31  ;;  %5856 = vmatprep.mubr.msk.f32.mxu0 %vm2461_vm1, %v774_v12 }
 0x139   : > { %v6900_v34 = vpop.f32.mrf.mxu0 }
 0x13a   : > { %9670 = vst [vmem:[#allocation24_spill] sm:$0xff] %v6900_v34 }
 0x13b   : > { %v6903_v35 = vpop.f32.mrf.mxu0  ;;  %5857 = vmatmul.mubr.msk.f32.gmra.mxu0 %vm2461_vm1, %v775_v16 }
 0x13c   : > { %9671 = vst [vmem:[#allocation25_spill] sm:$0xff] %v6903_v35  ;;  %5859 = vmatprep.mubr.msk.f32.mxu0 %vm2461_vm1, %v776_v17 }
 0x13d   : > { %v6908_v38 = vpop.f32.mrf.mxu0 }
 0x13e   : > { %9672 = vst [vmem:[#allocation26_spill] sm:$0xff] %v6908_v38 }
 0x13f   : > { %v6911_v39 = vpop.f32.mrf.mxu0  ;;  %5860 = vmatmul.mubr.msk.f32.gmra.mxu0 %vm2461_vm1, %v777_v23 }
 0x140   : > { %9673 = vst [vmem:[#allocation27_spill] sm:$0xff] %v6911_v39  ;;  %5862 = vmatprep.mubr.msk.f32.mxu0 %vm2461_vm1, %v778_v24  ;;  %v7095_v30 = vmul.f32 %v6911_v39, %v6911_v39 }
 0x141   : > { %v6913_v40 = vpop.f32.mrf.mxu0 }
 0x142   : > { %9674 = vst [vmem:[#allocation28_spill] sm:$0xff] %v6913_v40 }
 0x143   : > { %v6916_v42 = vpop.f32.mrf.mxu0  ;;  %5863 = vmatmul.mubr.msk.f32.gmra.mxu0 %vm2461_vm1, %v779_v32 }
 0x144   : > { %9675 = vst [vmem:[#allocation29_spill] sm:$0xff] %v6916_v42  ;;  %5865 = vmatprep.mubr.msk.f32.mxu0 %vm2461_vm1, %v780_v33 }
 0x145   : > { %v6919_v43 = vpop.f32.mrf.mxu0 }
 0x146   : > { %9676 = vst [vmem:[#allocation30_spill] sm:$0xff] %v6919_v43 }
 0x147   : > { %v6922_v45 = vpop.f32.mrf.mxu0  ;;  %5866 = vmatmul.mubr.msk.f32.gmra.mxu0 %vm2461_vm1, %v781_v41  ;;  %v1719_v41 = vmul.f32 %v6816_v2, %v6816_v2  ;;  %v1724_v2 = vmul.f32 %v6830_v9, %v6830_v9  ;;  %v1730_v9 = vmul.f32 %v6863_v21, %v6863_v21 }
 0x148   : > { %9677 = vst [vmem:[#allocation31_spill] sm:$0xff] %v6922_v45  ;;  %5868 = vmatprep.mubr.msk.f32.mxu0 %vm2461_vm1, %v782_v44  ;;  %v1718_v44 = vmul.f32 %v6818_v3, %v6818_v3  ;;  %v1733_v3 = vmul.f32 %v6873_v22, %v6873_v22  ;;  %v7083_v22 = vmul.f32 %v6900_v34, %v6900_v34 }
 0x149   : > { %v6926_v47 = vpop.f32.mrf.mxu0  ;;  %v7105_v34 = vmul.f32 %v6916_v42, %v6916_v42 }
 0x14a   : > { %9678 = vst [vmem:[#allocation32_spill] sm:$0xff] %v6926_v47 }
 0x14b   : > { %v6930_v49 = vpop.f32.mrf.mxu0  ;;  %5869 = vmatmul.mubr.msk.f32.gmra.mxu0 %vm2461_vm1, %v783_v50  ;;  %v1721_v50 = vmul.f32 %v6820_v4, %v6820_v4  ;;  %v1727_v4 = vmul.f32 %v6832_v10, %v6832_v10  ;;  %v7065_v10 = vmul.f32 %v6878_v25, %v6878_v25  ;;  %v7087_v25 = vmul.f32 %v6903_v35, %v6903_v35 }
 0x14c   : > { %9679 = vst [vmem:[#allocation33_spill] sm:$0xff] %v6930_v49  ;;  %5871 = vmatprep.mubr.msk.f32.mxu0 %vm2461_vm1, %v784_v52  ;;  %v1720_v52 = vmul.f32 %v6822_v5, %v6822_v5  ;;  %v1726_v5 = vmul.f32 %v6834_v11, %v6834_v11  ;;  %v7109_v35 = vmul.f32 %v6919_v43, %v6919_v43 }
 0x14d   : > { %v6934_v51 = vpop.f32.mrf.mxu0 }
 0x14e   : > { %9680 = vst [vmem:[#allocation34_spill] sm:$0xff] %v6934_v51  ;;  %9699 = vst [vmem:[#allocation53_spill] sm:$0xff] %v7109_v35 }
 0x14f   : > { %v6938_v53 = vpop.f32.mrf.mxu0  ;;  %5872 = vmatmul.mubr.msk.f32.gmra.mxu0 %vm2461_vm1, %v785_v58  ;;  %v1723_v58 = vmul.f32 %v6824_v6, %v6824_v6  ;;  %v1729_v6 = vmul.f32 %v6839_v13, %v6839_v13  ;;  %v7071_v13 = vmul.f32 %v6881_v26, %v6881_v26  ;;  %v7091_v26 = vmul.f32 %v6908_v38, %v6908_v38 }
 0x150   : > { %9681 = vst [vmem:[#allocation35_spill] sm:$0xff] %v6938_v53  ;;  %v7113_v38 = vmul.f32 %v6922_v45, %v6922_v45  ;;  %v7133_v45 = vmul.f32 %v6934_v51, %v6934_v51 }
 0x151   : > { %v6942_v55 = vpop.f32.mrf.mxu0 }
 0x152   : > { %9682 = vst [vmem:[#allocation36_spill] sm:$0xff] %v6942_v55  ;;  %9700 = vst [vmem:[#allocation54_spill] sm:$0xff] %v7113_v38 }
 0x153   : > { %v6946_v57 = vpop.f32.mrf.mxu0  ;;  %9704 = vst [vmem:[#allocation58_spill] sm:$0xff] %v7133_v45 }
 0x154   : > { %9683 = vst [vmem:[#allocation37_spill] sm:$0xff] %v6946_v57  ;;  %v1751_v39 = vmul.f32 %v6946_v57, %v6946_v57  ;;  %v7137_v57 = vmul.f32 %v6938_v53, %v6938_v53 }
 0x155   : > { %v6950_v59 = vpop.f32.mrf.mxu0 }
 0x156   : > { %9684 = vst [vmem:[#allocation38_spill] sm:$0xff] %v6950_v59  ;;  %v1750_v42 = vmul.f32 %v6950_v59, %v6950_v59  ;;  %9705 = vst [vmem:[#allocation59_spill] sm:$0xff] %v7137_v57  ;;  %v1783_v57 = vadd.f32 %v1751_v39, %v1719_v41 }
 0x157   : > { %v6954_v61 = vpop.f32.mrf.mxu0 }
 0x158   : > { %9685 = vst [vmem:[#allocation39_spill] sm:$0xff] %v6954_v61  ;;  %v1753_v43 = vmul.f32 %v6954_v61, %v6954_v61 }
 0x159   : > { %v6957_v62 = vpop.f32.mrf.mxu0 }
 0x15a   : > { %9686 = vst [vmem:[#allocation40_spill] sm:$0xff] %v6957_v62 }
 0x15b   : > { %v6962_v1 = vpop.f32.mrf.mxu0 }
 0x15c   : > { %9687 = vst [vmem:[#allocation41_spill] sm:$0xff] %v6962_v1 }
 0x15d   : > { %v6967_v14 = vpop.f32.mrf.mxu0 }
 0x15e   : > { %9688 = vst [vmem:[#allocation42_spill] sm:$0xff] %v6967_v14  ;;  %v1754_v59 = vmul.f32 %v6967_v14, %v6967_v14 }
 0x15f   : > { %v6971_v19 = vpop.f32.mrf.mxu0 }
 0x160   : > { %9689 = vst [vmem:[#allocation43_spill] sm:$0xff] %v6971_v19  ;;  %v1757_v61 = vmul.f32 %v6971_v19, %v6971_v19  ;;  %v1782_v19 = vadd.f32 %v1750_v42, %v1718_v44 }
 0x161   : > { %v6975_v20 = vpop.f32.mrf.mxu0 }
 0x162   : > { %9690 = vst [vmem:[#allocation44_spill] sm:$0xff] %v6975_v20  ;;  %v1756_v51 = vmul.f32 %v6975_v20, %v6975_v20 }
 0x163   : > { %v6979_v27 = vpop.f32.mrf.mxu0 }
 0x164   : > { %9691 = vst [vmem:[#allocation45_spill] sm:$0xff] %v6979_v27  ;;  %v1759_v45 = vmul.f32 %v6979_v27, %v6979_v27  ;;  %v7173_v42 = vadd.f32 %v1756_v51, %v1724_v2 }
 0x165   : > { %v6983_v29 = vpop.f32.mrf.mxu0 }
 0x166   : > { %9692 = vst [vmem:[#allocation46_spill] sm:$0xff] %v6983_v29 }
 0x167   : > { %v6987_v36 = vpop.f32.mrf.mxu0 }
 0x168   : > { %9693 = vst [vmem:[#allocation47_spill] sm:$0xff] %v6987_v36  ;;  %v1761_v14 = vmul.f32 %v6987_v36, %v6987_v36 }
 0x169   : > { %v6991_v37 = vpop.f32.mrf.mxu0 }
 0x16a   : > { %v1760_v20 = vmul.f32 %v6991_v37, %v6991_v37 }
 0x16b   : > { %v6995_v46 = vpop.f32.mrf.mxu0 }
 0x16c   : > { %9694 = vst [vmem:[#allocation48_spill] sm:$0xff] %v6995_v46  ;;  %v1763_v27 = vmul.f32 %v6995_v46, %v6995_v46  ;;  %v7181_v46 = vadd.f32 %v1761_v14, %v1729_v6 }
 0x16d   : > { %v6999_v48 = vpop.f32.mrf.mxu0 }
 0x16e   : > { %v1762_v39 = vmul.f32 %v6999_v48, %v6999_v48 }
 0x16f   : > { %v7003_v54 = vpop.f32.mrf.mxu0 }
 0x170   : > { %v1765_v41 = vmul.f32 %v7003_v54, %v7003_v54  ;;  %v7197_v6 = vadd.f32 %v1762_v39, %v1730_v9 }
 0x171   : > { %v7007_v56 = vpop.f32.mrf.mxu0 }
 0x173   : > { %v7010_v60 = vpop.f32.mrf.mxu0 }
 0x174   : > { %v1767_v2 = vmul.f32 %v7010_v60, %v7010_v60 }
 0x175   : > { %v7013_v63 = vpop.f32.mrf.mxu0 }
 0x177   : > { %v7015_v0 = vpop.f32.mrf.mxu0 }
 0x179   : > { %v7017_v12 = vpop.f32.mrf.mxu0 }
 0x17b   : > { %v7019_v16 = vpop.f32.mrf.mxu0 }
 0x17d   : > { %v7021_v17 = vpop.f32.mrf.mxu0 }
 0x17f   : > { %v7023_v23 = vpop.f32.mrf.mxu0 }
 0x181   : > { %v7025_v24 = vpop.f32.mrf.mxu0 }
 0x182   : > { %v1772_v39 = vmul.f32 %v7025_v24, %v7025_v24 }
 0x183   : > { %v7027_v32 = vpop.f32.mrf.mxu0 }
 0x184   : > { %9695 = vst [vmem:[#allocation49_spill] sm:$0xff] %v7027_v32 }
 0x185   : > { %v7029_v33 = vpop.f32.mrf.mxu0 }
 0x186   : > { %9696 = vst [vmem:[#allocation50_spill] sm:$0xff] %v7029_v33  ;;  %v1725_v33 = vmul.f32 %v6828_v8, %v6828_v8  ;;  %v1731_v8 = vmul.f32 %v6853_v18, %v6853_v18  ;;  %v7079_v18 = vmul.f32 %v6895_v31, %v6895_v31  ;;  %v7099_v31 = vmul.f32 %v6913_v40, %v6913_v40 }
 0x187   : > { %v7047_v32 = vpop.f32.mrf.mxu0  ;;  %v7119_v40 = vmul.f32 %v6926_v47, %v6926_v47  ;;  %v1755_v47 = vmul.f32 %v6962_v1, %v6962_v1  ;;  %v1758_v1 = vmul.f32 %v6983_v29, %v6983_v29  ;;  %v1786_v29 = vadd.f32 %v1754_v59, %v1722_v28 }
 0x188   : > { %9697 = vst [vmem:[#allocation51_spill] sm:$0xff] %v7047_v32  ;;  %v7171_v36 = vadd.f32 %v1757_v61, %v1725_v33  ;;  %v7189_v28 = vadd.f32 %v1763_v27, %v1731_v8  ;;  %v1768_v8 = vmul.f32 %v7017_v12, %v7017_v12  ;;  %v1771_v61 = vmul.f32 %v7019_v16, %v7019_v16 }
 0x189   : > { %v7067_v11 = vpop.f32.mrf.mxu0  ;;  %9701 = vst [vmem:[#allocation55_spill] sm:$0xff] %v7119_v40  ;;  %v7221_v27 = vadd.f32 %v1767_v2, %v7071_v13 }
 0x18b   : > { %v7101_v21 = vpop.f32.mrf.mxu0 }
 0x18c   : > { %9698 = vst [vmem:[#allocation52_spill] sm:$0xff] %v7101_v21  ;;  %v7123_v21 = vmul.f32 %v6930_v49, %v6930_v49  ;;  %v1752_v49 = vmul.f32 %v6957_v62, %v6957_v62  ;;  %v7155_v62 = vmul.f32 %v6942_v55, %v6942_v55  ;;  %v1787_v55 = vadd.f32 %v1755_v47, %v1723_v58 }
 0x18d   : > { %v7129_v35 = vpop.f32.mrf.mxu0  ;;  %v1764_v47 = vmul.f32 %v7007_v56, %v7007_v56  ;;  %v1773_v58 = vmul.f32 %v7023_v23, %v7023_v23 }
 0x18e   : > { %9702 = vst [vmem:[#allocation56_spill] sm:$0xff] %v7123_v21  ;;  %9703 = vst [vmem:[#allocation57_spill] sm:$0xff] %v7129_v35  ;;  %v1785_v21 = vadd.f32 %v1753_v43, %v1721_v50  ;;  %v1784_v38 = vadd.f32 %v1752_v49, %v1720_v52  ;;  %v7175_v43 = vadd.f32 %v1759_v45, %v1727_v4 }
 0x18f   : > { %v7151_v53 = vpop.f32.mrf.mxu0  ;;  %v7179_v50 = vadd.f32 %v1758_v1, %v1726_v5  ;;  %v7187_v52 = vadd.f32 %v1760_v20, %v1728_v7  ;;  %v1766_v4 = vmul.f32 %v7013_v63, %v7013_v63  ;;  %v7199_v45 = vadd.f32 %v1765_v41, %v1733_v3 }
 0x190   : > { %9706 = vst [vmem:[#allocation60_spill] sm:$0xff] %v7151_v53  ;;  %v1769_v7 = vmul.f32 %v7015_v0, %v7015_v0  ;;  %v1770_v1 = vmul.f32 %v7021_v17, %v7021_v17  ;;  %v7214_v3 = vadd.f32 %v1764_v47, %v7065_v10 }
 0x191   : > { %v7165_v40 = vpop.f32.mrf.mxu0  ;;  %v7224_v33 = vadd.f32 %v1766_v4, %v7075_v15  ;;  %v7241_v15 = vadd.f32 %v1768_v8, %v7083_v22  ;;  %v7260_v22 = vadd.f32 %v1772_v39, %v7099_v31  ;;  %v1777_v31 = vmul.f32 %v7047_v32, %v7047_v32 }
 0x192   : > { %9707 = vst [vmem:[#allocation61_spill] sm:$0xff] %v7165_v40  ;;  %v7238_v47 = vadd.f32 %v1769_v7, %v7079_v18  ;;  %v7247_v2 = vadd.f32 %v1770_v1, %v7091_v26  ;;  %v7257_v18 = vadd.f32 %v1773_v58, %v7095_v30  ;;  %v9714_v7 = vld [vmem:[#allocation50_spill] sm:$0xff]  ;;  %v1778_v39 = vmul.f32 %v7129_v35, %v7129_v35 }
 0x193   : > { %v7177_v44 = vpop.f32.mrf.mxu0  ;;  %v1774_v8 = vmul.f32 %v9714_v7, %v9714_v7 }
 0x194   : > { %9708 = vst [vmem:[#allocation62_spill] sm:$0xff] %v7177_v44  ;;  %v1815_v49 = vmul.f32 %v7177_v44, %v7177_v44 }
 0x195   : > { %v7195_v5 = vpop.f32.mrf.mxu0 }
 0x196   : > { %9709 = vst [vmem:[#allocation63_spill] sm:$0xff] %v7195_v5  ;;  %v1847_v51 = vadd.f32 %v1815_v49, %v1783_v57  ;;  %v1814_v59 = vmul.f32 %v7195_v5, %v7195_v5  ;;  %v7244_v49 = vadd.f32 %v1771_v61, %v7087_v25  ;;  %v9713_v25 = vld [vmem:[#allocation49_spill] sm:$0xff] }
 0x197   : > { %v7211_v9 = vpop.f32.mrf.mxu0  ;;  %v1775_v26 = vmul.f32 %v9713_v25, %v9713_v25 }
 0x198   : > { %9710 = vst [vmem:[#allocation64_spill] sm:$0xff] %v7211_v9  ;;  %v7216_v57 = vadd.f32 1e-08, %v1847_v51  ;;  %v1846_v14 = vadd.f32 %v1814_v59, %v1782_v19  ;;  %v1817_v20 = vmul.f32 %v7211_v9, %v7211_v9  ;;  %v1781_v9 = vmul.f32 %v7151_v53, %v7151_v53  ;;  %v9723_v53 = vld [vmem:[#allocation58_spill] sm:$0xff] }
 0x199   : > { %v7230_v10 = vpop.f32.mrf.mxu0 }
 0x19a   : > { %9711 = vst [vmem:[#allocation65_spill] sm:$0xff] %v7230_v10  ;;  %6048 = vrsqrt.f32 %v7216_v57  ;;  %v7233_v19 = vadd.f32 1e-08, %v1846_v14  ;;  %v1849_v41 = vadd.f32 %v1817_v20, %v1785_v21  ;;  %v1816_v13 = vmul.f32 %v7230_v10, %v7230_v10  ;;  %v9716_v20 = vld [vmem:[#allocation52_spill] sm:$0xff] }
 0x19b   : > { %v7249_v4 = vpop.f32.mrf.mxu0  ;;  %v1776_v14 = vmul.f32 %v7067_v11, %v7067_v11  ;;  %v1779_v58 = vmul.f32 %v9716_v20, %v9716_v20  ;;  %v1780_v10 = vmul.f32 %v7165_v40, %v7165_v40  ;;  %v7316_v40 = vadd.f32 %v1778_v39, %v9723_v53 }
 0x19c   : > { %9712 = vst [vmem:[#allocation66_spill] sm:$0xff] %v7249_v4  ;;  %v7251_v51 = vadd.f32 1e-08, %v1849_v41  ;;  %v1848_v21 = vadd.f32 %v1816_v13, %v1784_v38  ;;  %v1819_v59 = vmul.f32 %v7249_v4, %v7249_v4  ;;  %6050 = vrsqrt.f32 %v7233_v19  ;;  %v9718_v4 = vld [vmem:[#allocation53_spill] sm:$0xff] }
 0x19d   : > { %v7266_v61 = vpop.f32.mrf.mxu0  ;;  %vm1919_vm2 = vcmp.eq.f32.partialorder %v7216_v57, inf  ;;  %v1922_v53 = vand.u32 2147483648, %v7216_v57  ;;  %vm1921_vm3 = vcmp.eq.f32.partialorder %v7216_v57, 0.0  ;;  %vm1912_vm4 = vcmp.eq.f32.partialorder %v7233_v19, inf }
 0x19e   : > { %9715 = vst [vmem:[#allocation49_spill] sm:$0xff] %v7266_v61  ;;  %6052 = vrsqrt.f32 %v7251_v51  ;;  %v7269_v38 = vadd.f32 1e-08, %v1848_v21  ;;  %v1851_v1 = vadd.f32 %v1819_v59, %v1787_v55  ;;  %v1818_v30 = vmul.f32 %v7266_v61, %v7266_v61 }
 0x19f   : > { %v7281_v41 = vpop.f32.mrf.mxu0  ;;  %v7289_v59 = vadd.f32 %v1775_v26, %v7105_v34  ;;  %v7292_v61 = vadd.f32 %v1774_v8, %v9718_v4  ;;  %v9720_v26 = vld [vmem:[#allocation54_spill] sm:$0xff]  ;;  %v9721_v8 = vld [vmem:[#allocation55_spill] sm:$0xff]  ;;  %vm1914_vm5 = vcmp.eq.f32.partialorder %v7233_v19, 0.0  ;;  %vm1933_vm6 = vcmp.eq.f32.partialorder %v7251_v51, inf }
 0x1a0   : > { %9717 = vst [vmem:[#allocation50_spill] sm:$0xff] %v7281_v41  ;;  %6054 = vrsqrt.f32 %v7269_v38  ;;  %v7284_v55 = vadd.f32 1e-08, %v1851_v1  ;;  %v1850_v13 = vadd.f32 %v1818_v30, %v1786_v29  ;;  %v1821_v21 = vmul.f32 %v7281_v41, %v7281_v41  ;;  %v9722_v41 = vld [vmem:[#allocation56_spill] sm:$0xff] }
 0x1a1   : > { %v7298_v44 = vpop.f32.mrf.mxu0  ;;  %v7307_v4 = vadd.f32 %v1777_v31, %v9720_v26  ;;  %v7310_v30 = vadd.f32 %v1776_v14, %v9721_v8  ;;  %v7313_v5 = vadd.f32 %v1779_v58, %v9722_v41  ;;  %v7330_v58 = vadd.f32 %v1780_v10, %v7155_v62 }
 0x1a2   : > { %9719 = vst [vmem:[#allocation53_spill] sm:$0xff] %v7298_v44  ;;  %6056 = vrsqrt.f32 %v7284_v55  ;;  %v7301_v29 = vadd.f32 1e-08, %v1850_v13  ;;  %v1853_v1 = vadd.f32 %v1821_v21, %v7171_v36  ;;  %v1820_v34 = vmul.f32 %v7298_v44, %v7298_v44  ;;  %v9725_v21 = vld [vmem:[#allocation59_spill] sm:$0xff] }
 0x1a3   : > { %v7318_v20 = vpop.f32.mrf.mxu0  ;;  %v7327_v14 = vadd.f32 %v1781_v9, %v9725_v21  ;;  %v1915_v10 = vand.u32 2147483648, %v7233_v19  ;;  %vm1926_vm7 = vcmp.eq.f32.partialorder %v7269_v38, inf  ;;  %v1929_v21 = vand.u32 2147483648, %v7269_v38 }
 0x1a4   : > { %9724 = vst [vmem:[#allocation54_spill] sm:$0xff] %v7318_v20  ;;  %6058 = vrsqrt.f32 %v7301_v29  ;;  %v7321_v36 = vadd.f32 1e-08, %v1853_v1  ;;  %v1852_v13 = vadd.f32 %v1820_v34, %v7173_v42  ;;  %v1823_v31 = vmul.f32 %v7318_v20, %v7318_v20 }
 0x1a5   : > { %v7332_v41 = vpop.f32.mrf.mxu0  ;;  %v1936_v20 = vand.u32 2147483648, %v7251_v51  ;;  %vm1928_vm8 = vcmp.eq.f32.partialorder %v7269_v38, 0.0  ;;  %vm1935_vm9 = vcmp.eq.f32.partialorder %v7251_v51, 0.0  ;;  %vm1947_vm10 = vcmp.eq.f32.partialorder %v7284_v55, inf }
 0x1a6   : > { %9726 = vst [vmem:[#allocation55_spill] sm:$0xff] %v7332_v41  ;;  %6060 = vrsqrt.f32 %v7321_v36  ;;  %v7337_v39 = vadd.f32 1e-08, %v1852_v13  ;;  %v1855_v42 = vadd.f32 %v1823_v31, %v7175_v43  ;;  %v1822_v1 = vmul.f32 %v7332_v41, %v7332_v41 }
 0x1a7   : > { %v6049_v9 = vpop.eup %6048  ;;  %v7343_v62 = vpop.f32.mrf.mxu0  ;;  %vm1940_vm11 = vcmp.eq.f32.partialorder %v7301_v29, inf  ;;  %vm1942_vm12 = vcmp.eq.f32.partialorder %v7301_v29, 0.0  ;;  %vm1949_vm13 = vcmp.eq.f32.partialorder %v7284_v55, 0.0  ;;  %vm1961_vm14 = vcmp.eq.f32.partialorder %v7321_v36, inf }
 0x1a8   : > { %9727 = vst [vmem:[#allocation56_spill] sm:$0xff] %v7343_v62  ;;  %6062 = vrsqrt.f32 %v7337_v39  ;;  %v7350_v34 = vadd.f32 1e-08, %v1855_v42  ;;  %v1854_v43 = vadd.f32 %v1822_v1, %v7179_v50  ;;  %v1825_v26 = vmul.f32 %v7343_v62, %v7343_v62 }
 0x1a9   : > { %v6051_v8 = vpop.eup %6050  ;;  %v7355_v13 = vpop.f32.mrf.mxu0  ;;  %v1918_v31 = vmul.f32 %v6049_v9, %v7216_v57  ;;  %vm1963_vm15 = vcmp.eq.f32.partialorder %v7321_v36, 0.0 }
 0x1aa   : > { %9728 = vst [vmem:[#allocation58_spill] sm:$0xff] %v7355_v13  ;;  %6064 = vrsqrt.f32 %v7350_v34  ;;  %v7362_v42 = vadd.f32 1e-08, %v1854_v43  ;;  %v1857_v50 = vadd.f32 %v1825_v26, %v7181_v46  ;;  %v1824_v1 = vmul.f32 %v7355_v13, %v7355_v13 }
 0x1ab   : > { %v6053_v9 = vpop.eup %6052  ;;  %v7369_v62 = vpop.f32.mrf.mxu0  ;;  %v1911_v41 = vmul.f32 %v6051_v8, %v7233_v19  ;;  %v1920_v44 = vsel %vm1919_vm2, %v7216_v57, %v1918_v31  ;;  %vm1954_vm2 = vcmp.eq.f32.partialorder %v7337_v39, inf }
 0x1ac   : > { %9729 = vst [vmem:[#allocation59_spill] sm:$0xff] %v7369_v62  ;;  %6066 = vrsqrt.f32 %v7362_v42  ;;  %v7378_v43 = vadd.f32 1e-08, %v1857_v50  ;;  %v1856_v26 = vadd.f32 %v1824_v1, %v7187_v52  ;;  %v1827_v13 = vmul.f32 %v7369_v62, %v7369_v62 }
 0x1ad   : > { %v6055_v8 = vpop.eup %6054  ;;  %v7384_v35 = vpop.f32.mrf.mxu0  ;;  %v1913_v31 = vsel %vm1912_vm4, %v7233_v19, %v1911_v41  ;;  %v1932_v46 = vmul.f32 %v6053_v9, %v7251_v51  ;;  %vm1975_vm4 = vcmp.eq.f32.partialorder %v7350_v34, inf }
 0x1ae   : > { %9730 = vst [vmem:[#allocation67_spill] sm:$0xff] %v7384_v35  ;;  %6068 = vrsqrt.f32 %v7378_v43  ;;  %v7393_v52 = vadd.f32 1e-08, %v1856_v26  ;;  %v1859_v1 = vadd.f32 %v1827_v13, %v7189_v28  ;;  %v1826_v62 = vmul.f32 %v7384_v35, %v7384_v35 }
 0x1af   : > { %v6057_v41 = vpop.eup %6056  ;;  %v1916_v9 = vsel %vm1914_vm5, %v1915_v10, %v1913_v31  ;;  %v7403_v50 = vpop.f32.mrf.mxu0  ;;  %v1923_v26 = vsel %vm1921_vm3, %v1922_v53, %v1920_v44  ;;  %v1925_v28 = vmul.f32 %v6055_v8, %v7269_v38  ;;  %v1934_v13 = vsel %vm1933_vm6, %v7251_v51, %v1932_v46  ;;  %v2886_v44 = vld [vmem:[%s9523_s6] sm:$0xff]  ;;  %v9731_v31 = vld [vmem:[#allocation21_spill] sm:$0xff] }
 0x1b0   : > { %6070 = vrsqrt.f32 %v7393_v52  ;;  %v7412_v32 = vadd.f32 1e-08, %v1859_v1  ;;  %v1858_v35 = vadd.f32 %v1826_v62, %v7197_v6  ;;  %5770 = vmatprep.mubr.msk.f32.mxu1 %vm884_vm0, %v1916_v9  ;;  %v1829_v19 = vmul.f32 %v7403_v50, %v7403_v50 }
 0x1b1   : > { %v6059_v57 = vpop.eup %6058  ;;  %5771 = vmatmul.mubr.msk.f32.vlgmr.msra.gmra.mxu1 %vm884_vm0, %v1923_v26  ;;  %v7423_v53 = vpop.f32.mrf.mxu0  ;;  %v1927_v6 = vsel %vm1926_vm7, %v7269_v38, %v1925_v28  ;;  %v1946_v62 = vmul.f32 %v6057_v41, %v7284_v55  ;;  %v1957_v10 = vand.u32 2147483648, %v7337_v39  ;;  %vm1956_vm3 = vcmp.eq.f32.partialorder %v7337_v39, 0.0 }
 0x1b2   : > { %v7431_v46 = vadd.f32 1e-08, %v1858_v35  ;;  %v1861_v8 = vadd.f32 %v1829_v19, %v7199_v45  ;;  %5875 = vmatpush3.msra.mxu1 %v9731_v31  ;;  %v1828_v1 = vmul.f32 %v7423_v53, %v7423_v53  ;;  %6072 = vrsqrt.f32 %v7412_v32 }
 0x1b3   : > { %v6061_v9 = vpop.eup %6060  ;;  %v1930_v41 = vsel %vm1928_vm8, %v1929_v21, %v1927_v6  ;;  %v7442_v26 = vpop.f32.mrf.mxu0  ;;  %v1937_v35 = vsel %vm1935_vm9, %v1936_v20, %v1934_v13  ;;  %v1939_v45 = vmul.f32 %v6059_v57, %v7301_v29  ;;  %5876 = vmatprep.subr.mxu1 %v2886_v44  ;;  %v1948_v38 = vsel %vm1947_vm10, %v7284_v55, %v1946_v62 }
 0x1b4   : > { %6074 = vrsqrt.f32 %v7431_v46  ;;  %v1860_v28 = vadd.f32 %v1828_v1, %v7214_v3  ;;  %5773 = vmatprep.mubr.msk.f32.mxu1 %vm884_vm0, %v1930_v41  ;;  %v1831_v19 = vmul.f32 %v7442_v26, %v7442_v26  ;;  %vm1968_vm5 = vcmp.eq.f32.partialorder %v7362_v42, inf  ;;  %5877 = vmatpush3.msra.mxu1 %v2886_v44 }
 0x1b5   : > { %vm1977_vm6 = vcmp.eq.f32.partialorder %v7350_v34, 0.0  ;;  %v6063_v51 = vpop.eup %6062  ;;  %v7457_v20 = vadd.f32 1e-08, %v1861_v8  ;;  %5774 = vmatmul.mubr.msk.f32.gmra.mxu1 %vm884_vm0, %v1937_v35  ;;  %v7460_v3 = vpop.f32.mrf.mxu0  ;;  %v1941_v21 = vsel %vm1940_vm11, %v7301_v29, %v1939_v45  ;;  %v1960_v13 = vmul.f32 %v6061_v9, %v7321_v36 }
 0x1b6   : > { %v1971_v57 = vand.u32 2147483648, %v7362_v42  ;;  %v7467_v6 = vadd.f32 1e-08, %v1860_v28  ;;  %v1863_v62 = vadd.f32 %v1831_v19, %v7221_v27  ;;  %v1830_v44 = vmul.f32 %v7460_v3, %v7460_v3 }
 0x1b7   : > { %vm1970_vm7 = vcmp.eq.f32.partialorder %v7362_v42, 0.0  ;;  %v1978_v8 = vand.u32 2147483648, %v7350_v34  ;;  %v6065_v31 = vpop.eup %6064  ;;  %v9732_v1 = vand.u32 2147483648, %v7301_v29  ;;  %v7478_v9 = vpop.f32.mrf.mxu0  ;;  %v9733_v35 = vand.u32 2147483648, %v7284_v55 }
 0x1b8   : > { %v1953_v45 = vmul.f32 %v6063_v51, %v7337_v39  ;;  %v1962_v28 = vsel %vm1961_vm14, %v7321_v36, %v1960_v13  ;;  %6076 = vrsqrt.f32 %v7467_v6  ;;  %v7489_v19 = vadd.f32 1e-08, %v1863_v62 }
 0x1b9   : > { %v1944_v41 = vsel %vm1942_vm12, %v9732_v1, %v1941_v21  ;;  %v1951_v27 = vsel %vm1949_vm13, %v9733_v35, %v1948_v38  ;;  %v1862_v29 = vadd.f32 %v1830_v44, %v7224_v33  ;;  %v1833_v21 = vmul.f32 %v7478_v9, %v7478_v9  ;;  %v6067_v55 = vpop.eup %6066  ;;  %v7498_v38 = vpop.f32.mrf.mxu0 }
 0x1ba   : > { %5776 = vmatprep.mubr.msk.f32.mxu1 %vm884_vm0, %v1944_v41  ;;  %vm1982_vm8 = vcmp.eq.f32.partialorder %v7393_v52, inf  ;;  %6078 = vrsqrt.f32 %v7457_v20  ;;  %v1955_v51 = vsel %vm1954_vm2, %v7337_v39, %v1953_v45  ;;  %v9734_v33 = vand.u32 2147483648, %v7321_v36 }
 0x1bb   : > { %5777 = vmatmul.mubr.msk.f32.gmra.mxu1 %vm884_vm0, %v1951_v27  ;;  %v1974_v62 = vmul.f32 %v6065_v31, %v7350_v34  ;;  %v7508_v44 = vadd.f32 1e-08, %v1862_v29  ;;  %v1865_v1 = vadd.f32 %v1833_v21, %v7238_v47  ;;  %v1832_v41 = vmul.f32 %v7498_v38, %v7498_v38  ;;  %v6069_v27 = vpop.eup %6068  ;;  %v7518_v45 = vpop.f32.mrf.mxu0 }
 0x1bc   : > { %v1965_v13 = vsel %vm1963_vm15, %v9734_v33, %v1962_v28  ;;  %vm1984_vm9 = vcmp.eq.f32.partialorder %v7393_v52, 0.0  ;;  %v1985_v35 = vand.u32 2147483648, %v7393_v52  ;;  %6080 = vrsqrt.f32 %v7489_v19 }
 0x1bd   : > { %v1958_v36 = vsel %vm1956_vm3, %v1957_v10, %v1955_v51  ;;  %v1967_v31 = vmul.f32 %v6067_v55, %v7362_v42  ;;  %v1976_v47 = vsel %vm1975_vm4, %v7350_v34, %v1974_v62  ;;  %v7524_v28 = vadd.f32 1e-08, %v1865_v1  ;;  %v6071_v39 = vpop.eup %6070  ;;  %v7533_v10 = vpop.f32.mrf.mxu0 }
 0x1be   : > { %v1864_v29 = vadd.f32 %v1832_v41, %v7241_v15  ;;  %5779 = vmatprep.mubr.msk.f32.mxu1 %vm884_vm0, %v1958_v36  ;;  %v1835_v21 = vmul.f32 %v7518_v45, %v7518_v45  ;;  %vm1989_vm10 = vcmp.eq.f32.partialorder %v7378_v43, inf  ;;  %6082 = vrsqrt.f32 %v7508_v44 }
 0x1bf   : > { %5780 = vmatmul.mubr.msk.f32.gmra.mxu1 %vm884_vm0, %v1965_v13  ;;  %v1969_v55 = vsel %vm1968_vm5, %v7362_v42, %v1967_v31  ;;  %v1979_v15 = vsel %vm1977_vm6, %v1978_v8, %v1976_v47  ;;  %v1988_v51 = vmul.f32 %v6069_v27, %v7378_v43  ;;  %v1834_v1 = vmul.f32 %v7533_v10, %v7533_v10  ;;  %v7549_v41 = vpop.f32.mrf.mxu0  ;;  %v6073_v27 = vpop.eup %6072 }
 0x1c0   : > { %v7541_v33 = vadd.f32 1e-08, %v1864_v29  ;;  %v1867_v62 = vadd.f32 %v1835_v21, %v7244_v49  ;;  %vm1991_vm11 = vcmp.eq.f32.partialorder %v7378_v43, 0.0  ;;  %v1972_v13 = vsel %vm1970_vm7, %v1971_v57, %v1969_v55 }
 0x1c1   : > { %v1981_v36 = vmul.f32 %v6071_v39, %v7393_v52  ;;  %v1990_v34 = vsel %vm1989_vm10, %v7378_v43, %v1988_v51  ;;  %v1992_v8 = vand.u32 2147483648, %v7378_v43  ;;  %6084 = vrsqrt.f32 %v7524_v28  ;;  %5782 = vmatprep.mubr.msk.f32.mxu1 %vm884_vm0, %v1972_v13  ;;  %v6075_v57 = vpop.eup %6074  ;;  %v7563_v47 = vpop.f32.mrf.mxu0 }
 0x1c2   : > { %v7555_v49 = vadd.f32 1e-08, %v1867_v62  ;;  %v1866_v31 = vadd.f32 %v1834_v1, %v7247_v2  ;;  %v1837_v42 = vmul.f32 %v7549_v41, %v7549_v41  ;;  %6086 = vrsqrt.f32 %v7541_v33 }
 0x1c3   : > { %5783 = vmatmul.mubr.msk.f32.gmra.mxu1 %vm884_vm0, %v1979_v15  ;;  %v1983_v29 = vsel %vm1982_vm8, %v7393_v52, %v1981_v36  ;;  %v1993_v21 = vsel %vm1991_vm11, %v1992_v8, %v1990_v34  ;;  %vm1996_vm12 = vcmp.eq.f32.partialorder %v7431_v46, inf  ;;  %v1836_v55 = vmul.f32 %v7563_v47, %v7563_v47  ;;  %v7580_v51 = vpop.f32.mrf.mxu0 }
 0x1c4   : > { %v7571_v2 = vadd.f32 1e-08, %v1866_v31  ;;  %v1869_v39 = vadd.f32 %v1837_v42, %v7257_v18  ;;  %vm1998_vm13 = vcmp.eq.f32.partialorder %v7431_v46, 0.0  ;;  %6088 = vrsqrt.f32 %v7555_v49 }
 0x1c5   : > { %v1986_v15 = vsel %vm1984_vm9, %v1985_v35, %v1983_v29  ;;  %v1995_v43 = vmul.f32 %v6075_v57, %v7431_v46  ;;  %v2002_v62 = vmul.f32 %v6073_v27, %v7412_v32  ;;  %v1868_v18 = vadd.f32 %v1836_v55, %v7260_v22  ;;  %v6077_v34 = vpop.eup %6076  ;;  %v7593_v52 = vpop.f32.mrf.mxu0 }
 0x1c6   : > { %v7584_v1 = vadd.f32 1e-08, %v1869_v39  ;;  %5785 = vmatprep.mubr.msk.f32.mxu1 %vm884_vm0, %v1986_v15  ;;  %v1839_v13 = vmul.f32 %v7580_v51, %v7580_v51  ;;  %v1999_v36 = vand.u32 2147483648, %v7431_v46  ;;  %6090 = vrsqrt.f32 %v7571_v2 }
 0x1c7   : > { %5786 = vmatmul.mubr.msk.f32.gmra.mxu1 %vm884_vm0, %v1993_v21  ;;  %v1997_v35 = vsel %vm1996_vm12, %v7431_v46, %v1995_v43  ;;  %vm2003_vm14 = vcmp.eq.f32.partialorder %v7412_v32, inf  ;;  %vm2005_vm15 = vcmp.eq.f32.partialorder %v7412_v32, 0.0  ;;  %v6079_v22 = vpop.eup %6078  ;;  %v7600_v8 = vadd.f32 1e-08, %v1868_v18  ;;  %v7609_v29 = vpop.f32.mrf.mxu0 }
 0x1c8   : > { %v1871_v27 = vadd.f32 %v1839_v13, %v7289_v59  ;;  %v1838_v31 = vmul.f32 %v7593_v52, %v7593_v52  ;;  %v2006_v42 = vand.u32 2147483648, %v7412_v32  ;;  %6092 = vrsqrt.f32 %v7584_v1 }
 0x1c9   : > { %v2000_v57 = vsel %vm1998_vm13, %v1999_v36, %v1997_v35  ;;  %v2004_v21 = vsel %vm2003_vm14, %v7412_v32, %v2002_v62  ;;  %v2009_v39 = vmul.f32 %v6077_v34, %v7467_v6  ;;  %v6081_v55 = vpop.eup %6080  ;;  %v1841_v43 = vmul.f32 %v7609_v29, %v7609_v29  ;;  %v7623_v62 = vpop.f32.mrf.mxu0 }
 0x1ca   : > { %v7613_v15 = vadd.f32 1e-08, %v1871_v27  ;;  %v1870_v59 = vadd.f32 %v1838_v31, %v7292_v61  ;;  %5788 = vmatprep.mubr.msk.f32.mxu1 %vm884_vm0, %v2000_v57  ;;  %vm2010_vm2 = vcmp.eq.f32.partialorder %v7467_v6, inf  ;;  %6094 = vrsqrt.f32 %v7600_v8 }
 0x1cb   : > { %v2007_v46 = vsel %vm2005_vm15, %v2006_v42, %v2004_v21  ;;  %v2011_v18 = vsel %vm2010_vm2, %v7467_v6, %v2009_v39  ;;  %v2013_v13 = vand.u32 2147483648, %v7467_v6  ;;  %v6083_v36 = vpop.eup %6082  ;;  %v1873_v34 = vadd.f32 %v1841_v43, %v7307_v4  ;;  %v7635_v27 = vpop.f32.mrf.mxu0 }
 0x1cc   : > { %v7627_v61 = vadd.f32 1e-08, %v1870_v59  ;;  %5789 = vmatmul.mubr.msk.f32.gmra.mxu1 %vm884_vm0, %v2007_v46  ;;  %v1840_v35 = vmul.f32 %v7623_v62, %v7623_v62  ;;  %vm2012_vm3 = vcmp.eq.f32.partialorder %v7467_v6, 0.0  ;;  %6096 = vrsqrt.f32 %v7613_v15 }
 0x1cd   : > { %v2014_v32 = vsel %vm2012_vm3, %v2013_v13, %v2011_v18  ;;  %v2016_v31 = vmul.f32 %v6079_v22, %v7457_v20  ;;  %vm2017_vm4 = vcmp.eq.f32.partialorder %v7457_v20, inf  ;;  %v1843_v42 = vmul.f32 %v7635_v27, %v7635_v27  ;;  %v7649_v39 = vpop.f32.mrf.mxu0 }
 0x1ce   : > { %6098 = vrsqrt.f32 %v7627_v61  ;;  %v1872_v4 = vadd.f32 %v1840_v35, %v7310_v30  ;;  %5791 = vmatprep.mubr.msk.f32.mxu1 %vm884_vm0, %v2014_v32  ;;  %vm2019_vm5 = vcmp.eq.f32.partialorder %v7457_v20, 0.0  ;;  %v6085_v6 = vpop.eup %6084  ;;  %v7645_v57 = vadd.f32 1e-08, %v1873_v34 }
 0x1cf   : > { %v2018_v21 = vsel %vm2017_vm4, %v7457_v20, %v2016_v31  ;;  %v2020_v22 = vand.u32 2147483648, %v7457_v20  ;;  %v2023_v59 = vmul.f32 %v6083_v36, %v7508_v44  ;;  %v6087_v43 = vpop.eup %6086  ;;  %v1875_v46 = vadd.f32 %v1843_v42, %v7313_v5  ;;  %v7661_v35 = vpop.f32.mrf.mxu0 }
 0x1d0   : > { %v7652_v30 = vadd.f32 1e-08, %v1872_v4  ;;  %v1842_v18 = vmul.f32 %v7649_v39, %v7649_v39  ;;  %vm2024_vm6 = vcmp.eq.f32.partialorder %v7508_v44, inf  ;;  %vm2026_vm7 = vcmp.eq.f32.partialorder %v7508_v44, 0.0 }
 0x1d1   : > { %v2021_v13 = vsel %vm2019_vm5, %v2020_v22, %v2018_v21  ;;  %v2025_v34 = vsel %vm2024_vm6, %v7508_v44, %v2023_v59  ;;  %v2027_v20 = vand.u32 2147483648, %v7508_v44  ;;  %v6089_v36 = vpop.eup %6088  ;;  %v7664_v32 = vadd.f32 1e-08, %v1875_v46  ;;  %v7673_v44 = vpop.f32.mrf.mxu0 }
 0x1d2   : > { %6100 = vrsqrt.f32 %v7652_v30  ;;  %5792 = vmatmul.mubr.msk.f32.gmra.mxu1 %vm884_vm0, %v2021_v13  ;;  %v1874_v5 = vadd.f32 %v1842_v18, %v7316_v40  ;;  %v1845_v31 = vmul.f32 %v7661_v35, %v7661_v35  ;;  %v2030_v42 = vmul.f32 %v6081_v55, %v7489_v19 }
 0x1d3   : > { %6102 = vrsqrt.f32 %v7645_v57  ;;  %v2028_v4 = vsel %vm2026_vm7, %v2027_v20, %v2025_v34  ;;  %vm2031_vm8 = vcmp.eq.f32.partialorder %v7489_v19, inf  ;;  %v6091_v21 = vpop.eup %6090  ;;  %vm2033_vm9 = vcmp.eq.f32.partialorder %v7489_v19, 0.0 }
 0x1d4   : > { %v7675_v22 = vadd.f32 1e-08, %v1874_v5  ;;  %5794 = vmatprep.mubr.msk.f32.mxu1 %vm884_vm0, %v2028_v4  ;;  %v1877_v59 = vadd.f32 %v1845_v31, %v7327_v14  ;;  %v2034_v40 = vand.u32 2147483648, %v7489_v19  ;;  %6104 = vrsqrt.f32 %v7664_v32 }
 0x1d5   : > { %v2032_v46 = vsel %vm2031_vm8, %v7489_v19, %v2030_v42  ;;  %v1844_v55 = vmul.f32 %v7673_v44, %v7673_v44  ;;  %v2037_v18 = vmul.f32 %v6087_v43, %v7541_v33  ;;  %v6093_v13 = vpop.eup %6092  ;;  %vm2038_vm10 = vcmp.eq.f32.partialorder %v7541_v33, inf }
 0x1d6   : > { %6106 = vrsqrt.f32 %v7675_v22  ;;  %v7687_v34 = vadd.f32 1e-08, %v1877_v59  ;;  %v2035_v20 = vsel %vm2033_vm9, %v2034_v40, %v2032_v46  ;;  %v2041_v19 = vand.u32 2147483648, %v7541_v33 }
 0x1d7   : > { %5795 = vmatmul.mubr.msk.f32.gmra.mxu1 %vm884_vm0, %v2035_v20  ;;  %v1876_v14 = vadd.f32 %v1844_v55, %v7330_v58  ;;  %v2039_v5 = vsel %vm2038_vm10, %v7541_v33, %v2037_v18  ;;  %v2044_v31 = vmul.f32 %v6085_v6, %v7524_v28  ;;  %v6095_v4 = vpop.eup %6094  ;;  %vm2040_vm11 = vcmp.eq.f32.partialorder %v7541_v33, 0.0 }
 0x1d8   : > { %vm2045_vm12 = vcmp.eq.f32.partialorder %v7524_v28, inf  ;;  %vm2047_vm13 = vcmp.eq.f32.partialorder %v7524_v28, 0.0  ;;  %v2048_v43 = vand.u32 2147483648, %v7524_v28  ;;  %v2042_v59 = vsel %vm2040_vm11, %v2041_v19, %v2039_v5 }
 0x1d9   : > { %v7699_v42 = vadd.f32 1e-08, %v1876_v14  ;;  %v2046_v58 = vsel %vm2045_vm12, %v7524_v28, %v2044_v31  ;;  %v2051_v40 = vmul.f32 %v6091_v21, %v7571_v2  ;;  %v6097_v46 = vpop.eup %6096  ;;  %6108 = vrsqrt.f32 %v7687_v34  ;;  %5797 = vmatprep.mubr.msk.f32.mxu1 %vm884_vm0, %v2042_v59 }
 0x1da   : > { %v2049_v6 = vsel %vm2047_vm13, %v2048_v43, %v2046_v58  ;;  %vm2052_vm14 = vcmp.eq.f32.partialorder %v7571_v2, inf  ;;  %v2055_v33 = vand.u32 2147483648, %v7571_v2  ;;  %vm2054_vm15 = vcmp.eq.f32.partialorder %v7571_v2, 0.0 }
 0x1db   : > { %v6099_v55 = vpop.eup %6098  ;;  %6110 = vrsqrt.f32 %v7699_v42  ;;  %5798 = vmatmul.mubr.msk.f32.gmra.mxu1 %vm884_vm0, %v2049_v6  ;;  %v2053_v18 = vsel %vm2052_vm14, %v7571_v2, %v2051_v40  ;;  %v2058_v28 = vmul.f32 %v6089_v36, %v7555_v49  ;;  %vm2059_vm2 = vcmp.eq.f32.partialorder %v7555_v49, inf }
 0x1dc   : > { %v2056_v21 = vsel %vm2054_vm15, %v2055_v33, %v2053_v18  ;;  %v2062_v20 = vand.u32 2147483648, %v7555_v49  ;;  %v2065_v14 = vmul.f32 %v6095_v4, %v7600_v8  ;;  %vm2061_vm3 = vcmp.eq.f32.partialorder %v7555_v49, 0.0 }
 0x1dd   : > { %5800 = vmatprep.mubr.msk.f32.mxu1 %vm884_vm0, %v2056_v21  ;;  %v2060_v5 = vsel %vm2059_vm2, %v7555_v49, %v2058_v28  ;;  %vm2066_vm4 = vcmp.eq.f32.partialorder %v7600_v8, inf  ;;  %v2069_v19 = vand.u32 2147483648, %v7600_v8  ;;  %vm2068_vm5 = vcmp.eq.f32.partialorder %v7600_v8, 0.0 }
 0x1de   : > { %v2063_v2 = vsel %vm2061_vm3, %v2062_v20, %v2060_v5  ;;  %v2067_v36 = vsel %vm2066_vm4, %v7600_v8, %v2065_v14  ;;  %v2072_v31 = vmul.f32 %v6093_v13, %v7584_v1  ;;  %vm2073_vm6 = vcmp.eq.f32.partialorder %v7584_v1, inf }
 0x1df   : > { %v6101_v43 = vpop.eup %6100  ;;  %5801 = vmatmul.mubr.msk.f32.gmra.mxu1 %vm884_vm0, %v2063_v2  ;;  %v2070_v4 = vsel %vm2068_vm5, %v2069_v19, %v2067_v36  ;;  %v2079_v59 = vmul.f32 %v6099_v55, %v7627_v61  ;;  %v2076_v40 = vand.u32 2147483648, %v7584_v1  ;;  %vm2080_vm7 = vcmp.eq.f32.partialorder %v7627_v61, inf }
 0x1e0   : > { %v6103_v49 = vpop.eup %6102  ;;  %5803 = vmatprep.mubr.msk.f32.mxu1 %vm884_vm0, %v2070_v4  ;;  %v2074_v58 = vsel %vm2073_vm6, %v7584_v1, %v2072_v31  ;;  %v2083_v8 = vand.u32 2147483648, %v7627_v61  ;;  %vm2075_vm8 = vcmp.eq.f32.partialorder %v7584_v1, 0.0  ;;  %vm2082_vm9 = vcmp.eq.f32.partialorder %v7627_v61, 0.0 }
 0x1e1   : > { %v2081_v13 = vsel %vm2080_vm7, %v7627_v61, %v2079_v59  ;;  %v2086_v6 = vmul.f32 %v6097_v46, %v7613_v15  ;;  %v6105_v33 = vpop.eup %6104  ;;  %v2077_v55 = vsel %vm2075_vm8, %v2076_v40, %v2074_v58  ;;  %vm2087_vm10 = vcmp.eq.f32.partialorder %v7613_v15, inf }
 0x1e2   : > { %v2084_v18 = vsel %vm2082_vm9, %v2083_v8, %v2081_v13  ;;  %v2093_v28 = vmul.f32 %v6101_v43, %v7652_v30  ;;  %vm2094_vm11 = vcmp.eq.f32.partialorder %v7652_v30, inf  ;;  %v2097_v1 = vand.u32 2147483648, %v7652_v30 }
 0x1e3   : > { %v6107_v21 = vpop.eup %6106  ;;  %5804 = vmatmul.mubr.msk.f32.gmra.mxu1 %vm884_vm0, %v2077_v55  ;;  %v2088_v20 = vsel %vm2087_vm10, %v7613_v15, %v2086_v6  ;;  %v2090_v61 = vand.u32 2147483648, %v7613_v15  ;;  %vm2096_vm12 = vcmp.eq.f32.partialorder %v7652_v30, 0.0  ;;  %v2100_v14 = vmul.f32 %v6103_v49, %v7645_v57 }
 0x1e4   : > { %5806 = vmatprep.mubr.msk.f32.mxu1 %vm884_vm0, %v2084_v18  ;;  %v2095_v46 = vsel %vm2094_vm11, %v7652_v30, %v2093_v28  ;;  %vm2089_vm13 = vcmp.eq.f32.partialorder %v7613_v15, 0.0  ;;  %v2107_v19 = vmul.f32 %v6107_v21, %v7675_v22  ;;  %vm2101_vm14 = vcmp.eq.f32.partialorder %v7645_v57, inf }
 0x1e5   : > { %v2098_v5 = vsel %vm2096_vm12, %v2097_v1, %v2095_v46  ;;  %v2091_v2 = vsel %vm2089_vm13, %v2090_v61, %v2088_v20  ;;  %vm2108_vm15 = vcmp.eq.f32.partialorder %v7675_v22, inf  ;;  %v2102_v31 = vsel %vm2101_vm14, %v7645_v57, %v2100_v14  ;;  %v9737_v20 = vld [vmem:[#allocation7_spill] sm:$0xff]  ;;  %v9738_v1 = vld [vmem:[#allocation6_spill] sm:$0xff]  ;;  %v9739_v61 = vld [vmem:[#allocation9_spill] sm:$0xff] }
 0x1e6   : > { %v6109_v36 = vpop.eup %6108  ;;  %v2109_v43 = vsel %vm2108_vm15, %v7675_v22, %v2107_v19  ;;  %v2111_v30 = vand.u32 2147483648, %v7675_v22  ;;  %v2114_v4 = vmul.f32 %v6105_v33, %v7664_v32  ;;  %v2104_v59 = vand.u32 2147483648, %v7645_v57  ;;  %v9740_v46 = vld [vmem:[#allocation8_spill] sm:$0xff]  ;;  %v9742_v14 = vld [vmem:[#allocation10_spill] sm:$0xff] }
 0x1e7   : > { %5807 = vmatmul.mubr.msk.f32.gmra.mxu1 %vm884_vm0, %v2091_v2  ;;  %vm2110_vm2 = vcmp.eq.f32.partialorder %v7675_v22, 0.0  ;;  %vm2103_vm3 = vcmp.eq.f32.partialorder %v7645_v57, 0.0  ;;  %vm2115_vm4 = vcmp.eq.f32.partialorder %v7664_v32, inf  ;;  %vm2122_vm5 = vcmp.eq.f32.partialorder %v7699_v42, inf  ;;  %v9744_v19 = vld [vmem:[#allocation12_spill] sm:$0xff]  ;;  %v9745_v2 = vld [vmem:[#allocation15_spill] sm:$0xff] }
 0x1e8   : > { %v6111_v15 = vpop.eup %6110  ;;  %5809 = vmatprep.mubr.msk.f32.mxu1 %vm884_vm0, %v2098_v5  ;;  %v2112_v49 = vsel %vm2110_vm2, %v2111_v30, %v2109_v43  ;;  %v2105_v40 = vsel %vm2103_vm3, %v2104_v59, %v2102_v31  ;;  %v2116_v8 = vsel %vm2115_vm4, %v7664_v32, %v2114_v4  ;;  %v2125_v6 = vand.u32 2147483648, %v7699_v42  ;;  %v9743_v5 = vld [vmem:[#allocation13_spill] sm:$0xff]  ;;  %v9748_v43 = vld [vmem:[#allocation16_spill] sm:$0xff]  ;;  %v9749_v30 = vld [vmem:[#allocation19_spill] sm:$0xff] }
 0x1e9   : > { %v2121_v58 = vmul.f32 %v6111_v15, %v7699_v42  ;;  %v2128_v22 = vmul.f32 %v6109_v36, %v7687_v34  ;;  %v2118_v57 = vand.u32 2147483648, %v7664_v32  ;;  %vm2124_vm6 = vcmp.eq.f32.partialorder %v7699_v42, 0.0  ;;  %v9746_v36 = vld [vmem:[#allocation14_spill] sm:$0xff]  ;;  %v9747_v31 = vld [vmem:[#allocation17_spill] sm:$0xff]  ;;  %v9752_v59 = vld [vmem:[#allocation20_spill] sm:$0xff] }
 0x1ea   : > { %vm2117_vm7 = vcmp.eq.f32.partialorder %v7664_v32, 0.0  ;;  %vm2129_vm8 = vcmp.eq.f32.partialorder %v7687_v34, inf  ;;  %v2132_v28 = vand.u32 2147483648, %v7687_v34  ;;  %vm2131_vm9 = vcmp.eq.f32.partialorder %v7687_v34, 0.0  ;;  %v9736_v32 = vld [vmem:[#allocation4_spill] sm:$0xff]  ;;  %v9750_v4 = vld [vmem:[#allocation18_spill] sm:$0xff] }
 0x1eb   : > { %5810 = vmatmul.mubr.msk.f32.gmra.mxu1 %vm884_vm0, %v2105_v40  ;;  %v2123_v13 = vsel %vm2122_vm5, %v7699_v42, %v2121_v58  ;;  %v2119_v55 = vsel %vm2117_vm7, %v2118_v57, %v2116_v8  ;;  %v2130_v18 = vsel %vm2129_vm8, %v7687_v34, %v2128_v22  ;;  %v9735_v42 = vld [vmem:[#allocation5_spill] sm:$0xff]  ;;  %v9741_v34 = vld [vmem:[#allocation11_spill] sm:$0xff]  ;;  %v9751_v15 = vld [vmem:[#allocation22_spill] sm:$0xff] }
 0x1ec   : > { %5812 = vmatprep.mubr.msk.f32.mxu1 %vm884_vm0, %v2112_v49  ;;  %v2126_v33 = vsel %vm2124_vm6, %v2125_v6, %v2123_v13  ;;  %v2133_v21 = vsel %vm2131_vm9, %v2132_v28, %v2130_v18  ;;  %v9753_v49 = vld [vmem:[#allocation24_spill] sm:$0xff]  ;;  %v9754_v58 = vld [vmem:[#allocation23_spill] sm:$0xff]  ;;  %v9755_v40 = vld [vmem:[#allocation26_spill] sm:$0xff] }
 0x1ed   : > { %v9756_v8 = vld [vmem:[#allocation25_spill] sm:$0xff]  ;;  %v9757_v13 = vld [vmem:[#allocation28_spill] sm:$0xff]  ;;  %v9758_v6 = vld [vmem:[#allocation27_spill] sm:$0xff] }
 0x1ee   : > { %v9759_v22 = vld [vmem:[#allocation30_spill] sm:$0xff]  ;;  %v9760_v57 = vld [vmem:[#allocation29_spill] sm:$0xff] }
 0x1ef   : > { %5813 = vmatmul.mubr.msk.f32.gmra.mxu1 %vm884_vm0, %v2119_v55  ;;  %v9762_v55 = vld [vmem:[#allocation31_spill] sm:$0xff]  ;;  %v9763_v18 = vld [vmem:[#allocation34_spill] sm:$0xff]  ;;  %v9764_v28 = vld [vmem:[#allocation33_spill] sm:$0xff] }
 0x1f0   : > { %5815 = vmatprep.mubr.msk.f32.mxu1 %vm884_vm0, %v2126_v33  ;;  %v9761_v33 = vld [vmem:[#allocation32_spill] sm:$0xff] }
 0x1f3   : > { %5816 = vmatmul.mubr.msk.f32.gmra.mxu1 %vm884_vm0, %v2133_v21  ;;  %v9765_v21 = vld [vmem:[#allocation36_spill] sm:$0xff] }
 0x1f4   : > { %5878 = vmatprep.mubr.msk.f32.mxu1 %vm884_vm0, %v9735_v42  ;;  %v9766_v42 = vld [vmem:[#allocation35_spill] sm:$0xff] }
 0x1f7   : > { %5879 = vmatmul.mubr.msk.f32.vlgmr.msra.gmra.mxu1 %vm884_vm0, %v9736_v32  ;;  %v9767_v32 = vld [vmem:[#allocation38_spill] sm:$0xff] }
 0x1f8   : > { %5881 = vmatprep.mubr.msk.f32.mxu1 %vm884_vm0, %v9737_v20  ;;  %v9768_v20 = vld [vmem:[#allocation37_spill] sm:$0xff] }
 0x1fb   : > { %5882 = vmatmul.mubr.msk.f32.gmra.mxu1 %vm884_vm0, %v9738_v1  ;;  %v5828_v1 = vpop.f32.mrf.mxu0 }
 0x1fc   : > { %5884 = vmatprep.mubr.msk.f32.mxu1 %vm884_vm0, %v9739_v61  ;;  %v9769_v61 = vld [vmem:[#allocation40_spill] sm:$0xff] }
 0x1ff   : > { %5885 = vmatmul.mubr.msk.f32.gmra.mxu1 %vm884_vm0, %v9740_v46  ;;  %v9770_v46 = vld [vmem:[#allocation39_spill] sm:$0xff] }
 0x200   : > { %5887 = vmatprep.mubr.msk.f32.mxu1 %vm884_vm0, %v9741_v34  ;;  %v2624_v34 = vpop.f32.mrf.mxu0 }
 0x203   : > { %5888 = vmatmul.mubr.msk.f32.gmra.mxu1 %vm884_vm0, %v9742_v14  ;;  %v9771_v14 = vld [vmem:[#allocation42_spill] sm:$0xff] }
 0x204   : > { %5890 = vmatprep.mubr.msk.f32.mxu1 %vm884_vm0, %v9743_v5  ;;  %v9772_v5 = vld [vmem:[#allocation41_spill] sm:$0xff] }
 0x207   : > { %5891 = vmatmul.mubr.msk.f32.gmra.mxu1 %vm884_vm0, %v9744_v19  ;;  %v5831_v19 = vpop.f32.mrf.mxu0 }
 0x208   : > { %5893 = vmatprep.mubr.msk.f32.mxu1 %vm884_vm0, %v9745_v2  ;;  %v9773_v2 = vld [vmem:[#allocation44_spill] sm:$0xff] }
 0x20b   : > { %5894 = vmatmul.mubr.msk.f32.gmra.mxu1 %vm884_vm0, %v9746_v36  ;;  %v9774_v36 = vld [vmem:[#allocation43_spill] sm:$0xff] }
 0x20c   : > { %5896 = vmatprep.mubr.msk.f32.mxu1 %vm884_vm0, %v9747_v31  ;;  %v2634_v31 = vpop.f32.mrf.mxu0 }
 0x20f   : > { %5897 = vmatmul.mubr.msk.f32.gmra.mxu1 %vm884_vm0, %v9748_v43  ;;  %v9775_v43 = vld [vmem:[#allocation46_spill] sm:$0xff] }
 0x210   : > { %5899 = vmatprep.mubr.msk.f32.mxu1 %vm884_vm0, %v9749_v30  ;;  %v9776_v30 = vld [vmem:[#allocation45_spill] sm:$0xff] }
 0x213   : > { %5900 = vmatmul.mubr.msk.f32.gmra.mxu1 %vm884_vm0, %v9750_v4  ;;  %v5834_v4 = vpop.f32.mrf.mxu0 }
 0x214   : > { %5902 = vmatprep.mubr.msk.f32.mxu1 %vm884_vm0, %v9751_v15  ;;  %v9777_v15 = vld [vmem:[#allocation47_spill] sm:$0xff] }
 0x217   : > { %5903 = vmatmul.mubr.msk.f32.gmra.mxu1 %vm884_vm0, %v9752_v59  ;;  %v7866_v59 = vpop.f32.mrf.mxu0 }
 0x218   : > { %5905 = vmatprep.mubr.msk.f32.mxu1 %vm884_vm0, %v9753_v49  ;;  %v9778_v49 = vld [vmem:[#allocation48_spill] sm:$0xff] }
 0x21b   : > { %5906 = vmatmul.mubr.msk.f32.gmra.mxu1 %vm884_vm0, %v9754_v58  ;;  %v7872_v58 = vpop.f32.mrf.mxu0 }
 0x21c   : > { %5908 = vmatprep.mubr.msk.f32.mxu1 %vm884_vm0, %v9755_v40 }
 0x21f   : > { %5909 = vmatmul.mubr.msk.f32.gmra.mxu1 %vm884_vm0, %v9756_v8  ;;  %v9784_v8 = vld [vmem:[#allocation63_spill] sm:$0xff] }
 0x220   : > { %5911 = vmatprep.mubr.msk.f32.mxu1 %vm884_vm0, %v9757_v13 }
 0x223   : > { %5912 = vmatmul.mubr.msk.f32.gmra.mxu1 %vm884_vm0, %v9758_v6 }
 0x224   : > { %5914 = vmatprep.mubr.msk.f32.mxu1 %vm884_vm0, %v9759_v22 }
 0x227   : > { %5915 = vmatmul.mubr.msk.f32.gmra.mxu1 %vm884_vm0, %v9760_v57 }
 0x228   : > { %5917 = vmatprep.mubr.msk.f32.mxu1 %vm884_vm0, %v9761_v33  ;;  %v9785_v33 = vld [vmem:[#allocation62_spill] sm:$0xff] }
 0x22b   : > { %5918 = vmatmul.mubr.msk.f32.gmra.mxu1 %vm884_vm0, %v9762_v55 }
 0x22c   : > { %5920 = vmatprep.mubr.msk.f32.mxu1 %vm884_vm0, %v9763_v18 }
 0x22f   : > { %5921 = vmatmul.mubr.msk.f32.gmra.mxu1 %vm884_vm0, %v9764_v28 }
 0x230   : > { %5923 = vmatprep.mubr.msk.f32.mxu1 %vm884_vm0, %v9765_v21  ;;  %v9786_v21 = vld [vmem:[#allocation65_spill] sm:$0xff] }
 0x233   : > { %5924 = vmatmul.mubr.msk.f32.gmra.mxu1 %vm884_vm0, %v9766_v42 }
 0x234   : > { %5926 = vmatprep.mubr.msk.f32.mxu1 %vm884_vm0, %v9767_v32 }
 0x237   : > { %5927 = vmatmul.mubr.msk.f32.gmra.mxu1 %vm884_vm0, %v9768_v20 }
 0x238   : > { %5929 = vmatprep.mubr.msk.f32.mxu1 %vm884_vm0, %v9769_v61 }
 0x23b   : > { %5930 = vmatmul.mubr.msk.f32.gmra.mxu1 %vm884_vm0, %v9770_v46 }
 0x23c   : > { %5932 = vmatprep.mubr.msk.f32.mxu1 %vm884_vm0, %v9771_v14 }
 0x23f   : > { %5933 = vmatmul.mubr.msk.f32.gmra.mxu1 %vm884_vm0, %v9772_v5 }
 0x240   : > { %5935 = vmatprep.mubr.msk.f32.mxu1 %vm884_vm0, %v9773_v2 }
 0x243   : > { %5936 = vmatmul.mubr.msk.f32.gmra.mxu1 %vm884_vm0, %v9774_v36  ;;  %v9788_v36 = vld [vmem:[#allocation49_spill] sm:$0xff] }
 0x244   : > { %5938 = vmatprep.mubr.msk.f32.mxu1 %vm884_vm0, %v9775_v43 }
 0x247   : > { %5939 = vmatmul.mubr.msk.f32.gmra.mxu1 %vm884_vm0, %v9776_v30 }
 0x248   : > { %5941 = vmatprep.mubr.msk.f32.mxu1 %vm884_vm0, %v6991_v37  ;;  %v7878_v37 = vpop.f32.mrf.mxu0 }
 0x24b   : > { %5942 = vmatmul.mubr.msk.f32.gmra.mxu1 %vm884_vm0, %v9777_v15 }
 0x24c   : > { %5944 = vmatprep.mubr.msk.f32.mxu1 %vm884_vm0, %v6999_v48  ;;  %v7884_v48 = vpop.f32.mrf.mxu0 }
 0x24f   : > { %5945 = vmatmul.mubr.msk.f32.gmra.mxu1 %vm884_vm0, %v9778_v49 }
 0x250   : > { %5947 = vmatprep.mubr.msk.f32.mxu1 %vm884_vm0, %v7007_v56  ;;  %v7890_v56 = vpop.f32.mrf.mxu0 }
 0x253   : > { %5948 = vmatmul.mubr.msk.f32.gmra.mxu1 %vm884_vm0, %v7003_v54  ;;  %v7896_v54 = vpop.f32.mrf.mxu0 }
 0x254   : > { %5950 = vmatprep.mubr.msk.f32.mxu1 %vm884_vm0, %v7013_v63 }
 0x257   : > { %5951 = vmatmul.mubr.msk.f32.gmra.mxu1 %vm884_vm0, %v7010_v60  ;;  %v7902_v60 = vpop.f32.mrf.mxu0 }
 0x258   : > { %5953 = vmatprep.mubr.msk.f32.mxu1 %vm884_vm0, %v7017_v12 }
 0x259   : > { %v7908_v63 = vpop.f32.mrf.mxu0 }
 0x25b   : > { %5954 = vmatmul.mubr.msk.f32.gmra.mxu1 %vm884_vm0, %v7015_v0  ;;  %v9779_v0 = vld [vmem:[#allocation51_spill] sm:$0xff]  ;;  %v7914_v12 = vpop.f32.mrf.mxu0 }
 0x25c   : > { %5956 = vmatprep.mubr.msk.f32.mxu1 %vm884_vm0, %v7021_v17  ;;  %v9781_v17 = vld [vmem:[#allocation52_spill] sm:$0xff] }
 0x25f   : > { %5957 = vmatmul.mubr.msk.f32.gmra.mxu1 %vm884_vm0, %v7019_v16  ;;  %v9780_v16 = vld [vmem:[#allocation57_spill] sm:$0xff] }
 0x260   : > { %5959 = vmatprep.mubr.msk.f32.mxu1 %vm884_vm0, %v7025_v24  ;;  %v9782_v24 = vld [vmem:[#allocation61_spill] sm:$0xff] }
 0x263   : > { %5960 = vmatmul.mubr.msk.f32.gmra.mxu1 %vm884_vm0, %v7023_v23  ;;  %v7920_v23 = vpop.f32.mrf.mxu0 }
 0x264   : > { %5962 = vmatprep.mubr.msk.f32.mxu1 %vm884_vm0, %v9714_v7  ;;  %v7929_v7 = vld [vmem:[%s9522_s5] ss:$0 sm:$0xff] }
 0x265   : > { %v7931_v40 = vpop.f32.mrf.mxu0 }
 0x267   : > { %5963 = vmatmul.mubr.msk.f32.gmra.mxu1 %vm884_vm0, %v9713_v25  ;;  %v9783_v25 = vld [vmem:[#allocation60_spill] sm:$0xff]  ;;  %v7945_v18 = vpop.f32.mrf.mxu0 }
 0x268   : > { %5965 = vmatprep.mubr.msk.f32.mxu1 %vm884_vm0, %v7067_v11 }
 0x269   : > { %v7955_v5 = vpop.f32.mrf.mxu0 }
 0x26b   : > { %5966 = vmatmul.mubr.msk.f32.gmra.mxu1 %vm884_vm0, %v9779_v0  ;;  %v9789_v0 = vld [vmem:[#allocation66_spill] sm:$0xff] }
 0x26c   : > { %5968 = vmatprep.mubr.msk.f32.mxu1 %vm884_vm0, %v9780_v16 }
 0x26f   : > { %5969 = vmatmul.mubr.msk.f32.gmra.mxu1 %vm884_vm0, %v9781_v17  ;;  %v7968_v17 = vpop.f32.mrf.mxu0 }
 0x270   : > { %5971 = vmatprep.mubr.msk.f32.mxu1 %vm884_vm0, %v9782_v24 }
 0x271   : > { %v5772_v11 = vpop.f32.mrf.mxu1 }
 0x272   : > { %v2630_v13 = vadd.f32 %v5828_v1, %v5772_v11 }
 0x273   : > { %5972 = vmatmul.mubr.msk.f32.gmra.mxu1 %vm884_vm0, %v9783_v25  ;;  %v2302_v6 = vpop.f32.mrf.mxu1  ;;  %v9790_v25 = vld [vmem:[#allocation53_spill] sm:$0xff] }
 0x274   : > { %5974 = vmatprep.mubr.msk.f32.mxu1 %vm884_vm0, %v9784_v8  ;;  %v2791_v22 = vadd.f32 %v7929_v7, %v2630_v13  ;;  %v2625_v57 = vadd.f32 %v2624_v34, %v2302_v6  ;;  %v9787_v34 = vld [vmem:[#allocation64_spill] sm:$0xff] }
 0x275   : > { %v5775_v55 = vpop.f32.mrf.mxu1 }
 0x276   : > { %v2823_v28 = vmax.f32 %v2791_v22, 0.0  ;;  %v2790_v42 = vadd.f32 %v7929_v7, %v2625_v57  ;;  %v2640_v32 = vadd.f32 %v5831_v19, %v5775_v55  ;;  %v9791_v22 = vld [vmem:[#allocation50_spill] sm:$0xff] }
 0x277   : > { %5975 = vmatmul.mubr.msk.f32.gmra.mxu1 %vm884_vm0, %v9785_v33  ;;  %v2312_v20 = vpop.f32.mrf.mxu1  ;;  %v7982_v33 = vpop.f32.mrf.mxu0 }
 0x278   : > { %5977 = vmatprep.mubr.msk.f32.mxu1 %vm884_vm0, %v9786_v21  ;;  %2855 = vst.msk [vmem:[%s7941_s21 + $0x8] sm:$0xff] %vm2461_vm1, %v2823_v28  ;;  %v2822_v1 = vmax.f32 %v2790_v42, 0.0  ;;  %v2793_v61 = vadd.f32 %v7929_v7, %v2640_v32  ;;  %v2635_v46 = vadd.f32 %v2634_v31, %v2312_v20  ;;  %v9792_v28 = vld [vmem:[#allocation55_spill] sm:$0xff] }
 0x27a   : > { %2854 = vst.msk [vmem:[%s7941_s21] sm:$0xff] %vm2461_vm1, %v2822_v1  ;;  %v2825_v2 = vmax.f32 %v2793_v61, 0.0  ;;  %v2792_v19 = vadd.f32 %v7929_v7, %v2635_v46  ;;  %v9793_v1 = vld [vmem:[#allocation54_spill] sm:$0xff]  ;;  %v7996_v46 = vpop.f32.mrf.mxu0 }
 0x27b   : > { %5978 = vmatmul.mubr.msk.f32.gmra.mxu1 %vm884_vm0, %v9787_v34  ;;  %v5778_v14 = vpop.f32.mrf.mxu1 }
 0x27c   : > { %5980 = vmatprep.mubr.msk.f32.mxu1 %vm884_vm0, %v9788_v36  ;;  %v2650_v43 = vadd.f32 %v5834_v4, %v5778_v14  ;;  %2857 = vst.msk [vmem:[%s7941_s21 + $0x18] sm:$0xff] %vm2461_vm1, %v2825_v2  ;;  %v2824_v31 = vmax.f32 %v2792_v19, 0.0  ;;  %v9794_v14 = vld [vmem:[#allocation58_spill] sm:$0xff] }
 0x27d   : > { %v2322_v30 = vpop.f32.mrf.mxu1 }
 0x27e   : > { %v2795_v15 = vadd.f32 %v7929_v7, %v2650_v43  ;;  %v2645_v49 = vadd.f32 %v7866_v59, %v2322_v30  ;;  %2856 = vst.msk [vmem:[%s7941_s21 + $0x10] sm:$0xff] %vm2461_vm1, %v2824_v31  ;;  %v9795_v30 = vld [vmem:[#allocation56_spill] sm:$0xff]  ;;  %v8010_v31 = vpop.f32.mrf.mxu0 }
 0x27f   : > { %5981 = vmatmul.mubr.msk.f32.gmra.mxu1 %vm884_vm0, %v9789_v0  ;;  %v5781_v16 = vpop.f32.mrf.mxu1 }
 0x280   : > { %v2827_v24 = vmax.f32 %v2795_v15, 0.0  ;;  %5983 = vmatprep.mubr.msk.f32.mxu1 %vm884_vm0, %v9790_v25  ;;  %v2794_v4 = vadd.f32 %v7929_v7, %v2645_v49  ;;  %v2660_v11 = vadd.f32 %v7872_v58, %v5781_v16  ;;  %v9796_v49 = vld [vmem:[#allocation67_spill] sm:$0xff] }
 0x281   : > { %v2332_v8 = vpop.f32.mrf.mxu1 }
 0x282   : > { %2859 = vst.msk [vmem:[%s7941_s21 + $0x28] sm:$0xff] %vm2461_vm1, %v2827_v24  ;;  %v2826_v59 = vmax.f32 %v2794_v4, 0.0  ;;  %v2797_v13 = vadd.f32 %v7929_v7, %v2660_v11  ;;  %v2655_v6 = vadd.f32 %v7878_v37, %v2332_v8  ;;  %v9797_v4 = vld [vmem:[#allocation59_spill] sm:$0xff]  ;;  %v5861_v8 = vpop.f32.mrf.mxu0 }
 0x283   : > { %5984 = vmatmul.mubr.msk.f32.gmra.mxu1 %vm884_vm0, %v9791_v22  ;;  %v5784_v57 = vpop.f32.mrf.mxu1 }
 0x284   : > { %2858 = vst.msk [vmem:[%s7941_s21 + $0x20] sm:$0xff] %vm2461_vm1, %v2826_v59  ;;  %v2829_v55 = vmax.f32 %v2797_v13, 0.0  ;;  %5986 = vmatprep.mubr.msk.f32.mxu1 %vm884_vm0, %v9792_v28  ;;  %v2796_v58 = vadd.f32 %v7929_v7, %v2655_v6  ;;  %v2670_v21 = vadd.f32 %v7884_v48, %v5784_v57 }
 0x285   : > { %v2342_v42 = vpop.f32.mrf.mxu1 }
 0x286   : > { %2861 = vst.msk [vmem:[%s7941_s21 + $0x38] sm:$0xff] %vm2461_vm1, %v2829_v55  ;;  %v2828_v37 = vmax.f32 %v2796_v58, 0.0  ;;  %v2799_v32 = vadd.f32 %v7929_v7, %v2670_v21  ;;  %v2665_v20 = vadd.f32 %v7890_v56, %v2342_v42 }
 0x287   : > { %5987 = vmatmul.mubr.msk.f32.gmra.mxu1 %vm884_vm0, %v9793_v1  ;;  %v5787_v61 = vpop.f32.mrf.mxu1 }
 0x288   : > { %2860 = vst.msk [vmem:[%s7941_s21 + $0x30] sm:$0xff] %vm2461_vm1, %v2828_v37  ;;  %v2831_v34 = vmax.f32 %v2799_v32, 0.0  ;;  %5989 = vmatprep.mubr.msk.f32.mxu1 %vm884_vm0, %v9794_v14  ;;  %v2798_v48 = vadd.f32 %v7929_v7, %v2665_v20  ;;  %v2680_v2 = vadd.f32 %v7896_v54, %v5787_v61 }
 0x289   : > { %v2352_v36 = vpop.f32.mrf.mxu1 }
 0x28a   : > { %2863 = vst.msk [vmem:[%s7941_s21 + $0x48] sm:$0xff] %vm2461_vm1, %v2831_v34  ;;  %v2830_v56 = vmax.f32 %v2798_v48, 0.0  ;;  %v2801_v19 = vadd.f32 %v7929_v7, %v2680_v2  ;;  %v2675_v43 = vadd.f32 %v7902_v60, %v2352_v36 }
 0x28b   : > { %5990 = vmatmul.mubr.msk.f32.gmra.mxu1 %vm884_vm0, %v9795_v30 }
 0x28c   : > { %2862 = vst.msk [vmem:[%s7941_s21 + $0x40] sm:$0xff] %vm2461_vm1, %v2830_v56  ;;  %v2833_v15 = vmax.f32 %v2801_v19, 0.0  ;;  %5992 = vmatprep.mubr.msk.f32.mxu1 %vm884_vm0, %v9796_v49  ;;  %v2800_v54 = vadd.f32 %v7929_v7, %v2675_v43  ;;  %v5790_v0 = vpop.f32.mrf.mxu1 }
 0x28d   : > { %v2690_v16 = vadd.f32 %v7908_v63, %v5790_v0 }
 0x28e   : > { %2865 = vst.msk [vmem:[%s7941_s21 + $0x58] sm:$0xff] %vm2461_vm1, %v2833_v15  ;;  %v2832_v60 = vmax.f32 %v2800_v54, 0.0  ;;  %v2362_v24 = vpop.f32.mrf.mxu1 }
 0x28f   : > { %v2803_v25 = vadd.f32 %v7929_v7, %v2690_v16  ;;  %5993 = vmatmul.mubr.msk.f32.gmra.mxu1 %vm884_vm0, %v9797_v4  ;;  %v2685_v11 = vadd.f32 %v7914_v12, %v2362_v24  ;;  %v2734_v12 = vpop.f32.mrf.mxu0 }
 0x290   : > { %2864 = vst.msk [vmem:[%s7941_s21 + $0x50] sm:$0xff] %vm2461_vm1, %v2832_v60  ;;  %5995 = vmatprep.mubr.msk.f32.mxu1 %vm884_vm0, %v7423_v53 }
 0x291   : > { %v2835_v59 = vmax.f32 %v2803_v25, 0.0  ;;  %v2802_v63 = vadd.f32 %v7929_v7, %v2685_v11 }
 0x292   : > { %v5793_v13 = vpop.f32.mrf.mxu1 }
 0x293   : > { %2867 = vst.msk [vmem:[%s7941_s21 + $0x68] sm:$0xff] %vm2461_vm1, %v2835_v59  ;;  %v2834_v6 = vmax.f32 %v2802_v63, 0.0  ;;  %v2700_v22 = vadd.f32 %v7920_v23, %v5793_v13  ;;  %5996 = vmatmul.mubr.msk.f32.gmra.mxu1 %vm884_vm0, %v7403_v50  ;;  %v5864_v50 = vpop.f32.mrf.mxu0 }
 0x294   : > { %5998 = vmatprep.mubr.msk.f32.mxu1 %vm884_vm0, %v7460_v3  ;;  %v2372_v57 = vpop.f32.mrf.mxu1 }
 0x295   : > { %2866 = vst.msk [vmem:[%s7941_s21 + $0x60] sm:$0xff] %vm2461_vm1, %v2834_v6  ;;  %v2805_v53 = vadd.f32 %v7929_v7, %v2700_v22  ;;  %v2695_v55 = vadd.f32 %v7931_v40, %v2372_v57 }
 0x297   : > { %v2837_v28 = vmax.f32 %v2805_v53, 0.0  ;;  %v2804_v58 = vadd.f32 %v7929_v7, %v2695_v55  ;;  %v5796_v21 = vpop.f32.mrf.mxu1  ;;  %5999 = vmatmul.mubr.msk.f32.gmra.mxu1 %vm884_vm0, %v7442_v26  ;;  %v2744_v26 = vpop.f32.mrf.mxu0 }
 0x298   : > { %v2710_v23 = vadd.f32 %v7945_v18, %v5796_v21  ;;  %6001 = vmatprep.mubr.msk.f32.mxu1 %vm884_vm0, %v7498_v38 }
 0x299   : > { %2869 = vst.msk [vmem:[%s7941_s21 + $0x78] sm:$0xff] %vm2461_vm1, %v2837_v28  ;;  %v2836_v3 = vmax.f32 %v2804_v58, 0.0  ;;  %v2382_v42 = vpop.f32.mrf.mxu1 }
 0x29a   : > { %v2807_v40 = vadd.f32 %v7929_v7, %v2710_v23  ;;  %v2705_v37 = vadd.f32 %v7955_v5, %v2382_v42 }
 0x29b   : > { %2868 = vst.msk [vmem:[%s7941_s21 + $0x70] sm:$0xff] %vm2461_vm1, %v2836_v3  ;;  %v5799_v32 = vpop.f32.mrf.mxu1  ;;  %6002 = vmatmul.mubr.msk.f32.gmra.mxu1 %vm884_vm0, %v7478_v9  ;;  %v5867_v9 = vpop.f32.mrf.mxu0 }
 0x29c   : > { %v2839_v18 = vmax.f32 %v2807_v40, 0.0  ;;  %v2806_v20 = vadd.f32 %v7929_v7, %v2705_v37  ;;  %v2720_v38 = vadd.f32 %v7968_v17, %v5799_v32  ;;  %6004 = vmatprep.mubr.msk.f32.mxu1 %vm884_vm0, %v7533_v10 }
 0x29d   : > { %v2392_v1 = vpop.f32.mrf.mxu1  ;;  %v2754_v19 = vpop.f32.mrf.mxu0 }
 0x29e   : > { %2871 = vst.msk [vmem:[%s7941_s21 + $0x88] sm:$0xff] %vm2461_vm1, %v2839_v18  ;;  %v2838_v5 = vmax.f32 %v2806_v20, 0.0  ;;  %v2809_v61 = vadd.f32 %v7929_v7, %v2720_v38  ;;  %v2715_v34 = vadd.f32 %v7982_v33, %v2392_v1 }
 0x29f   : > { %v5802_v14 = vpop.f32.mrf.mxu1  ;;  %6005 = vmatmul.mubr.msk.f32.gmra.mxu1 %vm884_vm0, %v7518_v45 }
 0x2a0   : > { %2870 = vst.msk [vmem:[%s7941_s21 + $0x80] sm:$0xff] %vm2461_vm1, %v2838_v5  ;;  %v2841_v17 = vmax.f32 %v2809_v61, 0.0  ;;  %v2808_v48 = vadd.f32 %v7929_v7, %v2715_v34  ;;  %v2730_v10 = vadd.f32 %v7996_v46, %v5802_v14  ;;  %6007 = vmatprep.mubr.msk.f32.mxu1 %vm884_vm0, %v7563_v47 }
 0x2a1   : > { %v2402_v2 = vpop.f32.mrf.mxu1 }
 0x2a2   : > { %2873 = vst.msk [vmem:[%s7941_s21 + $0x98] sm:$0xff] %vm2461_vm1, %v2841_v17  ;;  %v2840_v33 = vmax.f32 %v2808_v48, 0.0  ;;  %v2811_v36 = vadd.f32 %v7929_v7, %v2730_v10  ;;  %v2725_v45 = vadd.f32 %v8010_v31, %v2402_v2 }
 0x2a3   : > { %v5805_v56 = vpop.f32.mrf.mxu1  ;;  %6008 = vmatmul.mubr.msk.f32.gmra.mxu1 %vm884_vm0, %v7549_v41  ;;  %v5870_v41 = vpop.f32.mrf.mxu0 }
 0x2a4   : > { %2872 = vst.msk [vmem:[%s7941_s21 + $0x90] sm:$0xff] %vm2461_vm1, %v2840_v33  ;;  %v2843_v46 = vmax.f32 %v2811_v36, 0.0  ;;  %v2810_v43 = vadd.f32 %v7929_v7, %v2725_v45  ;;  %v2740_v47 = vadd.f32 %v5861_v8, %v5805_v56  ;;  %6010 = vmatprep.mubr.msk.f32.mxu1 %vm884_vm0, %v7593_v52 }
 0x2a5   : > { %v2412_v30 = vpop.f32.mrf.mxu1 }
 0x2a6   : > { %2875 = vst.msk [vmem:[%s7941_s21 + $0xa8] sm:$0xff] %vm2461_vm1, %v2843_v46  ;;  %v2842_v31 = vmax.f32 %v2810_v43, 0.0  ;;  %v2813_v15 = vadd.f32 %v7929_v7, %v2740_v47  ;;  %v2735_v49 = vadd.f32 %v2734_v12, %v2412_v30 }
 0x2a7   : > { %v5808_v54 = vpop.f32.mrf.mxu1  ;;  %6011 = vmatmul.mubr.msk.f32.gmra.mxu1 %vm884_vm0, %v7580_v51  ;;  %v2764_v51 = vpop.f32.mrf.mxu0 }
 0x2a8   : > { %2874 = vst.msk [vmem:[%s7941_s21 + $0xa0] sm:$0xff] %vm2461_vm1, %v2842_v31  ;;  %v2845_v0 = vmax.f32 %v2813_v15, 0.0  ;;  %v2812_v16 = vadd.f32 %v7929_v7, %v2735_v49  ;;  %v2750_v60 = vadd.f32 %v5864_v50, %v5808_v54  ;;  %6013 = vmatprep.mubr.msk.f32.mxu1 %vm884_vm0, %v7623_v62 }
 0x2a9   : > { %v2422_v52 = vpop.f32.mrf.mxu1 }
 0x2aa   : > { %2877 = vst.msk [vmem:[%s7941_s21 + $0xb8] sm:$0xff] %vm2461_vm1, %v2845_v0  ;;  %v2844_v24 = vmax.f32 %v2812_v16, 0.0  ;;  %v2815_v25 = vadd.f32 %v7929_v7, %v2750_v60  ;;  %v2745_v4 = vadd.f32 %v2744_v26, %v2422_v52 }
 0x2ab   : > { %v5811_v11 = vpop.f32.mrf.mxu1  ;;  %6014 = vmatmul.mubr.msk.f32.gmra.mxu1 %vm884_vm0, %v7609_v29  ;;  %v5873_v29 = vpop.f32.mrf.mxu0 }
 0x2ac   : > { %2876 = vst.msk [vmem:[%s7941_s21 + $0xb0] sm:$0xff] %vm2461_vm1, %v2844_v24  ;;  %v2847_v8 = vmax.f32 %v2815_v25, 0.0  ;;  %v2814_v59 = vadd.f32 %v7929_v7, %v2745_v4  ;;  %v2760_v63 = vadd.f32 %v5867_v9, %v5811_v11  ;;  %6016 = vmatprep.mubr.msk.f32.mxu1 %vm884_vm0, %v7649_v39 }
 0x2ad   : > { %v2432_v62 = vpop.f32.mrf.mxu1  ;;  %v2774_v50 = vpop.f32.mrf.mxu0 }
 0x2ae   : > { %2879 = vst.msk [vmem:[%s7941_s21 + $0xc8] sm:$0xff] %vm2461_vm1, %v2847_v8  ;;  %v2846_v13 = vmax.f32 %v2814_v59, 0.0  ;;  %v2817_v6 = vadd.f32 %v7929_v7, %v2760_v63  ;;  %v2755_v22 = vadd.f32 %v2754_v19, %v2432_v62 }
 0x2af   : > { %v5814_v12 = vpop.f32.mrf.mxu1  ;;  %6017 = vmatmul.mubr.msk.f32.gmra.mxu1 %vm884_vm0, %v7635_v27 }
 0x2b0   : > { %2878 = vst.msk [vmem:[%s7941_s21 + $0xc0] sm:$0xff] %vm2461_vm1, %v2846_v13  ;;  %v2849_v57 = vmax.f32 %v2817_v6, 0.0  ;;  %v2816_v53 = vadd.f32 %v7929_v7, %v2755_v22  ;;  %v2770_v39 = vadd.f32 %v5870_v41, %v5814_v12  ;;  %6019 = vmatprep.mubr.msk.f32.mxu1 %vm884_vm0, %v7673_v44 }
 0x2b1   : > { %v2442_v55 = vpop.f32.mrf.mxu1 }
 0x2b2   : > { %2881 = vst.msk [vmem:[%s7941_s21 + $0xd8] sm:$0xff] %vm2461_vm1, %v2849_v57  ;;  %v2848_v28 = vmax.f32 %v2816_v53, 0.0  ;;  %v2819_v58 = vadd.f32 %v7929_v7, %v2770_v39  ;;  %v2765_v21 = vadd.f32 %v2764_v51, %v2442_v55 }
 0x2b3   : > { %v5817_v27 = vpop.f32.mrf.mxu1  ;;  %6020 = vmatmul.mubr.msk.f32.gmra.mxu1 %vm884_vm0, %v7661_v35 }
 0x2b4   : > { %2880 = vst.msk [vmem:[%s7941_s21 + $0xd0] sm:$0xff] %vm2461_vm1, %v2848_v28  ;;  %v2851_v23 = vmax.f32 %v2819_v58, 0.0  ;;  %v2818_v44 = vadd.f32 %v7929_v7, %v2765_v21  ;;  %v2780_v3 = vadd.f32 %v5873_v29, %v5817_v27 }
 0x2b5   : > { %v2452_v42 = vpop.f32.mrf.mxu1 }
 0x2b6   : > { %2883 = vst.msk [vmem:[%s7941_s21 + $0xe8] sm:$0xff] %vm2461_vm1, %v2851_v23  ;;  %v2850_v40 = vmax.f32 %v2818_v44, 0.0  ;;  %v2821_v37 = vadd.f32 %v7929_v7, %v2780_v3  ;;  %v2775_v32 = vadd.f32 %v2774_v50, %v2452_v42 }
 0x2b7   : > { %v8122_v26 = vpop.f32.mrf.mxu1 }
 0x2b8   : > { %9798 = vst [vmem:[#allocation21_spill] sm:$0xff] %v8122_v26  ;;  %2882 = vst.msk [vmem:[%s7941_s21 + $0xe0] sm:$0xff] %vm2461_vm1, %v2850_v40  ;;  %v2853_v35 = vmax.f32 %v2821_v37, 0.0  ;;  %v2820_v18 = vadd.f32 %v7929_v7, %v2775_v32  ;;  %v3722_v37 = vmul.f32 %v8122_v26, %v8122_v26 }
 0x2b9   : > { %v8127_v20 = vpop.f32.mrf.mxu1 }
 0x2ba   : > { %9799 = vst [vmem:[#allocation5_spill] sm:$0xff] %v8127_v20  ;;  %2885 = vst.msk [vmem:[%s7941_s21 + $0xf8] sm:$0xff] %vm2461_vm1, %v2853_v35  ;;  %v2852_v38 = vmax.f32 %v2820_v18, 0.0  ;;  %v3721_v32 = vmul.f32 %v8127_v20, %v8127_v20 }
 0x2bb   : > { %v8131_v1 = vpop.f32.mrf.mxu1 }
 0x2bc   : > { %9800 = vst [vmem:[#allocation4_spill] sm:$0xff] %v8131_v1  ;;  %2884 = vst.msk [vmem:[%s7941_s21 + $0xf0] sm:$0xff] %vm2461_vm1, %v2852_v38  ;;  %v3724_v35 = vmul.f32 %v8131_v1, %v8131_v1 }
 0x2bd   : > { %v8135_v5 = vpop.f32.mrf.mxu1 }
 0x2be   : > { %9801 = vst [vmem:[#allocation7_spill] sm:$0xff] %v8135_v5  ;;  %v3723_v18 = vmul.f32 %v8135_v5, %v8135_v5 }
 0x2bf   : > { %v8137_v61 = vpop.f32.mrf.mxu1 }
 0x2c0   : > { %9802 = vst [vmem:[#allocation6_spill] sm:$0xff] %v8137_v61  ;;  %v3726_v38 = vmul.f32 %v8137_v61, %v8137_v61 }
 0x2c1   : > { %v8139_v34 = vpop.f32.mrf.mxu1 }
 0x2c2   : > { %9803 = vst [vmem:[#allocation9_spill] sm:$0xff] %v8139_v34 }
 0x2c3   : > { %v8141_v14 = vpop.f32.mrf.mxu1 }
 0x2c4   : > { %9804 = vst [vmem:[#allocation8_spill] sm:$0xff] %v8141_v14 }
 0x2c5   : > { %v8143_v9 = vpop.f32.mrf.mxu1 }
 0x2c6   : > { %9805 = vst [vmem:[#allocation11_spill] sm:$0xff] %v8143_v9  ;;  %v3727_v20 = vmul.f32 %v8143_v9, %v8143_v9 }
 0x2c7   : > { %v8145_v7 = vpop.f32.mrf.mxu1 }
 0x2c8   : > { %9806 = vst [vmem:[#allocation10_spill] sm:$0xff] %v8145_v7  ;;  %v3730_v1 = vmul.f32 %v8145_v7, %v8145_v7 }
 0x2c9   : > { %v8147_v17 = vpop.f32.mrf.mxu1 }
 0x2ca   : > { %9807 = vst [vmem:[#allocation13_spill] sm:$0xff] %v8147_v17  ;;  %v3729_v5 = vmul.f32 %v8147_v17, %v8147_v17 }
 0x2cb   : > { %v8149_v48 = vpop.f32.mrf.mxu1 }
 0x2cc   : > { %9808 = vst [vmem:[#allocation12_spill] sm:$0xff] %v8149_v48  ;;  %v8271_v61 = vmul.f32 %v8149_v48, %v8149_v48 }
 0x2cd   : > { %v8151_v10 = vpop.f32.mrf.mxu1 }
 0x2ce   : > { %9809 = vst [vmem:[#allocation15_spill] sm:$0xff] %v8151_v10 }
 0x2cf   : > { %v8153_v2 = vpop.f32.mrf.mxu1 }
 0x2d0   : > { %9810 = vst [vmem:[#allocation14_spill] sm:$0xff] %v8153_v2 }
 0x2d1   : > { %v8155_v33 = vpop.f32.mrf.mxu1 }
 0x2d2   : > { %9811 = vst [vmem:[#allocation17_spill] sm:$0xff] %v8155_v33  ;;  %v8283_v9 = vmul.f32 %v8155_v33, %v8155_v33 }
 0x2d3   : > { %v8157_v36 = vpop.f32.mrf.mxu1 }
 0x2d4   : > { %9812 = vst [vmem:[#allocation16_spill] sm:$0xff] %v8157_v36  ;;  %v8287_v7 = vmul.f32 %v8157_v36, %v8157_v36 }
 0x2d5   : > { %v8159_v45 = vpop.f32.mrf.mxu1 }
 0x2d6   : > { %9813 = vst [vmem:[#allocation19_spill] sm:$0xff] %v8159_v45  ;;  %v8293_v48 = vmul.f32 %v8159_v45, %v8159_v45 }
 0x2d7   : > { %v8161_v56 = vpop.f32.mrf.mxu1 }
 0x2d8   : > { %9814 = vst [vmem:[#allocation18_spill] sm:$0xff] %v8161_v56 }
 0x2d9   : > { %v8163_v19 = vpop.f32.mrf.mxu1 }
 0x2da   : > { %9815 = vst [vmem:[#allocation22_spill] sm:$0xff] %v8163_v19 }
 0x2db   : > { %v8165_v46 = vpop.f32.mrf.mxu1 }
 0x2dc   : > { %9816 = vst [vmem:[#allocation20_spill] sm:$0xff] %v8165_v46  ;;  %v8305_v33 = vmul.f32 %v8165_v46, %v8165_v46 }
 0x2dd   : > { %v8167_v43 = vpop.f32.mrf.mxu1 }
 0x2de   : > { %9817 = vst [vmem:[#allocation24_spill] sm:$0xff] %v8167_v43  ;;  %v8309_v36 = vmul.f32 %v8167_v43, %v8167_v43 }
 0x2df   : > { %v8169_v47 = vpop.f32.mrf.mxu1 }
 0x2e0   : > { %9818 = vst [vmem:[#allocation23_spill] sm:$0xff] %v8169_v47  ;;  %v8313_v45 = vmul.f32 %v8169_v47, %v8169_v47 }
 0x2e1   : > { %v8171_v30 = vpop.f32.mrf.mxu1 }
 0x2e2   : > { %9819 = vst [vmem:[#allocation26_spill] sm:$0xff] %v8171_v30 }
 0x2e3   : > { %v8173_v31 = vpop.f32.mrf.mxu1 }
 0x2e4   : > { %9820 = vst [vmem:[#allocation25_spill] sm:$0xff] %v8173_v31 }
 0x2e5   : > { %v8175_v15 = vpop.f32.mrf.mxu1 }
 0x2e6   : > { %9821 = vst [vmem:[#allocation28_spill] sm:$0xff] %v8175_v15 }
 0x2e7   : > { %v8177_v49 = vpop.f32.mrf.mxu1 }
 0x2e8   : > { %9822 = vst [vmem:[#allocation27_spill] sm:$0xff] %v8177_v49 }
 0x2e9   : > { %v8179_v54 = vpop.f32.mrf.mxu1 }
 0x2ea   : > { %9823 = vst [vmem:[#allocation30_spill] sm:$0xff] %v8179_v54 }
 0x2eb   : > { %v8181_v41 = vpop.f32.mrf.mxu1 }
 0x2ec   : > { %9824 = vst [vmem:[#allocation29_spill] sm:$0xff] %v8181_v41 }
 0x2ed   : > { %v8183_v0 = vpop.f32.mrf.mxu1 }
 0x2ee   : > { %9825 = vst [vmem:[#allocation32_spill] sm:$0xff] %v8183_v0 }
 0x2ef   : > { %v8185_v16 = vpop.f32.mrf.mxu1 }
 0x2f0   : > { %9826 = vst [vmem:[#allocation31_spill] sm:$0xff] %v8185_v16 }
 0x2f1   : > { %v8187_v60 = vpop.f32.mrf.mxu1 }
 0x2f2   : > { %9827 = vst [vmem:[#allocation34_spill] sm:$0xff] %v8187_v60 }
 0x2f3   : > { %v8189_v52 = vpop.f32.mrf.mxu1 }
 0x2f4   : > { %9828 = vst [vmem:[#allocation33_spill] sm:$0xff] %v8189_v52 }
 0x2f5   : > { %v8191_v24 = vpop.f32.mrf.mxu1 }
 0x2f6   : > { %9829 = vst [vmem:[#allocation36_spill] sm:$0xff] %v8191_v24 }
 0x2f7   : > { %v8193_v25 = vpop.f32.mrf.mxu1 }
 0x2f8   : > { %9830 = vst [vmem:[#allocation35_spill] sm:$0xff] %v8193_v25  ;;  %v3754_v46 = vmul.f32 %v8193_v25, %v8193_v25  ;;  %v8343_v25 = vmul.f32 %v8179_v54, %v8179_v54 }
 0x2f9   : > { %v8195_v4 = vpop.f32.mrf.mxu1 }
 0x2fa   : > { %9831 = vst [vmem:[#allocation38_spill] sm:$0xff] %v8195_v4  ;;  %v3753_v43 = vmul.f32 %v8195_v4, %v8195_v4 }
 0x2fb   : > { %v8197_v11 = vpop.f32.mrf.mxu1 }
 0x2fc   : > { %9832 = vst [vmem:[#allocation37_spill] sm:$0xff] %v8197_v11  ;;  %v3756_v47 = vmul.f32 %v8197_v11, %v8197_v11  ;;  %v8363_v11 = vmul.f32 %v8185_v16, %v8185_v16 }
 0x2fd   : > { %v8199_v51 = vpop.f32.mrf.mxu1 }
 0x2fe   : > { %9833 = vst [vmem:[#allocation40_spill] sm:$0xff] %v8199_v51  ;;  %9856 = vst [vmem:[#allocation55_spill] sm:$0xff] %v8363_v11 }
 0x2ff   : > { %v8201_v8 = vpop.f32.mrf.mxu1 }
 0x300   : > { %9834 = vst [vmem:[#allocation39_spill] sm:$0xff] %v8201_v8  ;;  %v3758_v4 = vmul.f32 %v8201_v8, %v8201_v8  ;;  %v3786_v8 = vadd.f32 %v3754_v46, %v3722_v37 }
 0x301   : > { %v8203_v59 = vpop.f32.mrf.mxu1 }
 0x302   : > { %9835 = vst [vmem:[#allocation42_spill] sm:$0xff] %v8203_v59  ;;  %v3790_v16 = vadd.f32 %v3758_v4, %v3726_v38 }
 0x303   : > { %v8205_v63 = vpop.f32.mrf.mxu1 }
 0x304   : > { %9836 = vst [vmem:[#allocation41_spill] sm:$0xff] %v8205_v63  ;;  %v3760_v54 = vmul.f32 %v8205_v63, %v8205_v63  ;;  %v3785_v63 = vadd.f32 %v3753_v43, %v3721_v32 }
 0x305   : > { %v8207_v62 = vpop.f32.mrf.mxu1 }
 0x306   : > { %v3759_v11 = vmul.f32 %v8207_v62, %v8207_v62 }
 0x307   : > { %v8209_v13 = vpop.f32.mrf.mxu1 }
 0x309   : > { %v8211_v6 = vpop.f32.mrf.mxu1 }
 0x30b   : > { %v8213_v22 = vpop.f32.mrf.mxu1 }
 0x30c   : > { %v3764_v46 = vmul.f32 %v8213_v22, %v8213_v22 }
 0x30d   : > { %v8215_v12 = vpop.f32.mrf.mxu1 }
 0x30e   : > { %v3763_v43 = vmul.f32 %v8215_v12, %v8215_v12 }
 0x30f   : > { %v8217_v29 = vpop.f32.mrf.mxu1 }
 0x311   : > { %v8219_v57 = vpop.f32.mrf.mxu1 }
 0x312   : > { %9837 = vst [vmem:[#allocation44_spill] sm:$0xff] %v8219_v57  ;;  %v3765_v4 = vmul.f32 %v8219_v57, %v8219_v57 }
 0x313   : > { %v8221_v53 = vpop.f32.mrf.mxu1 }
 0x314   : > { %9838 = vst [vmem:[#allocation43_spill] sm:$0xff] %v8221_v53 }
 0x315   : > { %v8223_v39 = vpop.f32.mrf.mxu1 }
 0x316   : > { %9839 = vst [vmem:[#allocation46_spill] sm:$0xff] %v8223_v39 }
 0x317   : > { %v8225_v55 = vpop.f32.mrf.mxu1 }
 0x319   : > { %v8227_v28 = vpop.f32.mrf.mxu1 }
 0x31a   : > { %9840 = vst [vmem:[#allocation45_spill] sm:$0xff] %v8227_v28 }
 0x31b   : > { %v8229_v58 = vpop.f32.mrf.mxu1 }
 0x31c   : > { %9841 = vst [vmem:[#allocation47_spill] sm:$0xff] %v8229_v58 }
 0x31d   : > { %v8231_v21 = vpop.f32.mrf.mxu1 }
 0x31e   : > { %9842 = vst [vmem:[#allocation48_spill] sm:$0xff] %v8231_v21 }
 0x31f   : > { %v8233_v27 = vpop.f32.mrf.mxu1 }
 0x320   : > { %9843 = vst [vmem:[#allocation51_spill] sm:$0xff] %v8233_v27 }
 0x321   : > { %v8235_v50 = vpop.f32.mrf.mxu1 }
 0x322   : > { %9844 = vst [vmem:[#allocation57_spill] sm:$0xff] %v8235_v50 }
 0x323   : > { %v8237_v23 = vpop.f32.mrf.mxu1 }
 0x324   : > { %9845 = vst [vmem:[#allocation52_spill] sm:$0xff] %v8237_v23 }
 0x325   : > { %v8239_v44 = vpop.f32.mrf.mxu1 }
 0x326   : > { %9846 = vst [vmem:[#allocation61_spill] sm:$0xff] %v8239_v44 }
 0x327   : > { %v8241_v3 = vpop.f32.mrf.mxu1 }
 0x328   : > { %9847 = vst [vmem:[#allocation60_spill] sm:$0xff] %v8241_v3 }
 0x329   : > { %v8243_v42 = vpop.f32.mrf.mxu1 }
 0x32a   : > { %9848 = vst [vmem:[#allocation63_spill] sm:$0xff] %v8243_v42  ;;  %v3725_v42 = vmul.f32 %v8139_v34, %v8139_v34  ;;  %v8275_v34 = vmul.f32 %v8151_v10, %v8151_v10  ;;  %v8297_v10 = vmul.f32 %v8161_v56, %v8161_v56  ;;  %v8317_v56 = vmul.f32 %v8171_v30, %v8171_v30 }
 0x32b   : > { %v8245_v40 = vpop.f32.mrf.mxu1  ;;  %v8335_v30 = vmul.f32 %v8175_v15, %v8175_v15  ;;  %v8355_v15 = vmul.f32 %v8183_v0, %v8183_v0  ;;  %v8375_v0 = vmul.f32 %v8191_v24, %v8191_v24 }
 0x32c   : > { %9849 = vst [vmem:[#allocation62_spill] sm:$0xff] %v8245_v40  ;;  %v3728_v40 = vmul.f32 %v8141_v14, %v8141_v14  ;;  %v8279_v14 = vmul.f32 %v8153_v2, %v8153_v2  ;;  %v8301_v2 = vmul.f32 %v8163_v19, %v8163_v19  ;;  %v8321_v19 = vmul.f32 %v8173_v31, %v8173_v31 }
 0x32d   : > { %v8261_v3 = vpop.f32.mrf.mxu1  ;;  %v8339_v31 = vmul.f32 %v8177_v49, %v8177_v49  ;;  %9855 = vst [vmem:[#allocation50_spill] sm:$0xff] %v8355_v15  ;;  %v3757_v49 = vmul.f32 %v8203_v59, %v8203_v59  ;;  %9858 = vst [vmem:[#allocation58_spill] sm:$0xff] %v8375_v0  ;;  %v3788_v15 = vadd.f32 %v3756_v47, %v3724_v35 }
 0x32e   : > { %9850 = vst [vmem:[#allocation65_spill] sm:$0xff] %v8261_v3  ;;  %v8387_v0 = vadd.f32 %v3760_v54, %v3728_v40  ;;  %v3766_v47 = vmul.f32 %v8217_v29, %v8217_v29  ;;  %v3770_v40 = vmul.f32 %v8225_v55, %v8225_v55  ;;  %v8409_v35 = vadd.f32 %v3759_v11, %v3727_v20 }
 0x32f   : > { %v8289_v17 = vpop.f32.mrf.mxu1  ;;  %v3789_v24 = vadd.f32 %v3757_v49, %v3725_v42  ;;  %v3768_v49 = vmul.f32 %v8221_v53, %v8221_v53  ;;  %v3767_v42 = vmul.f32 %v8223_v39, %v8223_v39  ;;  %v3772_v39 = vmul.f32 %v8229_v58, %v8229_v58 }
 0x330   : > { %9851 = vst [vmem:[#allocation64_spill] sm:$0xff] %v8289_v17  ;;  %v3755_v17 = vmul.f32 %v8199_v51, %v8199_v51  ;;  %v8351_v51 = vmul.f32 %v8181_v41, %v8181_v41  ;;  %v8371_v41 = vmul.f32 %v8189_v52, %v8189_v52  ;;  %v3761_v52 = vmul.f32 %v8211_v6, %v8211_v6 }
 0x331   : > { %v8323_v26 = vpop.f32.mrf.mxu1  ;;  %v8426_v20 = vadd.f32 %v3764_v46, %v8271_v61  ;;  %v8440_v11 = vadd.f32 %v3768_v49, %v8287_v7  ;;  %v8446_v61 = vadd.f32 %v3770_v40, %v8297_v10  ;;  %v3774_v10 = vmul.f32 %v8233_v27, %v8233_v27 }
 0x332   : > { %9852 = vst [vmem:[#allocation49_spill] sm:$0xff] %v8323_v26  ;;  %9854 = vst [vmem:[#allocation53_spill] sm:$0xff] %v8351_v51  ;;  %v3787_v51 = vadd.f32 %v3755_v17, %v3723_v18  ;;  %v8413_v38 = vadd.f32 %v3761_v52, %v3729_v5  ;;  %v8432_v5 = vadd.f32 %v3766_v47, %v8279_v14 }
 0x333   : > { %v8347_v26 = vpop.f32.mrf.mxu1  ;;  %9857 = vst [vmem:[#allocation54_spill] sm:$0xff] %v8371_v41  ;;  %v3775_v49 = vmul.f32 %v8239_v44, %v8239_v44  ;;  %v9862_v44 = vld [vmem:[#allocation62_spill] sm:$0xff] }
 0x334   : > { %9853 = vst [vmem:[#allocation66_spill] sm:$0xff] %v8347_v26  ;;  %v8367_v26 = vmul.f32 %v8187_v60, %v8187_v60  ;;  %v3762_v60 = vmul.f32 %v8209_v13, %v8209_v13 }
 0x335   : > { %v8377_v59 = vpop.f32.mrf.mxu1 }
 0x336   : > { %9859 = vst [vmem:[#allocation56_spill] sm:$0xff] %v8377_v59  ;;  %v8411_v18 = vadd.f32 %v3762_v60, %v3730_v1  ;;  %v3769_v59 = vmul.f32 %v8227_v28, %v8227_v28  ;;  %v8429_v1 = vadd.f32 %v3763_v43, %v8275_v34  ;;  %v8435_v60 = vadd.f32 %v3765_v4, %v8283_v9 }
 0x337   : > { %v8385_v41 = vpop.f32.mrf.mxu1  ;;  %v3771_v34 = vmul.f32 %v8231_v21, %v8231_v21  ;;  %v3776_v4 = vmul.f32 %v8237_v23, %v8237_v23  ;;  %v3780_v23 = vmul.f32 %v9862_v44, %v9862_v44 }
 0x338   : > { %v3818_v17 = vmul.f32 %v8385_v41, %v8385_v41  ;;  %v8458_v7 = vadd.f32 %v3769_v59, %v8301_v2 }
 0x339   : > { %v8401_v54 = vpop.f32.mrf.mxu1  ;;  %v8481_v40 = vadd.f32 %v3771_v34, %v8309_v36 }
 0x33a   : > { %v3850_v37 = vadd.f32 %v3818_v17, %v3786_v8  ;;  %v3817_v32 = vmul.f32 %v8401_v54, %v8401_v54 }
 0x33b   : > { %v8417_v53 = vpop.f32.mrf.mxu1 }
 0x33c   : > { %v8421_v57 = vadd.f32 1e-08, %v3850_v37  ;;  %v3849_v8 = vadd.f32 %v3817_v32, %v3785_v63  ;;  %v3820_v17 = vmul.f32 %v8417_v53, %v8417_v53  ;;  %v8443_v63 = vadd.f32 %v3767_v42, %v8293_v48  ;;  %v9860_v37 = vld [vmem:[#allocation60_spill] sm:$0xff] }
 0x33d   : > { %v8437_v52 = vpop.f32.mrf.mxu1  ;;  %v8461_v48 = vadd.f32 %v3772_v39, %v8305_v33  ;;  %v3778_v32 = vmul.f32 %v9860_v37, %v9860_v37 }
 0x33e   : > { %6112 = vrsqrt.f32 %v8421_v57  ;;  %v8451_v14 = vadd.f32 1e-08, %v3849_v8  ;;  %v3852_v9 = vadd.f32 %v3820_v17, %v3788_v15  ;;  %v3819_v46 = vmul.f32 %v8437_v52, %v8437_v52  ;;  %v9861_v8 = vld [vmem:[#allocation63_spill] sm:$0xff] }
 0x33f   : > { %v8455_v43 = vpop.f32.mrf.mxu1  ;;  %v3773_v15 = vmul.f32 %v8235_v50, %v8235_v50  ;;  %v3777_v17 = vmul.f32 %v9861_v8, %v9861_v8  ;;  %vm3922_vm1 = vcmp.eq.f32.partialorder %v8421_v57, inf  ;;  %vm3924_vm10 = vcmp.eq.f32.partialorder %v8421_v57, 0.0 }
 0x340   : > { %v3822_v47 = vmul.f32 %v8455_v43, %v8455_v43  ;;  %6114 = vrsqrt.f32 %v8451_v14  ;;  %v8476_v33 = vadd.f32 1e-08, %v3852_v9  ;;  %v3851_v59 = vadd.f32 %v3819_v46, %v3787_v51  ;;  %v9863_v9 = vld [vmem:[#allocation64_spill] sm:$0xff] }
 0x341   : > { %v8474_v2 = vpop.f32.mrf.mxu1  ;;  %v8492_v51 = vadd.f32 %v3774_v10, %v8313_v45  ;;  %v3782_v36 = vmul.f32 %v9863_v9, %v9863_v9  ;;  %v8508_v45 = vadd.f32 %v3773_v15, %v8317_v56  ;;  %v8511_v10 = vadd.f32 %v3776_v4, %v8321_v19  ;;  %v9865_v19 = vld [vmem:[#allocation50_spill] sm:$0xff] }
 0x342   : > { %v3854_v39 = vadd.f32 %v3822_v47, %v3790_v16  ;;  %v3821_v42 = vmul.f32 %v8474_v2, %v8474_v2  ;;  %v3779_v16 = vmul.f32 %v8261_v3, %v8261_v3  ;;  %6116 = vrsqrt.f32 %v8476_v33 }
 0x343   : > { %v8489_v50 = vpop.f32.mrf.mxu1  ;;  %v8499_v34 = vadd.f32 1e-08, %v3851_v59  ;;  %v8514_v9 = vadd.f32 %v3775_v49, %v8335_v30  ;;  %v9866_v30 = vld [vmem:[#allocation55_spill] sm:$0xff]  ;;  %v9867_v49 = vld [vmem:[#allocation49_spill] sm:$0xff]  ;;  %vm3915_vm11 = vcmp.eq.f32.partialorder %v8451_v14, inf  ;;  %vm3917_vm12 = vcmp.eq.f32.partialorder %v8451_v14, 0.0 }
 0x344   : > { %v8501_v46 = vadd.f32 1e-08, %v3854_v39  ;;  %v3853_v47 = vadd.f32 %v3821_v42, %v3789_v24  ;;  %v3824_v44 = vmul.f32 %v8489_v50, %v8489_v50  ;;  %v8519_v39 = vadd.f32 %v3778_v32, %v8339_v31  ;;  %v9864_v42 = vld [vmem:[#allocation53_spill] sm:$0xff] }
 0x345   : > { %v8505_v8 = vpop.f32.mrf.mxu1  ;;  %v8522_v24 = vadd.f32 %v3777_v17, %v8343_v25  ;;  %v8525_v3 = vadd.f32 %v3780_v23, %v9864_v42  ;;  %6118 = vrsqrt.f32 %v8499_v34  ;;  %v8531_v15 = vadd.f32 %v3779_v16, %v9865_v19 }
 0x346   : > { %v3823_v59 = vmul.f32 %v8505_v8, %v8505_v8  ;;  %v8534_v4 = vadd.f32 %v3782_v36, %v9866_v30  ;;  %v8538_v31 = vmul.f32 %v9867_v49, %v9867_v49  ;;  %6120 = vrsqrt.f32 %v8501_v46 }
 0x347   : > { %v8528_v56 = vpop.f32.mrf.mxu1  ;;  %v8541_v25 = vadd.f32 1e-08, %v3853_v47  ;;  %v3856_v23 = vadd.f32 %v3824_v44, %v8387_v0  ;;  %v3925_v36 = vand.u32 2147483648, %v8421_v57  ;;  %v3918_v0 = vand.u32 2147483648, %v8451_v14 }
 0x348   : > { %v3855_v32 = vadd.f32 %v3823_v59, %v8409_v35  ;;  %v3826_v17 = vmul.f32 %v8528_v56, %v8528_v56  ;;  %vm3936_vm13 = vcmp.eq.f32.partialorder %v8476_v33, inf  ;;  %vm3938_vm14 = vcmp.eq.f32.partialorder %v8476_v33, 0.0 }
 0x349   : > { %v8547_v16 = vpop.f32.mrf.mxu1  ;;  %6122 = vrsqrt.f32 %v8541_v25  ;;  %v8562_v59 = vadd.f32 1e-08, %v3856_v23  ;;  %v3939_v30 = vand.u32 2147483648, %v8476_v33  ;;  %vm3929_vm15 = vcmp.eq.f32.partialorder %v8499_v34, inf }
 0x34a   : > { %v3825_v42 = vmul.f32 %v8547_v16, %v8547_v16  ;;  %v8564_v19 = vadd.f32 1e-08, %v3855_v32  ;;  %v3858_v49 = vadd.f32 %v3826_v17, %v8411_v18  ;;  %vm3931_vm2 = vcmp.eq.f32.partialorder %v8499_v34, 0.0 }
 0x34b   : > { %v6113_v47 = vpop.eup %6112  ;;  %v8558_v44 = vpop.f32.mrf.mxu1  ;;  %6124 = vrsqrt.f32 %v8562_v59  ;;  %v3932_v17 = vand.u32 2147483648, %v8499_v34  ;;  %vm3950_vm3 = vcmp.eq.f32.partialorder %v8501_v46, inf  ;;  %vm3952_vm4 = vcmp.eq.f32.partialorder %v8501_v46, 0.0 }
 0x34c   : > { %v3921_v35 = vmul.f32 %v6113_v47, %v8421_v57  ;;  %v3857_v37 = vadd.f32 %v3825_v42, %v8413_v38  ;;  %v3828_v23 = vmul.f32 %v8558_v44, %v8558_v44  ;;  %6126 = vrsqrt.f32 %v8564_v19 }
 0x34d   : > { %v6115_v27 = vpop.eup %6114  ;;  %v8582_v18 = vpop.f32.mrf.mxu1  ;;  %vm3943_vm5 = vcmp.eq.f32.partialorder %v8541_v25, inf  ;;  %vm3945_vm6 = vcmp.eq.f32.partialorder %v8541_v25, 0.0  ;;  %vm3964_vm7 = vcmp.eq.f32.partialorder %v8562_v59, inf  ;;  %vm3966_vm8 = vcmp.eq.f32.partialorder %v8562_v59, 0.0 }
 0x34e   : > { %v3923_v21 = vsel %vm3922_vm1, %v8421_v57, %v3921_v35  ;;  %v3914_v47 = vmul.f32 %v6115_v27, %v8451_v14  ;;  %v8591_v27 = vadd.f32 1e-08, %v3858_v49  ;;  %v3860_v58 = vadd.f32 %v3828_v23, %v8426_v20 }
 0x34f   : > { %v3926_v32 = vsel %vm3924_vm10, %v3925_v36, %v3923_v21  ;;  %v6117_v42 = vpop.eup %6116  ;;  %v3953_v21 = vand.u32 2147483648, %v8501_v46  ;;  %v8593_v36 = vadd.f32 1e-08, %v3857_v37  ;;  %v8603_v49 = vpop.f32.mrf.mxu1  ;;  %vm3957_vm9 = vcmp.eq.f32.partialorder %v8564_v19, inf }
 0x350   : > { %v5315_v38 = vmul.f32 -1.442695, %v3926_v32  ;;  %v3916_v57 = vsel %vm3915_vm11, %v8451_v14, %v3914_v47  ;;  %v3935_v32 = vmul.f32 %v6117_v42, %v8476_v33  ;;  %v3827_v47 = vmul.f32 %v8582_v18, %v8582_v18 }
 0x351   : > { %v3919_v35 = vsel %vm3917_vm12, %v3918_v0, %v3916_v57  ;;  %v3946_v0 = vand.u32 2147483648, %v8541_v25  ;;  %vm3959_vm1 = vcmp.eq.f32.partialorder %v8564_v19, 0.0  ;;  %vm3978_vm10 = vcmp.eq.f32.partialorder %v8591_v27, inf }
 0x352   : > { %6128 = vpow2.f32 %v5315_v38  ;;  %v5314_v28 = vmul.f32 -1.442695, %v3919_v35  ;;  %v6119_v37 = vpop.eup %6118  ;;  %v3937_v14 = vsel %vm3936_vm13, %v8476_v33, %v3935_v32  ;;  %v8617_v35 = vadd.f32 1e-08, %v3860_v58 }
 0x353   : > { %6130 = vrsqrt.f32 %v8591_v27  ;;  %v6121_v20 = vpop.eup %6120  ;;  %v3940_v23 = vsel %vm3938_vm14, %v3939_v30, %v3937_v14  ;;  %v3928_v38 = vmul.f32 %v6119_v37, %v8499_v34  ;;  %v3859_v33 = vadd.f32 %v3827_v47, %v8429_v1  ;;  %v8626_v37 = vpop.f32.mrf.mxu1 }
 0x354   : > { %6132 = vrsqrt.f32 %v8593_v36  ;;  %v5317_v42 = vmul.f32 -1.442695, %v3940_v23  ;;  %v3949_v57 = vmul.f32 %v6121_v20, %v8501_v46  ;;  %v3830_v30 = vmul.f32 %v8603_v49, %v8603_v49 }
 0x355   : > { %6134 = vpow2.f32 %v5314_v28  ;;  %v3930_v32 = vsel %vm3929_vm15, %v8499_v34, %v3928_v38  ;;  %v3967_v28 = vand.u32 2147483648, %v8562_v59  ;;  %v3829_v34 = vmul.f32 %v8626_v37, %v8626_v37 }
 0x356   : > { %v6123_v14 = vpop.eup %6122  ;;  %6136 = vpow2.f32 %v5317_v42  ;;  %v3933_v20 = vsel %vm3931_vm2, %v3932_v17, %v3930_v32  ;;  %v3951_v58 = vsel %vm3950_vm3, %v8501_v46, %v3949_v57  ;;  %v8639_v42 = vadd.f32 1e-08, %v3859_v33 }
 0x357   : > { %v5316_v23 = vmul.f32 -1.442695, %v3933_v20  ;;  %v3954_v1 = vsel %vm3952_vm4, %v3953_v21, %v3951_v58  ;;  %v3942_v47 = vmul.f32 %v6123_v14, %v8541_v25  ;;  %6138 = vrsqrt.f32 %v8617_v35  ;;  %v8652_v20 = vpop.f32.mrf.mxu1 }
 0x358   : > { %v5319_v38 = vmul.f32 -1.442695, %v3954_v1  ;;  %v6125_v17 = vpop.eup %6124  ;;  %v3960_v46 = vand.u32 2147483648, %v8564_v19  ;;  %v3862_v21 = vadd.f32 %v3830_v30, %v8432_v5  ;;  %vm3980_vm11 = vcmp.eq.f32.partialorder %v8591_v27, 0.0 }
 0x359   : > { %6140 = vpow2.f32 %v5316_v23  ;;  %v3944_v57 = vsel %vm3943_vm5, %v8541_v25, %v3942_v47  ;;  %v6127_v32 = vpop.eup %6126  ;;  %v3963_v33 = vmul.f32 %v6125_v17, %v8562_v59  ;;  %v3981_v25 = vand.u32 2147483648, %v8591_v27 }
 0x35a   : > { %6142 = vpow2.f32 %v5319_v38  ;;  %v3947_v14 = vsel %vm3945_vm6, %v3946_v0, %v3944_v57  ;;  %v3956_v23 = vmul.f32 %v6127_v32, %v8564_v19  ;;  %v8661_v0 = vadd.f32 1e-08, %v3862_v21 }
 0x35b   : > { %v5318_v58 = vmul.f32 -1.442695, %v3947_v14  ;;  %6144 = vrsqrt.f32 %v8639_v42  ;;  %v3965_v5 = vsel %vm3964_vm7, %v8562_v59, %v3963_v33  ;;  %v3861_v30 = vadd.f32 %v3829_v34, %v8435_v60  ;;  %v8673_v60 = vpop.f32.mrf.mxu1 }
 0x35c   : > { %v3968_v47 = vsel %vm3966_vm8, %v3967_v28, %v3965_v5  ;;  %v3958_v38 = vsel %vm3957_vm9, %v8564_v19, %v3956_v23  ;;  %vm3971_vm12 = vcmp.eq.f32.partialorder %v8593_v36, inf  ;;  %vm3973_vm13 = vcmp.eq.f32.partialorder %v8593_v36, 0.0 }
 0x35d   : > { %6146 = vpow2.f32 %v5318_v58  ;;  %v5321_v32 = vmul.f32 -1.442695, %v3968_v47  ;;  %v3961_v21 = vsel %vm3959_vm1, %v3960_v46, %v3958_v38  ;;  %v3832_v28 = vmul.f32 %v8652_v20, %v8652_v20 }
 0x35e   : > { %6148 = vrsqrt.f32 %v8661_v0  ;;  %v5320_v14 = vmul.f32 -1.442695, %v3961_v21  ;;  %v3974_v19 = vand.u32 2147483648, %v8593_v36  ;;  %v8681_v46 = vadd.f32 1e-08, %v3861_v30  ;;  %v8693_v30 = vpop.f32.mrf.mxu1 }
 0x35f   : > { %v6129_v1 = vpop.eup %6128  ;;  %vm3992_vm14 = vcmp.eq.f32.partialorder %v8617_v35, inf  ;;  %vm3994_vm15 = vcmp.eq.f32.partialorder %v8617_v35, 0.0  ;;  %vm3985_vm2 = vcmp.eq.f32.partialorder %v8639_v42, inf  ;;  %vm3987_vm3 = vcmp.eq.f32.partialorder %v8639_v42, 0.0 }
 0x360   : > { %v6131_v17 = vpop.eup %6130  ;;  %v4234_v57 = vadd.f32 1.0, %v6129_v1  ;;  %vm4006_vm4 = vcmp.eq.f32.partialorder %v8661_v0, inf  ;;  %vm4008_vm5 = vcmp.eq.f32.partialorder %v8661_v0, 0.0  ;;  %vm3999_vm6 = vcmp.eq.f32.partialorder %v8681_v46, inf }
 0x361   : > { %v6133_v34 = vpop.eup %6132  ;;  %v3977_v59 = vmul.f32 %v6131_v17, %v8591_v27  ;;  %vm4001_vm7 = vcmp.eq.f32.partialorder %v8681_v46, 0.0 }
 0x362   : > { %v6135_v33 = vpop.eup %6134  ;;  %6150 = vrcp.f32 %v4234_v57  ;;  %v3970_v58 = vmul.f32 %v6133_v34, %v8593_v36 }
 0x363   : > { %v4233_v23 = vadd.f32 1.0, %v6135_v33  ;;  %6152 = vpow2.f32 %v5321_v32  ;;  %v3979_v5 = vsel %vm3978_vm10, %v8591_v27, %v3977_v59  ;;  %v6137_v38 = vpop.eup %6136  ;;  %v3864_v32 = vadd.f32 %v3832_v28, %v8440_v11 }
 0x364   : > { %6154 = vpow2.f32 %v5320_v14  ;;  %v3982_v1 = vsel %vm3980_vm11, %v3981_v25, %v3979_v5  ;;  %v3972_v47 = vsel %vm3971_vm12, %v8593_v36, %v3970_v58  ;;  %v6139_v21 = vpop.eup %6138  ;;  %v4236_v34 = vadd.f32 1.0, %v6137_v38  ;;  %v8708_v36 = vpop.f32.mrf.mxu1 }
 0x365   : > { %6156 = vrcp.f32 %v4233_v23  ;;  %v5323_v17 = vmul.f32 -1.442695, %v3982_v1  ;;  %v3975_v57 = vsel %vm3973_vm13, %v3974_v19, %v3972_v47  ;;  %v3831_v25 = vmul.f32 %v8673_v60, %v8673_v60 }
 0x366   : > { %v5322_v27 = vmul.f32 -1.442695, %v3975_v57  ;;  %6158 = vrsqrt.f32 %v8681_v46  ;;  %v3991_v14 = vmul.f32 %v6139_v21, %v8617_v35  ;;  %v3995_v59 = vand.u32 2147483648, %v8617_v35  ;;  %v6141_v58 = vpop.eup %6140 }
 0x367   : > { %6160 = vpow2.f32 %v5323_v17  ;;  %v8703_v33 = vadd.f32 1e-08, %v3864_v32  ;;  %v3863_v11 = vadd.f32 %v3831_v25, %v8443_v63  ;;  %v6143_v28 = vpop.eup %6142  ;;  %v4235_v19 = vadd.f32 1.0, %v6141_v58 }
 0x368   : > { %6162 = vrcp.f32 %v4236_v34  ;;  %v3993_v23 = vsel %vm3992_vm14, %v8617_v35, %v3991_v14  ;;  %v3988_v5 = vand.u32 2147483648, %v8639_v42  ;;  %v6145_v1 = vpop.eup %6144  ;;  %v4238_v47 = vadd.f32 1.0, %v6143_v28  ;;  %v8725_v35 = vpop.f32.mrf.mxu1 }
 0x369   : > { %6164 = vpow2.f32 %v5322_v27  ;;  %v3996_v38 = vsel %vm3994_vm15, %v3995_v59, %v3993_v23  ;;  %v3984_v17 = vmul.f32 %v6145_v1, %v8639_v42  ;;  %v3834_v57 = vmul.f32 %v8693_v30, %v8693_v30 }
 0x36a   : > { %6166 = vrsqrt.f32 %v8703_v33  ;;  %v5325_v63 = vmul.f32 -1.442695, %v3996_v38  ;;  %v6147_v32 = vpop.eup %6146  ;;  %v4009_v21 = vand.u32 2147483648, %v8661_v0  ;;  %v8723_v34 = vadd.f32 1e-08, %v3863_v11  ;;  %v9869_v38 = vld [vmem:[#allocation35_spill] sm:$0xff] }
 0x36b   : > { %6168 = vrcp.f32 %v4235_v19  ;;  %v6149_v27 = vpop.eup %6148  ;;  %v4237_v25 = vadd.f32 1.0, %v6147_v32  ;;  %v3986_v14 = vsel %vm3985_vm2, %v8639_v42, %v3984_v17  ;;  %v3833_v11 = vmul.f32 %v8708_v36, %v8708_v36 }
 0x36c   : > { %6170 = vrcp.f32 %v4238_v47  ;;  %v3989_v59 = vsel %vm3987_vm3, %v3988_v5, %v3986_v14  ;;  %v4005_v58 = vmul.f32 %v6149_v27, %v8661_v0  ;;  %v3866_v23 = vadd.f32 %v3834_v57, %v8446_v61  ;;  %v9868_v5 = vld [vmem:[#allocation21_spill] sm:$0xff] }
 0x36d   : > { %6172 = vpow2.f32 %v5325_v63  ;;  %v5324_v19 = vmul.f32 -1.442695, %v3989_v59  ;;  %v3836_v1 = vmul.f32 %v8725_v35, %v8725_v35  ;;  %v4002_v57 = vand.u32 2147483648, %v8681_v46 }
 0x36e   : > { %6174 = vrsqrt.f32 %v8723_v34  ;;  %v4007_v32 = vsel %vm4006_vm4, %v8661_v0, %v4005_v58  ;;  %vm4020_vm8 = vcmp.eq.f32.partialorder %v8703_v33, inf  ;;  %v4023_v0 = vand.u32 2147483648, %v8703_v33 }
 0x36f   : > { %v6151_v28 = vpop.eup %6150  ;;  %6176 = vrcp.f32 %v4237_v25  ;;  %v4010_v61 = vsel %vm4008_vm5, %v4009_v21, %v4007_v32  ;;  %v3865_v21 = vadd.f32 %v3833_v11, %v8458_v7  ;;  %vm4022_vm9 = vcmp.eq.f32.partialorder %v8703_v33, 0.0 }
 0x370   : > { %v6153_v42 = vpop.eup %6152  ;;  %v4330_v47 = vmul.f32 %v6151_v28, %v9868_v5  ;;  %v4362_v63 = vmul.f32 %v6151_v28, %v9869_v38  ;;  %v4394_v17 = vmul.f32 %v6151_v28, %v8385_v41  ;;  %6178 = vpow2.f32 %v5324_v19  ;;  %v9870_v28 = vld [vmem:[#allocation5_spill] sm:$0xff]  ;;  %v8766_v38 = vpop.f32.mrf.mxu1 }
 0x371   : > { %v6155_v27 = vpop.eup %6154  ;;  %v4240_v14 = vadd.f32 1.0, %v6153_v42  ;;  %v5327_v59 = vmul.f32 -1.442695, %v4010_v61  ;;  %v9871_v42 = vld [vmem:[#allocation38_spill] sm:$0xff]  ;;  %v8769_v32 = vadd.f32 1e-08, %v3866_v23  ;;  %v3868_v7 = vadd.f32 %v3836_v1, %v8461_v48 }
 0x372   : > { %v6157_v25 = vpop.eup %6156  ;;  %4426 = vst.msk [vmem:[%s8751_s15 + $0x8] sm:$0xff] %vm884_vm0, %v4330_v47  ;;  %4458 = vst.msk [vmem:[%s8751_s15 + $0x108] sm:$0xff] %vm884_vm0, %v4362_v63  ;;  %v4239_v41 = vadd.f32 1.0, %v6155_v27  ;;  %vm4013_vm1 = vcmp.eq.f32.partialorder %v8723_v34, inf  ;;  %v4016_v27 = vand.u32 2147483648, %v8723_v34  ;;  %v9873_v48 = vld [vmem:[#allocation37_spill] sm:$0xff] }
 0x373   : > { %4490 = vst.msk [vmem:[%s8751_s15 + $0x208] sm:$0xff] %vm884_vm0, %v4394_v17  ;;  %v6159_v58 = vpop.eup %6158  ;;  %v4329_v19 = vmul.f32 %v6157_v25, %v9870_v28  ;;  %v4361_v5 = vmul.f32 %v6157_v25, %v9871_v42  ;;  %v4393_v47 = vmul.f32 %v6157_v25, %v8401_v54  ;;  %6180 = vrcp.f32 %v4240_v14  ;;  %v9872_v14 = vld [vmem:[#allocation4_spill] sm:$0xff]  ;;  %v8790_v42 = vpop.f32.mrf.mxu1 }
 0x374   : > { %v6161_v63 = vpop.eup %6160  ;;  %6182 = vrcp.f32 %v4239_v41  ;;  %v3998_v17 = vmul.f32 %v6159_v58, %v8681_v46  ;;  %vm4015_vm10 = vcmp.eq.f32.partialorder %v8723_v34, 0.0  ;;  %vm4034_vm11 = vcmp.eq.f32.partialorder %v8769_v32, inf }
 0x375   : > { %v6163_v11 = vpop.eup %6162  ;;  %4425 = vst.msk [vmem:[%s8751_s15] sm:$0xff] %vm884_vm0, %v4329_v19  ;;  %4457 = vst.msk [vmem:[%s8751_s15 + $0x100] sm:$0xff] %vm884_vm0, %v4361_v5  ;;  %v4242_v54 = vadd.f32 1.0, %v6161_v63  ;;  %6184 = vpow2.f32 %v5327_v59  ;;  %v8788_v19 = vadd.f32 1e-08, %v3865_v21  ;;  %v9874_v21 = vld [vmem:[#allocation7_spill] sm:$0xff] }
 0x376   : > { %4489 = vst.msk [vmem:[%s8751_s15 + $0x200] sm:$0xff] %vm884_vm0, %v4393_v47  ;;  %v6165_v23 = vpop.eup %6164  ;;  %v4332_v61 = vmul.f32 %v6163_v11, %v9872_v14  ;;  %v4364_v1 = vmul.f32 %v6163_v11, %v9873_v48  ;;  %v4396_v25 = vmul.f32 %v6163_v11, %v8417_v53  ;;  %v4000_v41 = vsel %vm3999_vm6, %v8681_v46, %v3998_v17  ;;  %v9875_v17 = vld [vmem:[#allocation40_spill] sm:$0xff]  ;;  %v9876_v14 = vld [vmem:[#allocation6_spill] sm:$0xff]  ;;  %v9877_v48 = vld [vmem:[#allocation39_spill] sm:$0xff] }
 0x377   : > { %v6167_v58 = vpop.eup %6166  ;;  %6186 = vrcp.f32 %v4242_v54  ;;  %v4241_v59 = vadd.f32 1.0, %v6165_v23  ;;  %v4003_v28 = vsel %vm4001_vm7, %v4002_v57, %v4000_v41  ;;  %v3835_v46 = vmul.f32 %v8766_v38, %v8766_v38 }
 0x378   : > { %v6169_v5 = vpop.eup %6168  ;;  %4428 = vst.msk [vmem:[%s8751_s15 + $0x18] sm:$0xff] %vm884_vm0, %v4332_v61  ;;  %4460 = vst.msk [vmem:[%s8751_s15 + $0x118] sm:$0xff] %vm884_vm0, %v4364_v1  ;;  %v5326_v53 = vmul.f32 -1.442695, %v4003_v28  ;;  %v4019_v47 = vmul.f32 %v6167_v58, %v8703_v33  ;;  %6188 = vrsqrt.f32 %v8769_v32  ;;  %v8820_v28 = vpop.f32.mrf.mxu1  ;;  %vm4036_vm12 = vcmp.eq.f32.partialorder %v8769_v32, 0.0 }
 0x379   : > { %4492 = vst.msk [vmem:[%s8751_s15 + $0x218] sm:$0xff] %vm884_vm0, %v4396_v25  ;;  %v6171_v57 = vpop.eup %6170  ;;  %v4331_v63 = vmul.f32 %v6169_v5, %v9874_v21  ;;  %v4363_v11 = vmul.f32 %v6169_v5, %v9875_v17  ;;  %v4395_v54 = vmul.f32 %v6169_v5, %v8437_v52  ;;  %6190 = vrcp.f32 %v4241_v59 }
 0x37a   : > { %v6173_v23 = vpop.eup %6172  ;;  %v4334_v61 = vmul.f32 %v6171_v57, %v9876_v14  ;;  %v4366_v1 = vmul.f32 %v6171_v57, %v9877_v48  ;;  %v4398_v25 = vmul.f32 %v6171_v57, %v8455_v43  ;;  %6192 = vpow2.f32 %v5326_v53  ;;  %v9878_v57 = vld [vmem:[#allocation9_spill] sm:$0xff] }
 0x37b   : > { %v6175_v41 = vpop.eup %6174  ;;  %4427 = vst.msk [vmem:[%s8751_s15 + $0x10] sm:$0xff] %vm884_vm0, %v4331_v63  ;;  %4459 = vst.msk [vmem:[%s8751_s15 + $0x110] sm:$0xff] %vm884_vm0, %v4363_v11  ;;  %v4244_v52 = vadd.f32 1.0, %v6173_v23  ;;  %v4021_v58 = vsel %vm4020_vm8, %v8703_v33, %v4019_v47  ;;  %6194 = vrsqrt.f32 %v8788_v19  ;;  %v8818_v59 = vadd.f32 1e-08, %v3868_v7  ;;  %v9879_v63 = vld [vmem:[#allocation42_spill] sm:$0xff] }
 0x37c   : > { %4491 = vst.msk [vmem:[%s8751_s15 + $0x210] sm:$0xff] %vm884_vm0, %v4395_v54  ;;  %v6177_v43 = vpop.eup %6176  ;;  %4430 = vst.msk [vmem:[%s8751_s15 + $0x28] sm:$0xff] %vm884_vm0, %v4334_v61  ;;  %v4024_v5 = vsel %vm4022_vm9, %v4023_v0, %v4021_v58  ;;  %v4012_v53 = vmul.f32 %v6175_v41, %v8723_v34  ;;  %v3867_v7 = vadd.f32 %v3835_v46, %v8481_v40  ;;  %v9880_v46 = vld [vmem:[#allocation66_spill] sm:$0xff]  ;;  %v8860_v61 = vpop.f32.mrf.mxu1  ;;  %v9881_v41 = vld [vmem:[#allocation8_spill] sm:$0xff]  ;;  %vm4027_vm13 = vcmp.eq.f32.partialorder %v8788_v19, inf }
 0x37d   : > { %4462 = vst.msk [vmem:[%s8751_s15 + $0x128] sm:$0xff] %vm884_vm0, %v4366_v1  ;;  %4494 = vst.msk [vmem:[%s8751_s15 + $0x228] sm:$0xff] %vm884_vm0, %v4398_v25  ;;  %v3838_v47 = vmul.f32 %v8790_v42, %v8790_v42  ;;  %v4333_v21 = vmul.f32 %v6177_v43, %v9878_v57  ;;  %v4365_v17 = vmul.f32 %v6177_v43, %v9879_v63  ;;  %6196 = vrcp.f32 %v4244_v52  ;;  %v6179_v54 = vpop.eup %6178  ;;  %v9882_v58 = vld [vmem:[#allocation41_spill] sm:$0xff] }
 0x37e   : > { %v4397_v11 = vmul.f32 %v6177_v43, %v8474_v2  ;;  %v5329_v33 = vmul.f32 -1.442695, %v4024_v5  ;;  %v4014_v0 = vsel %vm4013_vm1, %v8723_v34, %v4012_v53  ;;  %6198 = vrsqrt.f32 %v8818_v59  ;;  %v9883_v5 = vld [vmem:[#allocation11_spill] sm:$0xff] }
 0x37f   : > { %v8846_v40 = vadd.f32 %v8538_v31, %v8367_v26  ;;  %v8850_v23 = vmul.f32 %v9880_v46, %v9880_v46  ;;  %4429 = vst.msk [vmem:[%s8751_s15 + $0x20] sm:$0xff] %vm884_vm0, %v4333_v21  ;;  %4461 = vst.msk [vmem:[%s8751_s15 + $0x120] sm:$0xff] %vm884_vm0, %v4365_v17  ;;  %v4243_v2 = vadd.f32 1.0, %v6179_v54  ;;  %v4017_v14 = vsel %vm4015_vm10, %v4016_v27, %v4014_v0 }
 0x380   : > { %4493 = vst.msk [vmem:[%s8751_s15 + $0x220] sm:$0xff] %vm884_vm0, %v4397_v11  ;;  %v6181_v48 = vpop.eup %6180  ;;  %6200 = vpow2.f32 %v5329_v33  ;;  %v5328_v26 = vmul.f32 -1.442695, %v4017_v14  ;;  %v8862_v31 = vadd.f32 1e-08, %v3867_v7  ;;  %v3870_v1 = vadd.f32 %v3838_v47, %v8492_v51  ;;  %v9884_v11 = vld [vmem:[#allocation10_spill] sm:$0xff] }
 0x381   : > { %v6183_v25 = vpop.eup %6182  ;;  %v4336_v52 = vmul.f32 %v6181_v48, %v9881_v41  ;;  %v4368_v43 = vmul.f32 %v6181_v48, %v9882_v58  ;;  %v4400_v34 = vmul.f32 %v6181_v48, %v8489_v50  ;;  %6202 = vrcp.f32 %v4243_v2  ;;  %v8880_v50 = vpop.f32.mrf.mxu1 }
 0x382   : > { %v6185_v27 = vpop.eup %6184  ;;  %v4335_v53 = vmul.f32 %v6183_v25, %v9883_v5  ;;  %v4367_v57 = vmul.f32 %v6183_v25, %v8207_v62  ;;  %v4399_v7 = vmul.f32 %v6183_v25, %v8505_v8  ;;  %6204 = vpow2.f32 %v5328_v26 }
 0x383   : > { %4432 = vst.msk [vmem:[%s8751_s15 + $0x38] sm:$0xff] %vm884_vm0, %v4336_v52  ;;  %4464 = vst.msk [vmem:[%s8751_s15 + $0x138] sm:$0xff] %vm884_vm0, %v4368_v43  ;;  %v4246_v51 = vadd.f32 1.0, %v6185_v27  ;;  %6206 = vrsqrt.f32 %v8862_v31  ;;  %v4037_v62 = vand.u32 2147483648, %v8769_v32  ;;  %v8889_v8 = vadd.f32 1e-08, %v3870_v1  ;;  %v8912_v41 = vpop.f32.mrf.mxu1 }
 0x384   : > { %4496 = vst.msk [vmem:[%s8751_s15 + $0x238] sm:$0xff] %vm884_vm0, %v4400_v34  ;;  %v6187_v47 = vpop.eup %6186  ;;  %4431 = vst.msk [vmem:[%s8751_s15 + $0x30] sm:$0xff] %vm884_vm0, %v4335_v53  ;;  %v3837_v21 = vmul.f32 %v8820_v28, %v8820_v28  ;;  %v3840_v63 = vmul.f32 %v8860_v61, %v8860_v61  ;;  %vm4029_vm14 = vcmp.eq.f32.partialorder %v8788_v19, 0.0  ;;  %v4030_v25 = vand.u32 2147483648, %v8788_v19 }
 0x385   : > { %4463 = vst.msk [vmem:[%s8751_s15 + $0x130] sm:$0xff] %vm884_vm0, %v4367_v57  ;;  %4495 = vst.msk [vmem:[%s8751_s15 + $0x230] sm:$0xff] %vm884_vm0, %v4399_v7  ;;  %v6189_v17 = vpop.eup %6188  ;;  %v4338_v54 = vmul.f32 %v6187_v47, %v9884_v11  ;;  %v4370_v33 = vmul.f32 %v6187_v47, %v8209_v13  ;;  %v4402_v0 = vmul.f32 %v6187_v47, %v8528_v56  ;;  %6208 = vrcp.f32 %v4246_v51  ;;  %v9885_v13 = vld [vmem:[#allocation13_spill] sm:$0xff]  ;;  %v9886_v7 = vld [vmem:[#allocation12_spill] sm:$0xff] }
 0x386   : > { %v6191_v2 = vpop.eup %6190  ;;  %v4033_v14 = vmul.f32 %v6189_v17, %v8769_v32  ;;  %6210 = vrsqrt.f32 %v8889_v8  ;;  %v3869_v34 = vadd.f32 %v3837_v21, %v8508_v45  ;;  %v3872_v27 = vadd.f32 %v3840_v63, %v8511_v10  ;;  %v8940_v21 = vpop.f32.mrf.mxu1 }
 0x387   : > { %v6193_v48 = vpop.eup %6192  ;;  %4434 = vst.msk [vmem:[%s8751_s15 + $0x48] sm:$0xff] %vm884_vm0, %v4338_v54  ;;  %4466 = vst.msk [vmem:[%s8751_s15 + $0x148] sm:$0xff] %vm884_vm0, %v4370_v33  ;;  %v4337_v56 = vmul.f32 %v6191_v2, %v9885_v13  ;;  %v4369_v26 = vmul.f32 %v6191_v2, %v8211_v6  ;;  %v4401_v1 = vmul.f32 %v6191_v2, %v8547_v16  ;;  %vm4048_vm15 = vcmp.eq.f32.partialorder %v8818_v59, inf }
 0x388   : > { %4498 = vst.msk [vmem:[%s8751_s15 + $0x248] sm:$0xff] %vm884_vm0, %v4402_v0  ;;  %v6195_v52 = vpop.eup %6194  ;;  %v4245_v58 = vadd.f32 1.0, %v6193_v48  ;;  %v4035_v43 = vsel %vm4034_vm11, %v8769_v32, %v4033_v14  ;;  %vm4050_vm2 = vcmp.eq.f32.partialorder %v8818_v59, 0.0  ;;  %v8930_v10 = vadd.f32 1e-08, %v3869_v34  ;;  %v9887_v48 = vld [vmem:[#allocation15_spill] sm:$0xff] }
 0x389   : > { %4433 = vst.msk [vmem:[%s8751_s15 + $0x40] sm:$0xff] %vm884_vm0, %v4337_v56  ;;  %4465 = vst.msk [vmem:[%s8751_s15 + $0x140] sm:$0xff] %vm884_vm0, %v4369_v26  ;;  %v4038_v6 = vsel %vm4036_vm12, %v4037_v62, %v4035_v43  ;;  %v4026_v16 = vmul.f32 %v6195_v52, %v8788_v19  ;;  %v8932_v53 = vadd.f32 1e-08, %v3872_v27  ;;  %v4051_v11 = vand.u32 2147483648, %v8818_v59 }
 0x38a   : > { %4497 = vst.msk [vmem:[%s8751_s15 + $0x240] sm:$0xff] %vm884_vm0, %v4401_v1  ;;  %v6197_v5 = vpop.eup %6196  ;;  %6212 = vrcp.f32 %v4245_v58  ;;  %v5331_v45 = vmul.f32 -1.442695, %v4038_v6  ;;  %vm4041_vm3 = vcmp.eq.f32.partialorder %v8862_v31, inf  ;;  %v3842_v2 = vmul.f32 %v8912_v41, %v8912_v41  ;;  %v8965_v1 = vpop.f32.mrf.mxu1 }
 0x38b   : > { %v6199_v57 = vpop.eup %6198  ;;  %v4340_v32 = vmul.f32 %v6197_v5, %v9886_v7  ;;  %v4372_v51 = vmul.f32 %v6197_v5, %v8213_v22  ;;  %v4404_v47 = vmul.f32 %v6197_v5, %v8558_v44  ;;  %v4028_v62 = vsel %vm4027_vm13, %v8788_v19, %v4026_v16 }
 0x38c   : > { %6214 = vpow2.f32 %v5331_v45  ;;  %v4031_v63 = vsel %vm4029_vm14, %v4030_v25, %v4028_v62  ;;  %v4047_v17 = vmul.f32 %v6199_v57, %v8818_v59  ;;  %v3839_v44 = vmul.f32 %v8880_v50, %v8880_v50  ;;  %v9888_v45 = vld [vmem:[#allocation14_spill] sm:$0xff]  ;;  %v8995_v62 = vpop.f32.mrf.mxu1 }
 0x38d   : > { %v6201_v54 = vpop.eup %6200  ;;  %4436 = vst.msk [vmem:[%s8751_s15 + $0x58] sm:$0xff] %vm884_vm0, %v4340_v32  ;;  %4468 = vst.msk [vmem:[%s8751_s15 + $0x158] sm:$0xff] %vm884_vm0, %v4372_v51  ;;  %v5330_v22 = vmul.f32 -1.442695, %v4031_v63  ;;  %6216 = vrsqrt.f32 %v8930_v10  ;;  %vm4043_vm4 = vcmp.eq.f32.partialorder %v8862_v31, 0.0  ;;  %v4044_v43 = vand.u32 2147483648, %v8862_v31 }
 0x38e   : > { %4500 = vst.msk [vmem:[%s8751_s15 + $0x258] sm:$0xff] %vm884_vm0, %v4404_v47  ;;  %v6203_v19 = vpop.eup %6202  ;;  %v4248_v33 = vadd.f32 1.0, %v6201_v54  ;;  %v4049_v0 = vsel %vm4048_vm15, %v8818_v59, %v4047_v17  ;;  %6218 = vrsqrt.f32 %v8932_v53  ;;  %v3871_v34 = vadd.f32 %v3839_v44, %v8514_v9 }
 0x38f   : > { %v6205_v14 = vpop.eup %6204  ;;  %v4339_v13 = vmul.f32 %v6203_v19, %v9887_v48  ;;  %v4371_v56 = vmul.f32 %v6203_v19, %v8215_v12  ;;  %v4403_v26 = vmul.f32 %v6203_v19, %v8582_v18  ;;  %6220 = vpow2.f32 %v5330_v22  ;;  %v9889_v19 = vld [vmem:[#allocation17_spill] sm:$0xff]  ;;  %v9891_v48 = vld [vmem:[#allocation54_spill] sm:$0xff] }
 0x390   : > { %v6207_v25 = vpop.eup %6206  ;;  %6222 = vrcp.f32 %v4248_v33  ;;  %v4247_v52 = vadd.f32 1.0, %v6205_v14  ;;  %v4052_v58 = vsel %vm4050_vm2, %v4051_v11, %v4049_v0  ;;  %v3874_v59 = vadd.f32 %v3842_v2, %v8519_v39  ;;  %v9890_v0 = vld [vmem:[#allocation44_spill] sm:$0xff] }
 0x391   : > { %4435 = vst.msk [vmem:[%s8751_s15 + $0x50] sm:$0xff] %vm884_vm0, %v4339_v13  ;;  %4467 = vst.msk [vmem:[%s8751_s15 + $0x150] sm:$0xff] %vm884_vm0, %v4371_v56  ;;  %v5333_v12 = vmul.f32 -1.442695, %v4052_v58  ;;  %v4040_v18 = vmul.f32 %v6207_v25, %v8862_v31  ;;  %v3841_v6 = vmul.f32 %v8940_v21, %v8940_v21  ;;  %v3844_v16 = vmul.f32 %v8965_v1, %v8965_v1 }
 0x392   : > { %4499 = vst.msk [vmem:[%s8751_s15 + $0x250] sm:$0xff] %vm884_vm0, %v4403_v26  ;;  %v6209_v27 = vpop.eup %6208  ;;  %6224 = vrcp.f32 %v4247_v52  ;;  %v8991_v51 = vadd.f32 1e-08, %v3871_v34  ;;  %v8993_v47 = vadd.f32 1e-08, %v3874_v59  ;;  %vm4062_vm5 = vcmp.eq.f32.partialorder %v8889_v8, inf }
 0x393   : > { %v6211_v5 = vpop.eup %6210  ;;  %v4342_v57 = vmul.f32 %v6209_v27, %v9888_v45  ;;  %v4374_v7 = vmul.f32 %v6209_v27, %v8217_v29  ;;  %v4406_v9 = vmul.f32 %v6209_v27, %v8603_v49  ;;  %6226 = vpow2.f32 %v5333_v12  ;;  %v9892_v45 = vld [vmem:[#allocation16_spill] sm:$0xff] }
 0x394   : > { %v4042_v32 = vsel %vm4041_vm3, %v8862_v31, %v4040_v18  ;;  %v4061_v39 = vmul.f32 %v6211_v5, %v8889_v8  ;;  %vm4064_vm6 = vcmp.eq.f32.partialorder %v8889_v8, 0.0  ;;  %v4065_v49 = vand.u32 2147483648, %v8889_v8 }
 0x395   : > { %4438 = vst.msk [vmem:[%s8751_s15 + $0x68] sm:$0xff] %vm884_vm0, %v4342_v57  ;;  %4470 = vst.msk [vmem:[%s8751_s15 + $0x168] sm:$0xff] %vm884_vm0, %v4374_v7  ;;  %v4045_v29 = vsel %vm4043_vm4, %v4044_v43, %v4042_v32  ;;  %6228 = vrsqrt.f32 %v8991_v51  ;;  %v3873_v11 = vadd.f32 %v3841_v6, %v8522_v24  ;;  %v3876_v31 = vadd.f32 %v3844_v16, %v8525_v3  ;;  %v9018_v24 = vpop.f32.mrf.mxu1  ;;  %v9893_v7 = vld [vmem:[#allocation43_spill] sm:$0xff] }
 0x396   : > { %4502 = vst.msk [vmem:[%s8751_s15 + $0x268] sm:$0xff] %vm884_vm0, %v4406_v9  ;;  %v5332_v63 = vmul.f32 -1.442695, %v4045_v29  ;;  %v4063_v17 = vsel %vm4062_vm5, %v8889_v8, %v4061_v39  ;;  %6230 = vrsqrt.f32 %v8993_v47  ;;  %v3843_v44 = vmul.f32 %v8995_v62, %v8995_v62 }
 0x397   : > { %v6213_v54 = vpop.eup %6212  ;;  %v4066_v22 = vsel %vm4064_vm6, %v4065_v49, %v4063_v17  ;;  %v9022_v13 = vadd.f32 %v8850_v23, %v9891_v48  ;;  %vm4055_vm7 = vcmp.eq.f32.partialorder %v8930_v10, inf  ;;  %vm4057_vm8 = vcmp.eq.f32.partialorder %v8930_v10, 0.0  ;;  %v9043_v27 = vpop.f32.mrf.mxu1 }
 0x398   : > { %v4341_v33 = vmul.f32 %v6213_v54, %v9889_v19  ;;  %v4373_v8 = vmul.f32 %v6213_v54, %v9890_v0  ;;  %v4405_v2 = vmul.f32 %v6213_v54, %v8626_v37  ;;  %6232 = vpow2.f32 %v5332_v63  ;;  %v9896_v19 = vld [vmem:[#allocation56_spill] sm:$0xff] }
 0x399   : > { %v6215_v14 = vpop.eup %6214  ;;  %v5335_v56 = vmul.f32 -1.442695, %v4066_v22  ;;  %v4058_v26 = vand.u32 2147483648, %v8930_v10  ;;  %vm4076_vm9 = vcmp.eq.f32.partialorder %v8932_v53, inf  ;;  %v9034_v25 = vadd.f32 1e-08, %v3873_v11 }
 0x39a   : > { %v6217_v3 = vpop.eup %6216  ;;  %4437 = vst.msk [vmem:[%s8751_s15 + $0x60] sm:$0xff] %vm884_vm0, %v4341_v33  ;;  %4469 = vst.msk [vmem:[%s8751_s15 + $0x160] sm:$0xff] %vm884_vm0, %v4373_v8  ;;  %v4250_v37 = vadd.f32 1.0, %v6215_v14  ;;  %vm4078_vm1 = vcmp.eq.f32.partialorder %v8932_v53, 0.0  ;;  %v4079_v58 = vand.u32 2147483648, %v8932_v53  ;;  %v3875_v34 = vadd.f32 %v3843_v44, %v8531_v15  ;;  %v9895_v11 = vld [vmem:[#allocation46_spill] sm:$0xff]  ;;  %v9072_v44 = vpop.f32.mrf.mxu1 }
 0x39b   : > { %4501 = vst.msk [vmem:[%s8751_s15 + $0x260] sm:$0xff] %vm884_vm0, %v4405_v2  ;;  %v6219_v23 = vpop.eup %6218  ;;  %6234 = vpow2.f32 %v5335_v56  ;;  %v4054_v52 = vmul.f32 %v6217_v3, %v8930_v10  ;;  %v9040_v43 = vadd.f32 1e-08, %v3876_v31  ;;  %v3846_v5 = vmul.f32 %v9018_v24, %v9018_v24 }
 0x39c   : > { %v6221_v12 = vpop.eup %6220  ;;  %6236 = vrcp.f32 %v4250_v37  ;;  %v4075_v18 = vmul.f32 %v6219_v23, %v8932_v53  ;;  %v3845_v63 = vmul.f32 %v9043_v27, %v9043_v27  ;;  %v3783_v33 = vmul.f32 %v9896_v19, %v9896_v19 }
 0x39d   : > { %v6223_v59 = vpop.eup %6222  ;;  %v4249_v6 = vadd.f32 1.0, %v6221_v12  ;;  %v4056_v16 = vsel %vm4055_vm7, %v8930_v10, %v4054_v52  ;;  %6238 = vrsqrt.f32 %v9034_v25  ;;  %vm4069_vm10 = vcmp.eq.f32.partialorder %v8991_v51, inf }
 0x39e   : > { %v4344_v57 = vmul.f32 %v6223_v59, %v9892_v45  ;;  %v4376_v15 = vmul.f32 %v6223_v59, %v9893_v7  ;;  %v4408_v9 = vmul.f32 %v6223_v59, %v8652_v20  ;;  %v4059_v32 = vsel %vm4057_vm8, %v4058_v26, %v4056_v16  ;;  %v9894_v20 = vld [vmem:[#allocation19_spill] sm:$0xff]  ;;  %v9094_v26 = vpop.f32.mrf.mxu1 }
 0x39f   : > { %v6225_v39 = vpop.eup %6224  ;;  %6240 = vrcp.f32 %v4249_v6  ;;  %v5334_v29 = vmul.f32 -1.442695, %v4059_v32  ;;  %v4077_v49 = vsel %vm4076_vm9, %v8932_v53, %v4075_v18  ;;  %v3878_v53 = vadd.f32 %v3846_v5, %v8534_v4 }
 0x3a0   : > { %v6227_v17 = vpop.eup %6226  ;;  %4440 = vst.msk [vmem:[%s8751_s15 + $0x78] sm:$0xff] %vm884_vm0, %v4344_v57  ;;  %4472 = vst.msk [vmem:[%s8751_s15 + $0x178] sm:$0xff] %vm884_vm0, %v4376_v15  ;;  %v4343_v10 = vmul.f32 %v6225_v39, %v9894_v20  ;;  %v4375_v54 = vmul.f32 %v6225_v39, %v9895_v11  ;;  %v4407_v22 = vmul.f32 %v6225_v39, %v8673_v60  ;;  %v9084_v60 = vadd.f32 1e-08, %v3875_v34  ;;  %v9897_v15 = vld [vmem:[#allocation58_spill] sm:$0xff] }
 0x3a1   : > { %4504 = vst.msk [vmem:[%s8751_s15 + $0x278] sm:$0xff] %vm884_vm0, %v4408_v9  ;;  %v4080_v31 = vsel %vm4078_vm1, %v4079_v58, %v4077_v49  ;;  %v4252_v0 = vadd.f32 1.0, %v6227_v17  ;;  %6242 = vpow2.f32 %v5334_v29  ;;  %vm4071_vm11 = vcmp.eq.f32.partialorder %v8991_v51, 0.0  ;;  %v9898_v39 = vld [vmem:[#allocation18_spill] sm:$0xff] }
 0x3a2   : > { %v5337_v8 = vmul.f32 -1.442695, %v4080_v31  ;;  %4439 = vst.msk [vmem:[%s8751_s15 + $0x70] sm:$0xff] %vm884_vm0, %v4343_v10  ;;  %4471 = vst.msk [vmem:[%s8751_s15 + $0x170] sm:$0xff] %vm884_vm0, %v4375_v54  ;;  %6244 = vrsqrt.f32 %v9040_v43  ;;  %v6229_v2 = vpop.eup %6228  ;;  %v4072_v14 = vand.u32 2147483648, %v8991_v51  ;;  %v3877_v48 = vadd.f32 %v3845_v63, %v8846_v40  ;;  %v9899_v10 = vld [vmem:[#allocation22_spill] sm:$0xff] }
 0x3a3   : > { %4503 = vst.msk [vmem:[%s8751_s15 + $0x270] sm:$0xff] %vm884_vm0, %v4407_v22  ;;  %6246 = vrcp.f32 %v4252_v0  ;;  %v6231_v56 = vpop.eup %6230  ;;  %v4068_v3 = vmul.f32 %v6229_v2, %v8991_v51  ;;  %vm4090_vm12 = vcmp.eq.f32.partialorder %v8993_v47, inf  ;;  %v3848_v37 = vmul.f32 %v9072_v44, %v9072_v44  ;;  %v9900_v54 = vld [vmem:[#allocation45_spill] sm:$0xff] }
 0x3a4   : > { %6248 = vpow2.f32 %v5337_v8  ;;  %v4089_v23 = vmul.f32 %v6231_v56, %v8993_v47  ;;  %vm4092_vm13 = vcmp.eq.f32.partialorder %v8993_v47, 0.0  ;;  %v9099_v52 = vadd.f32 1e-08, %v3878_v53 }
 0x3a5   : > { %v6233_v4 = vpop.eup %6232  ;;  %6250 = vrsqrt.f32 %v9084_v60  ;;  %v4070_v58 = vsel %vm4069_vm10, %v8991_v51, %v4068_v3  ;;  %v4093_v12 = vand.u32 2147483648, %v8993_v47  ;;  %v9105_v18 = vadd.f32 1e-08, %v3877_v48 }
 0x3a6   : > { %v4251_v40 = vadd.f32 1.0, %v6233_v4  ;;  %v4073_v34 = vsel %vm4071_vm11, %v4072_v14, %v4070_v58  ;;  %v4091_v59 = vsel %vm4090_vm12, %v8993_v47, %v4089_v23  ;;  %6252 = vrsqrt.f32 %v9099_v52  ;;  %v9902_v23 = vld [vmem:[#allocation47_spill] sm:$0xff] }
 0x3a7   : > { %v3847_v6 = vmul.f32 %v9094_v26, %v9094_v26  ;;  %v5336_v5 = vmul.f32 -1.442695, %v4073_v34  ;;  %v4094_v45 = vsel %vm4092_vm13, %v4093_v12, %v4091_v59  ;;  %v3880_v57 = vadd.f32 %v3848_v37, %v9022_v13  ;;  %v9901_v37 = vld [vmem:[#allocation20_spill] sm:$0xff] }
 0x3a8   : > { %v6235_v16 = vpop.eup %6234  ;;  %6254 = vrcp.f32 %v4251_v40  ;;  %v3815_v9 = vadd.f32 %v3783_v33, %v9897_v15  ;;  %v5339_v32 = vmul.f32 -1.442695, %v4094_v45  ;;  %vm4083_vm14 = vcmp.eq.f32.partialorder %v9034_v25, inf }
 0x3a9   : > { %v6237_v7 = vpop.eup %6236  ;;  %v4254_v51 = vadd.f32 1.0, %v6235_v16  ;;  %6256 = vrsqrt.f32 %v9105_v18  ;;  %vm4085_vm15 = vcmp.eq.f32.partialorder %v9034_v25, 0.0  ;;  %vm4104_vm2 = vcmp.eq.f32.partialorder %v9040_v43, inf }
 0x3aa   : > { %v6239_v47 = vpop.eup %6238  ;;  %v4346_v29 = vmul.f32 %v6237_v7, %v9898_v39  ;;  %v4378_v49 = vmul.f32 %v6237_v7, %v8225_v55  ;;  %v4410_v63 = vmul.f32 %v6237_v7, %v8693_v30  ;;  %6258 = vpow2.f32 %v5336_v5 }
 0x3ab   : > { %6260 = vrcp.f32 %v4254_v51  ;;  %v4082_v13 = vmul.f32 %v6239_v47, %v9034_v25  ;;  %v4086_v55 = vand.u32 2147483648, %v9034_v25  ;;  %v9129_v30 = vadd.f32 1e-08, %v3880_v57  ;;  %v9903_v51 = vld [vmem:[#allocation24_spill] sm:$0xff] }
 0x3ac   : > { %v6241_v17 = vpop.eup %6240  ;;  %4442 = vst.msk [vmem:[%s8751_s15 + $0x88] sm:$0xff] %vm884_vm0, %v4346_v29  ;;  %4474 = vst.msk [vmem:[%s8751_s15 + $0x188] sm:$0xff] %vm884_vm0, %v4378_v49  ;;  %6262 = vpow2.f32 %v5339_v32  ;;  %v3879_v20 = vadd.f32 %v3847_v6, %v3815_v9  ;;  %vm4106_vm3 = vcmp.eq.f32.partialorder %v9040_v43, 0.0  ;;  %vm4097_vm4 = vcmp.eq.f32.partialorder %v9084_v60, inf  ;;  %v9904_v47 = vld [vmem:[#allocation48_spill] sm:$0xff] }
 0x3ad   : > { %4506 = vst.msk [vmem:[%s8751_s15 + $0x288] sm:$0xff] %vm884_vm0, %v4410_v63  ;;  %v4345_v11 = vmul.f32 %v6241_v17, %v9899_v10  ;;  %v4377_v22 = vmul.f32 %v6241_v17, %v9900_v54  ;;  %v4409_v31 = vmul.f32 %v6241_v17, %v8708_v36  ;;  %v4084_v33 = vsel %vm4083_vm14, %v9034_v25, %v4082_v13  ;;  %v9905_v54 = vld [vmem:[#allocation23_spill] sm:$0xff] }
 0x3ae   : > { %v6243_v0 = vpop.eup %6242  ;;  %v4087_v8 = vsel %vm4085_vm15, %v4086_v55, %v4084_v33  ;;  %6264 = vrsqrt.f32 %v9129_v30  ;;  %v9142_v48 = vadd.f32 1e-08, %v3879_v20  ;;  %v4107_v25 = vand.u32 2147483648, %v9040_v43 }
 0x3af   : > { %v6245_v53 = vpop.eup %6244  ;;  %4441 = vst.msk [vmem:[%s8751_s15 + $0x80] sm:$0xff] %vm884_vm0, %v4345_v11  ;;  %4473 = vst.msk [vmem:[%s8751_s15 + $0x180] sm:$0xff] %vm884_vm0, %v4377_v22  ;;  %v4253_v2 = vadd.f32 1.0, %v6243_v0  ;;  %v5338_v14 = vmul.f32 -1.442695, %v4087_v8  ;;  %vm4099_vm5 = vcmp.eq.f32.partialorder %v9084_v60, 0.0 }
 0x3b0   : > { %4505 = vst.msk [vmem:[%s8751_s15 + $0x280] sm:$0xff] %vm884_vm0, %v4409_v31  ;;  %v6247_v56 = vpop.eup %6246  ;;  %v4103_v36 = vmul.f32 %v6245_v53, %v9040_v43  ;;  %vm4118_vm6 = vcmp.eq.f32.partialorder %v9099_v52, inf  ;;  %vm4120_vm7 = vcmp.eq.f32.partialorder %v9099_v52, 0.0  ;;  %v4121_v15 = vand.u32 2147483648, %v9099_v52  ;;  %v9906_v31 = vld [vmem:[#allocation51_spill] sm:$0xff] }
 0x3b1   : > { %v6249_v3 = vpop.eup %6248  ;;  %v4348_v4 = vmul.f32 %v6247_v56, %v9901_v37  ;;  %v4380_v40 = vmul.f32 %v6247_v56, %v9902_v23  ;;  %v4412_v58 = vmul.f32 %v6247_v56, %v8725_v35  ;;  %6266 = vrcp.f32 %v4253_v2  ;;  %v9907_v37 = vld [vmem:[#allocation26_spill] sm:$0xff]  ;;  %v9908_v23 = vld [vmem:[#allocation57_spill] sm:$0xff] }
 0x3b2   : > { %v6251_v12 = vpop.eup %6250  ;;  %v4256_v34 = vadd.f32 1.0, %v6249_v3  ;;  %6268 = vpow2.f32 %v5338_v14  ;;  %v4105_v59 = vsel %vm4104_vm2, %v9040_v43, %v4103_v36  ;;  %v4100_v43 = vand.u32 2147483648, %v9084_v60 }
 0x3b3   : > { %4444 = vst.msk [vmem:[%s8751_s15 + $0x98] sm:$0xff] %vm884_vm0, %v4348_v4  ;;  %4476 = vst.msk [vmem:[%s8751_s15 + $0x198] sm:$0xff] %vm884_vm0, %v4380_v40  ;;  %v4108_v6 = vsel %vm4106_vm3, %v4107_v25, %v4105_v59  ;;  %v4096_v16 = vmul.f32 %v6251_v12, %v9084_v60  ;;  %6270 = vrsqrt.f32 %v9142_v48  ;;  %v6253_v35 = vpop.eup %6252  ;;  %vm4111_vm8 = vcmp.eq.f32.partialorder %v9105_v18, inf }
 0x3b4   : > { %4508 = vst.msk [vmem:[%s8751_s15 + $0x298] sm:$0xff] %vm884_vm0, %v4412_v58  ;;  %6272 = vrcp.f32 %v4256_v34  ;;  %v5341_v5 = vmul.f32 -1.442695, %v4108_v6  ;;  %v4117_v7 = vmul.f32 %v6253_v35, %v9099_v52  ;;  %v4114_v10 = vand.u32 2147483648, %v9105_v18  ;;  %v9909_v35 = vld [vmem:[#allocation25_spill] sm:$0xff] }
 0x3b5   : > { %v6255_v45 = vpop.eup %6254  ;;  %v4098_v57 = vsel %vm4097_vm4, %v9084_v60, %v4096_v16  ;;  %vm4113_vm9 = vcmp.eq.f32.partialorder %v9105_v18, 0.0  ;;  %vm4132_vm1 = vcmp.eq.f32.partialorder %v9129_v30, inf  ;;  %vm4134_vm10 = vcmp.eq.f32.partialorder %v9129_v30, 0.0 }
 0x3b6   : > { %v6257_v9 = vpop.eup %6256  ;;  %v4347_v32 = vmul.f32 %v6255_v45, %v9903_v51  ;;  %v4379_v39 = vmul.f32 %v6255_v45, %v9904_v47  ;;  %v4411_v29 = vmul.f32 %v6255_v45, %v8766_v38  ;;  %6274 = vpow2.f32 %v5341_v5 }
 0x3b7   : > { %v6259_v49 = vpop.eup %6258  ;;  %v4101_v63 = vsel %vm4099_vm5, %v4100_v43, %v4098_v57  ;;  %v4119_v13 = vsel %vm4118_vm6, %v9099_v52, %v4117_v7  ;;  %v4110_v17 = vmul.f32 %v6257_v9, %v9105_v18  ;;  %vm4125_vm11 = vcmp.eq.f32.partialorder %v9142_v48, inf  ;;  %v9910_v43 = vld [vmem:[#allocation52_spill] sm:$0xff] }
 0x3b8   : > { %v6261_v55 = vpop.eup %6260  ;;  %4443 = vst.msk [vmem:[%s8751_s15 + $0x90] sm:$0xff] %vm884_vm0, %v4347_v32  ;;  %4475 = vst.msk [vmem:[%s8751_s15 + $0x190] sm:$0xff] %vm884_vm0, %v4379_v39  ;;  %v4255_v38 = vadd.f32 1.0, %v6259_v49  ;;  %v5340_v20 = vmul.f32 -1.442695, %v4101_v63  ;;  %v4122_v60 = vsel %vm4120_vm7, %v4121_v15, %v4119_v13  ;;  %vm4127_vm12 = vcmp.eq.f32.partialorder %v9142_v48, 0.0 }
 0x3b9   : > { %4507 = vst.msk [vmem:[%s8751_s15 + $0x290] sm:$0xff] %vm884_vm0, %v4411_v29  ;;  %v6263_v11 = vpop.eup %6262  ;;  %v4350_v22 = vmul.f32 %v6261_v55, %v9905_v54  ;;  %v4382_v33 = vmul.f32 %v6261_v55, %v9906_v31  ;;  %v4414_v0 = vmul.f32 %v6261_v55, %v8790_v42  ;;  %v5343_v8 = vmul.f32 -1.442695, %v4122_v60  ;;  %v9911_v39 = vld [vmem:[#allocation28_spill] sm:$0xff] }
 0x3ba   : > { %6276 = vrcp.f32 %v4255_v38  ;;  %v4258_v53 = vadd.f32 1.0, %v6263_v11  ;;  %v4112_v2 = vsel %vm4111_vm8, %v9105_v18, %v4110_v17  ;;  %v4135_v18 = vand.u32 2147483648, %v9129_v30  ;;  %v9913_v38 = vld [vmem:[#allocation27_spill] sm:$0xff]  ;;  %v9914_v60 = vld [vmem:[#allocation60_spill] sm:$0xff] }
 0x3bb   : > { %v6265_v52 = vpop.eup %6264  ;;  %4446 = vst.msk [vmem:[%s8751_s15 + $0xa8] sm:$0xff] %vm884_vm0, %v4350_v22  ;;  %4478 = vst.msk [vmem:[%s8751_s15 + $0x1a8] sm:$0xff] %vm884_vm0, %v4382_v33  ;;  %6278 = vpow2.f32 %v5340_v20  ;;  %v4115_v14 = vsel %vm4113_vm9, %v4114_v10, %v4112_v2 }
 0x3bc   : > { %4510 = vst.msk [vmem:[%s8751_s15 + $0x2a8] sm:$0xff] %vm884_vm0, %v4414_v0  ;;  %6280 = vrcp.f32 %v4258_v53  ;;  %v5342_v42 = vmul.f32 -1.442695, %v4115_v14  ;;  %v4131_v56 = vmul.f32 %v6265_v52, %v9129_v30  ;;  %v9915_v0 = vld [vmem:[#allocation30_spill] sm:$0xff] }
 0x3bd   : > { %6282 = vpow2.f32 %v5343_v8  ;;  %v9916_v8 = vld [vmem:[#allocation63_spill] sm:$0xff] }
 0x3be   : > { %v6267_v36 = vpop.eup %6266  ;;  %6284 = vpow2.f32 %v5342_v42  ;;  %v4133_v25 = vsel %vm4132_vm1, %v9129_v30, %v4131_v56  ;;  %v9917_v56 = vld [vmem:[#allocation29_spill] sm:$0xff] }
 0x3bf   : > { %v6269_v3 = vpop.eup %6268  ;;  %v4349_v4 = vmul.f32 %v6267_v36, %v9907_v37  ;;  %v4381_v40 = vmul.f32 %v6267_v36, %v9908_v23  ;;  %v4413_v58 = vmul.f32 %v6267_v36, %v8820_v28  ;;  %v4136_v12 = vsel %vm4134_vm10, %v4135_v18, %v4133_v25  ;;  %v9918_v36 = vld [vmem:[#allocation62_spill] sm:$0xff] }
 0x3c0   : > { %v6271_v34 = vpop.eup %6270  ;;  %v4257_v59 = vadd.f32 1.0, %v6269_v3  ;;  %v5345_v6 = vmul.f32 -1.442695, %v4136_v12  ;;  %v4128_v28 = vand.u32 2147483648, %v9142_v48 }
 0x3c1   : > { %v6273_v16 = vpop.eup %6272  ;;  %4445 = vst.msk [vmem:[%s8751_s15 + $0xa0] sm:$0xff] %vm884_vm0, %v4349_v4  ;;  %4477 = vst.msk [vmem:[%s8751_s15 + $0x1a0] sm:$0xff] %vm884_vm0, %v4381_v40  ;;  %v4124_v30 = vmul.f32 %v6271_v34, %v9142_v48  ;;  %v9919_v4 = vld [vmem:[#allocation32_spill] sm:$0xff]  ;;  %v9920_v40 = vld [vmem:[#allocation65_spill] sm:$0xff] }
 0x3c2   : > { %4509 = vst.msk [vmem:[%s8751_s15 + $0x2a0] sm:$0xff] %vm884_vm0, %v4413_v58  ;;  %v4352_v5 = vmul.f32 %v6273_v16, %v9909_v35  ;;  %v4384_v45 = vmul.f32 %v6273_v16, %v9910_v43  ;;  %v4416_v57 = vmul.f32 %v6273_v16, %v8860_v61  ;;  %6286 = vrcp.f32 %v4257_v59  ;;  %v9921_v59 = vld [vmem:[#allocation31_spill] sm:$0xff]  ;;  %v9922_v16 = vld [vmem:[#allocation64_spill] sm:$0xff]  ;;  %v9923_v35 = vld [vmem:[#allocation34_spill] sm:$0xff] }
 0x3c3   : > { %v6275_v7 = vpop.eup %6274  ;;  %6288 = vpow2.f32 %v5345_v6  ;;  %v4126_v15 = vsel %vm4125_vm11, %v9142_v48, %v4124_v30  ;;  %v9912_v48 = vld [vmem:[#allocation61_spill] sm:$0xff] }
 0x3c4   : > { %4448 = vst.msk [vmem:[%s8751_s15 + $0xb8] sm:$0xff] %vm884_vm0, %v4352_v5  ;;  %4480 = vst.msk [vmem:[%s8751_s15 + $0x1b8] sm:$0xff] %vm884_vm0, %v4384_v45  ;;  %v4260_v9 = vadd.f32 1.0, %v6275_v7  ;;  %v4129_v51 = vsel %vm4127_vm12, %v4128_v28, %v4126_v15  ;;  %v9924_v5 = vld [vmem:[#allocation49_spill] sm:$0xff] }
 0x3c5   : > { %4512 = vst.msk [vmem:[%s8751_s15 + $0x2b8] sm:$0xff] %vm884_vm0, %v4416_v57  ;;  %v5344_v32 = vmul.f32 -1.442695, %v4129_v51  ;;  %v9925_v57 = vld [vmem:[#allocation33_spill] sm:$0xff]  ;;  %v9926_v51 = vld [vmem:[#allocation36_spill] sm:$0xff] }
 0x3c6   : > { %6290 = vrcp.f32 %v4260_v9 }
 0x3c7   : > { %v6277_v61 = vpop.eup %6276  ;;  %6292 = vpow2.f32 %v5344_v32 }
 0x3c8   : > { %v6279_v47 = vpop.eup %6278  ;;  %v4351_v29 = vmul.f32 %v6277_v61, %v9911_v39  ;;  %v4383_v49 = vmul.f32 %v6277_v61, %v9912_v48  ;;  %v4415_v63 = vmul.f32 %v6277_v61, %v8880_v50  ;;  %v4766_v39 = vld [vmem:[%s8751_s15 + $0x20] sm:$0xff] (%p6404_p5)  ;;  %v4770_v48 = vld [vmem:[%s8751_s15 + $0x30] sm:$0xff] (%p6404_p5) }
 0x3c9   : > { %v6281_v13 = vpop.eup %6280  ;;  %v4259_v17 = vadd.f32 1.0, %v6279_v47  ;;  %4767 = vst [vmem:[%s9316_s24 + $0x20] sm:$0xff] (%p6404_p5), %v4766_v39  ;;  %4771 = vst [vmem:[%s9316_s24 + $0x30] sm:$0xff] (%p6404_p5), %v4770_v48  ;;  %v4894_v39 = vld [vmem:[%s8751_s15 + $0x220] sm:$0xff] (%p6404_p5)  ;;  %v4898_v48 = vld [vmem:[%s8751_s15 + $0x230] sm:$0xff] (%p6404_p5) }
 0x3ca   : > { %v6283_v55 = vpop.eup %6282  ;;  %4447 = vst.msk [vmem:[%s8751_s15 + $0xb0] sm:$0xff] %vm884_vm0, %v4351_v29  ;;  %4479 = vst.msk [vmem:[%s8751_s15 + $0x1b0] sm:$0xff] %vm884_vm0, %v4383_v49  ;;  %v4354_v20 = vmul.f32 %v6281_v13, %v9913_v38  ;;  %v4386_v10 = vmul.f32 %v6281_v13, %v9914_v60  ;;  %v4418_v11 = vmul.f32 %v6281_v13, %v8912_v41  ;;  %v4768_v29 = vld [vmem:[%s8751_s15 + $0x28] sm:$0xff] (%p6404_p5)  ;;  %v4772_v49 = vld [vmem:[%s8751_s15 + $0x38] sm:$0xff] (%p6404_p5) }
 0x3cb   : > { %4511 = vst.msk [vmem:[%s8751_s15 + $0x2b0] sm:$0xff] %vm884_vm0, %v4415_v63  ;;  %v6285_v54 = vpop.eup %6284  ;;  %6294 = vrcp.f32 %v4259_v17  ;;  %v4262_v50 = vadd.f32 1.0, %v6283_v55  ;;  %4769 = vst [vmem:[%s9316_s24 + $0x28] sm:$0xff] (%p6404_p5), %v4768_v29  ;;  %v4774_v63 = vld [vmem:[%s8751_s15 + $0x40] sm:$0xff] (%p6404_p5)  ;;  %v4776_v13 = vld [vmem:[%s8751_s15 + $0x48] sm:$0xff] (%p6404_p5) }
 0x3cc   : > { %4450 = vst.msk [vmem:[%s8751_s15 + $0xc8] sm:$0xff] %vm884_vm0, %v4354_v20  ;;  %4482 = vst.msk [vmem:[%s8751_s15 + $0x1c8] sm:$0xff] %vm884_vm0, %v4386_v10  ;;  %v4261_v22 = vadd.f32 1.0, %v6285_v54  ;;  %v4778_v17 = vld [vmem:[%s8751_s15 + $0x50] sm:$0xff] (%p6404_p5)  ;;  %v4780_v55 = vld [vmem:[%s8751_s15 + $0x58] sm:$0xff] (%p6404_p5) }
 0x3cd   : > { %4514 = vst.msk [vmem:[%s8751_s15 + $0x2c8] sm:$0xff] %vm884_vm0, %v4418_v11  ;;  %6296 = vrcp.f32 %v4262_v50  ;;  %4773 = vst [vmem:[%s9316_s24 + $0x38] sm:$0xff] (%p6404_p5), %v4772_v49  ;;  %v4782_v38 = vld [vmem:[%s8751_s15 + $0x60] sm:$0xff] (%p6404_p5)  ;;  %v4784_v20 = vld [vmem:[%s8751_s15 + $0x68] sm:$0xff] (%p6404_p5) }
 0x3ce   : > { %6298 = vrcp.f32 %v4261_v22  ;;  %4775 = vst [vmem:[%s9316_s24 + $0x40] sm:$0xff] (%p6404_p5), %v4774_v63  ;;  %4777 = vst [vmem:[%s9316_s24 + $0x48] sm:$0xff] (%p6404_p5), %v4776_v13  ;;  %v4786_v60 = vld [vmem:[%s8751_s15 + $0x70] sm:$0xff] (%p6404_p5)  ;;  %v4788_v10 = vld [vmem:[%s8751_s15 + $0x78] sm:$0xff] (%p6404_p5) }
 0x3cf   : > { %v6287_v31 = vpop.eup %6286  ;;  %4779 = vst [vmem:[%s9316_s24 + $0x50] sm:$0xff] (%p6404_p5), %v4778_v17  ;;  %4781 = vst [vmem:[%s9316_s24 + $0x58] sm:$0xff] (%p6404_p5), %v4780_v55  ;;  %v4790_v11 = vld [vmem:[%s8751_s15 + $0x80] sm:$0xff] (%p6404_p5)  ;;  %v4792_v54 = vld [vmem:[%s8751_s15 + $0x88] sm:$0xff] (%p6404_p5) }
 0x3d0   : > { %v6289_v33 = vpop.eup %6288  ;;  %v4353_v41 = vmul.f32 %v6287_v31, %v9915_v0  ;;  %v4385_v53 = vmul.f32 %v6287_v31, %v9916_v8  ;;  %v4417_v2 = vmul.f32 %v6287_v31, %v8940_v21  ;;  %4783 = vst [vmem:[%s9316_s24 + $0x60] sm:$0xff] (%p6404_p5), %v4782_v38  ;;  %4785 = vst [vmem:[%s9316_s24 + $0x68] sm:$0xff] (%p6404_p5), %v4784_v20  ;;  %v4794_v50 = vld [vmem:[%s8751_s15 + $0x90] sm:$0xff] (%p6404_p5)  ;;  %v4796_v22 = vld [vmem:[%s8751_s15 + $0x98] sm:$0xff] (%p6404_p5) }
 0x3d1   : > { %v4264_v52 = vadd.f32 1.0, %v6289_v33  ;;  %4787 = vst [vmem:[%s9316_s24 + $0x70] sm:$0xff] (%p6404_p5), %v4786_v60  ;;  %4789 = vst [vmem:[%s9316_s24 + $0x78] sm:$0xff] (%p6404_p5), %v4788_v10  ;;  %v4798_v31 = vld [vmem:[%s8751_s15 + $0xa0] sm:$0xff] (%p6404_p5)  ;;  %v4800_v33 = vld [vmem:[%s8751_s15 + $0xa8] sm:$0xff] (%p6404_p5) }
 0x3d2   : > { %4449 = vst.msk [vmem:[%s8751_s15 + $0xc0] sm:$0xff] %vm884_vm0, %v4353_v41  ;;  %4481 = vst.msk [vmem:[%s8751_s15 + $0x1c0] sm:$0xff] %vm884_vm0, %v4385_v53  ;;  %v4802_v0 = vld [vmem:[%s8751_s15 + $0xb0] sm:$0xff] (%p6404_p5)  ;;  %v4804_v41 = vld [vmem:[%s8751_s15 + $0xb8] sm:$0xff] (%p6404_p5) }
 0x3d3   : > { %4513 = vst.msk [vmem:[%s8751_s15 + $0x2c0] sm:$0xff] %vm884_vm0, %v4417_v2  ;;  %v6291_v14 = vpop.eup %6290  ;;  %6300 = vrcp.f32 %v4264_v52  ;;  %4791 = vst [vmem:[%s9316_s24 + $0x80] sm:$0xff] (%p6404_p5), %v4790_v11  ;;  %v4808_v53 = vld [vmem:[%s8751_s15 + $0xc8] sm:$0xff] (%p6404_p5)  ;;  %v4900_v49 = vld [vmem:[%s8751_s15 + $0x238] sm:$0xff] (%p6404_p5) }
 0x3d4   : > { %v6293_v42 = vpop.eup %6292  ;;  %v4356_v18 = vmul.f32 %v6291_v14, %v9917_v56  ;;  %v4388_v25 = vmul.f32 %v6291_v14, %v9918_v36  ;;  %v4420_v3 = vmul.f32 %v6291_v14, %v8965_v1  ;;  %4793 = vst [vmem:[%s9316_s24 + $0x88] sm:$0xff] (%p6404_p5), %v4792_v54  ;;  %4795 = vst [vmem:[%s9316_s24 + $0x90] sm:$0xff] (%p6404_p5), %v4794_v50  ;;  %v4822_v36 = vld [vmem:[%s8751_s15 + $0x100] sm:$0xff] (%p6404_p5)  ;;  %v4896_v29 = vld [vmem:[%s8751_s15 + $0x228] sm:$0xff] (%p6404_p5) }
 0x3d5   : > { %v4263_v21 = vadd.f32 1.0, %v6293_v42  ;;  %4797 = vst [vmem:[%s9316_s24 + $0x98] sm:$0xff] (%p6404_p5), %v4796_v22  ;;  %4799 = vst [vmem:[%s9316_s24 + $0xa0] sm:$0xff] (%p6404_p5), %v4798_v31  ;;  %v4902_v63 = vld [vmem:[%s8751_s15 + $0x240] sm:$0xff] (%p6404_p5)  ;;  %v4904_v13 = vld [vmem:[%s8751_s15 + $0x248] sm:$0xff] (%p6404_p5) }
 0x3d6   : > { %4452 = vst.msk [vmem:[%s8751_s15 + $0xd8] sm:$0xff] %vm884_vm0, %v4356_v18  ;;  %4484 = vst.msk [vmem:[%s8751_s15 + $0x1d8] sm:$0xff] %vm884_vm0, %v4388_v25  ;;  %v4824_v25 = vld [vmem:[%s8751_s15 + $0x108] sm:$0xff] (%p6404_p5)  ;;  %v4906_v17 = vld [vmem:[%s8751_s15 + $0x250] sm:$0xff] (%p6404_p5) }
 0x3d7   : > { %4516 = vst.msk [vmem:[%s8751_s15 + $0x2d8] sm:$0xff] %vm884_vm0, %v4420_v3  ;;  %6302 = vrcp.f32 %v4263_v21  ;;  %4801 = vst [vmem:[%s9316_s24 + $0xa8] sm:$0xff] (%p6404_p5), %v4800_v33  ;;  %v4826_v3 = vld [vmem:[%s8751_s15 + $0x110] sm:$0xff] (%p6404_p5)  ;;  %v4828_v21 = vld [vmem:[%s8751_s15 + $0x118] sm:$0xff] (%p6404_p5) }
 0x3d8   : > { %v6295_v37 = vpop.eup %6294  ;;  %4803 = vst [vmem:[%s9316_s24 + $0xb0] sm:$0xff] (%p6404_p5), %v4802_v0  ;;  %4805 = vst [vmem:[%s9316_s24 + $0xb8] sm:$0xff] (%p6404_p5), %v4804_v41  ;;  %v4908_v55 = vld [vmem:[%s8751_s15 + $0x258] sm:$0xff] (%p6404_p5)  ;;  %v4910_v38 = vld [vmem:[%s8751_s15 + $0x260] sm:$0xff] (%p6404_p5) }
 0x3d9   : > { %v4355_v23 = vmul.f32 %v6295_v37, %v9919_v4  ;;  %v4387_v58 = vmul.f32 %v6295_v37, %v9920_v40  ;;  %v4419_v12 = vmul.f32 %v6295_v37, %v8995_v62  ;;  %v4806_v8 = vld [vmem:[%s8751_s15 + $0xc0] sm:$0xff] (%p6404_p5)  ;;  %4809 = vst [vmem:[%s9316_s24 + $0xc8] sm:$0xff] (%p6404_p5), %v4808_v53  ;;  %4823 = vst [vmem:[%s9316_s24 + $0x400] sm:$0xff] (%p6404_p5), %v4822_v36  ;;  %v4832_v4 = vld [vmem:[%s8751_s15 + $0x128] sm:$0xff] (%p6404_p5) }
 0x3da   : > { %v6297_v1 = vpop.eup %6296  ;;  %4807 = vst [vmem:[%s9316_s24 + $0xc0] sm:$0xff] (%p6404_p5), %v4806_v8  ;;  %4825 = vst [vmem:[%s9316_s24 + $0x408] sm:$0xff] (%p6404_p5), %v4824_v25  ;;  %v4830_v37 = vld [vmem:[%s8751_s15 + $0x120] sm:$0xff] (%p6404_p5)  ;;  %v4836_v40 = vld [vmem:[%s8751_s15 + $0x138] sm:$0xff] (%p6404_p5) }
 0x3db   : > { %v6299_v34 = vpop.eup %6298  ;;  %4451 = vst.msk [vmem:[%s8751_s15 + $0xd0] sm:$0xff] %vm884_vm0, %v4355_v23  ;;  %4483 = vst.msk [vmem:[%s8751_s15 + $0x1d0] sm:$0xff] %vm884_vm0, %v4387_v58  ;;  %v4358_v6 = vmul.f32 %v6297_v1, %v9921_v59  ;;  %v4390_v30 = vmul.f32 %v6297_v1, %v9922_v16  ;;  %v4422_v28 = vmul.f32 %v6297_v1, %v9018_v24  ;;  %v4834_v23 = vld [vmem:[%s8751_s15 + $0x130] sm:$0xff] (%p6404_p5)  ;;  %v4838_v58 = vld [vmem:[%s8751_s15 + $0x140] sm:$0xff] (%p6404_p5) }
 0x3dc   : > { %4515 = vst.msk [vmem:[%s8751_s15 + $0x2d0] sm:$0xff] %vm884_vm0, %v4419_v12  ;;  %v4357_v62 = vmul.f32 %v6299_v34, %v9923_v35  ;;  %v4389_v43 = vmul.f32 %v6299_v34, %v9924_v5  ;;  %v4421_v45 = vmul.f32 %v6299_v34, %v9043_v27  ;;  %4827 = vst [vmem:[%s9316_s24 + $0x410] sm:$0xff] (%p6404_p5), %v4826_v3  ;;  %v4840_v12 = vld [vmem:[%s8751_s15 + $0x148] sm:$0xff] (%p6404_p5)  ;;  %v4842_v1 = vld [vmem:[%s8751_s15 + $0x150] sm:$0xff] (%p6404_p5) }
 0x3dd   : > { %4454 = vst.msk [vmem:[%s8751_s15 + $0xe8] sm:$0xff] %vm884_vm0, %v4358_v6  ;;  %4486 = vst.msk [vmem:[%s8751_s15 + $0x1e8] sm:$0xff] %vm884_vm0, %v4390_v30  ;;  %v4812_v52 = vld [vmem:[%s8751_s15 + $0xd8] sm:$0xff] (%p6404_p5)  ;;  %v4846_v59 = vld [vmem:[%s8751_s15 + $0x160] sm:$0xff] (%p6404_p5) }
 0x3de   : > { %4518 = vst.msk [vmem:[%s8751_s15 + $0x2e8] sm:$0xff] %vm884_vm0, %v4422_v28  ;;  %4453 = vst.msk [vmem:[%s8751_s15 + $0xe0] sm:$0xff] %vm884_vm0, %v4357_v62  ;;  %v4844_v34 = vld [vmem:[%s8751_s15 + $0x158] sm:$0xff] (%p6404_p5)  ;;  %v4848_v6 = vld [vmem:[%s8751_s15 + $0x168] sm:$0xff] (%p6404_p5) }
 0x3df   : > { %4485 = vst.msk [vmem:[%s8751_s15 + $0x1e0] sm:$0xff] %vm884_vm0, %v4389_v43  ;;  %4517 = vst.msk [vmem:[%s8751_s15 + $0x2e0] sm:$0xff] %vm884_vm0, %v4421_v45  ;;  %v4850_v16 = vld [vmem:[%s8751_s15 + $0x170] sm:$0xff] (%p6404_p5)  ;;  %v4852_v30 = vld [vmem:[%s8751_s15 + $0x178] sm:$0xff] (%p6404_p5) }
 0x3e0   : > { %v6301_v24 = vpop.eup %6300  ;;  %4813 = vst [vmem:[%s9316_s24 + $0xd8] sm:$0xff] (%p6404_p5), %v4812_v52  ;;  %4829 = vst [vmem:[%s9316_s24 + $0x418] sm:$0xff] (%p6404_p5), %v4828_v21  ;;  %v4854_v28 = vld [vmem:[%s8751_s15 + $0x180] sm:$0xff] (%p6404_p5)  ;;  %v4856_v35 = vld [vmem:[%s8751_s15 + $0x188] sm:$0xff] (%p6404_p5) }
 0x3e1   : > { %v4360_v7 = vmul.f32 %v6301_v24, %v9925_v57  ;;  %v4392_v27 = vmul.f32 %v6301_v24, %v9880_v46  ;;  %v4424_v15 = vmul.f32 %v6301_v24, %v9072_v44  ;;  %v4758_v46 = vld [vmem:[%s8751_s15] sm:$0xff] (%p6404_p5)  ;;  %v4760_v44 = vld [vmem:[%s8751_s15 + $0x8] sm:$0xff] (%p6404_p5)  ;;  %4831 = vst [vmem:[%s9316_s24 + $0x420] sm:$0xff] (%p6404_p5), %v4830_v37  ;;  %4833 = vst [vmem:[%s9316_s24 + $0x428] sm:$0xff] (%p6404_p5), %v4832_v4 }
 0x3e2   : > { %4759 = vst [vmem:[%s9316_s24] sm:$0xff] (%p6404_p5), %v4758_v46  ;;  %4761 = vst [vmem:[%s9316_s24 + $0x8] sm:$0xff] (%p6404_p5), %v4760_v44  ;;  %v4810_v2 = vld [vmem:[%s8751_s15 + $0xd0] sm:$0xff] (%p6404_p5)  ;;  %v4860_v5 = vld [vmem:[%s8751_s15 + $0x198] sm:$0xff] (%p6404_p5) }
 0x3e3   : > { %4456 = vst.msk [vmem:[%s8751_s15 + $0xf8] sm:$0xff] %vm884_vm0, %v4360_v7  ;;  %4488 = vst.msk [vmem:[%s8751_s15 + $0x1f8] sm:$0xff] %vm884_vm0, %v4392_v27  ;;  %v4858_v62 = vld [vmem:[%s8751_s15 + $0x190] sm:$0xff] (%p6404_p5)  ;;  %v4862_v43 = vld [vmem:[%s8751_s15 + $0x1a0] sm:$0xff] (%p6404_p5) }
 0x3e4   : > { %4520 = vst.msk [vmem:[%s8751_s15 + $0x2f8] sm:$0xff] %vm884_vm0, %v4424_v15  ;;  %v6303_v9 = vpop.eup %6302  ;;  %4536 = sbr.rel (!%p6404_p5) target bundleno = 1031 (0x407), region = 94  ;;  %4811 = vst [vmem:[%s9316_s24 + $0xd0] sm:$0xff] (%p6404_p5), %v4810_v2  ;;  %v4816_v42 = vld [vmem:[%s8751_s15 + $0xe8] sm:$0xff] (%p6404_p5)  ;;  %v4866_v24 = vld [vmem:[%s8751_s15 + $0x1b0] sm:$0xff] (%p6404_p5) }
 0x3e5   : > { %v4359_v32 = vmul.f32 %v6303_v9, %v9926_v51  ;;  %v4391_v61 = vmul.f32 %v6303_v9, %v9896_v19  ;;  %v4423_v47 = vmul.f32 %v6303_v9, %v9094_v26  ;;  %v4762_v19 = vld [vmem:[%s8751_s15 + $0x10] sm:$0xff] (%p6404_p5)  ;;  %v4764_v26 = vld [vmem:[%s8751_s15 + $0x18] sm:$0xff] (%p6404_p5)  ;;  %v4814_v14 = vld [vmem:[%s8751_s15 + $0xe0] sm:$0xff] (%p6404_p5)  ;;  %4817 = vst [vmem:[%s9316_s24 + $0xe8] sm:$0xff] (%p6404_p5), %v4816_v42 }
 0x3e6   : > { %4763 = vst [vmem:[%s9316_s24 + $0x10] sm:$0xff] (%p6404_p5), %v4762_v19  ;;  %4765 = vst [vmem:[%s9316_s24 + $0x18] sm:$0xff] (%p6404_p5), %v4764_v26  ;;  %v4864_v45 = vld [vmem:[%s8751_s15 + $0x1a8] sm:$0xff] (%p6404_p5)  ;;  %v4868_v57 = vld [vmem:[%s8751_s15 + $0x1b8] sm:$0xff] (%p6404_p5) }
 0x3e7   : > { %4455 = vst.msk [vmem:[%s8751_s15 + $0xf0] sm:$0xff] %vm884_vm0, %v4359_v32  ;;  %4487 = vst.msk [vmem:[%s8751_s15 + $0x1f0] sm:$0xff] %vm884_vm0, %v4391_v61  ;;  %v4870_v7 = vld [vmem:[%s8751_s15 + $0x1c0] sm:$0xff] (%p6404_p5)  ;;  %v4872_v27 = vld [vmem:[%s8751_s15 + $0x1c8] sm:$0xff] (%p6404_p5) }
 0x3e8   : > { %4519 = vst.msk [vmem:[%s8751_s15 + $0x2f0] sm:$0xff] %vm884_vm0, %v4423_v47  ;;  %4815 = vst [vmem:[%s9316_s24 + $0xe0] sm:$0xff] (%p6404_p5), %v4814_v14  ;;  %v4874_v15 = vld [vmem:[%s8751_s15 + $0x1d0] sm:$0xff] (%p6404_p5)  ;;  %v4876_v9 = vld [vmem:[%s8751_s15 + $0x1d8] sm:$0xff] (%p6404_p5) }
 0x3e9   : > { %4835 = vst [vmem:[%s9316_s24 + $0x430] sm:$0xff] %v4834_v23  ;;  %4837 = vst [vmem:[%s9316_s24 + $0x438] sm:$0xff] %v4836_v40  ;;  %v4878_v51 = vld [vmem:[%s8751_s15 + $0x1e0] sm:$0xff]  ;;  %v4880_v32 = vld [vmem:[%s8751_s15 + $0x1e8] sm:$0xff] }
 0x3ea   : > { %v4820_v18 = vld [vmem:[%s8751_s15 + $0xf8] sm:$0xff]  ;;  %4839 = vst [vmem:[%s9316_s24 + $0x440] sm:$0xff] %v4838_v58  ;;  %4841 = vst [vmem:[%s9316_s24 + $0x448] sm:$0xff] %v4840_v12  ;;  %v4886_v46 = vld [vmem:[%s8751_s15 + $0x200] sm:$0xff] }
 0x3eb   : > { %4821 = vst [vmem:[%s9316_s24 + $0xf8] sm:$0xff] %v4820_v18  ;;  %4843 = vst [vmem:[%s9316_s24 + $0x450] sm:$0xff] %v4842_v1  ;;  %v4884_v47 = vld [vmem:[%s8751_s15 + $0x1f8] sm:$0xff]  ;;  %v4888_v44 = vld [vmem:[%s8751_s15 + $0x208] sm:$0xff] }
 0x3ec   : > { %4845 = vst [vmem:[%s9316_s24 + $0x458] sm:$0xff] %v4844_v34  ;;  %4847 = vst [vmem:[%s9316_s24 + $0x460] sm:$0xff] %v4846_v59  ;;  %v4890_v19 = vld [vmem:[%s8751_s15 + $0x210] sm:$0xff]  ;;  %v4892_v26 = vld [vmem:[%s8751_s15 + $0x218] sm:$0xff] }
 0x3ed   : > { %4849 = vst [vmem:[%s9316_s24 + $0x468] sm:$0xff] %v4848_v6  ;;  %4851 = vst [vmem:[%s9316_s24 + $0x470] sm:$0xff] %v4850_v16  ;;  %v4912_v20 = vld [vmem:[%s8751_s15 + $0x268] sm:$0xff]  ;;  %v4914_v60 = vld [vmem:[%s8751_s15 + $0x270] sm:$0xff] }
 0x3ee   : > { %v4818_v56 = vld [vmem:[%s8751_s15 + $0xf0] sm:$0xff]  ;;  %4853 = vst [vmem:[%s9316_s24 + $0x478] sm:$0xff] %v4852_v30  ;;  %4855 = vst [vmem:[%s9316_s24 + $0x480] sm:$0xff] %v4854_v28  ;;  %v4916_v10 = vld [vmem:[%s8751_s15 + $0x278] sm:$0xff] }
 0x3ef   : > { %4819 = vst [vmem:[%s9316_s24 + $0xf0] sm:$0xff] %v4818_v56  ;;  %4857 = vst [vmem:[%s9316_s24 + $0x488] sm:$0xff] %v4856_v35  ;;  %v4882_v61 = vld [vmem:[%s8751_s15 + $0x1f0] sm:$0xff]  ;;  %v4918_v11 = vld [vmem:[%s8751_s15 + $0x280] sm:$0xff] }
 0x3f0   : > { %4859 = vst [vmem:[%s9316_s24 + $0x490] sm:$0xff] %v4858_v62  ;;  %4861 = vst [vmem:[%s9316_s24 + $0x498] sm:$0xff] %v4860_v5  ;;  %v4920_v54 = vld [vmem:[%s8751_s15 + $0x288] sm:$0xff]  ;;  %v4922_v50 = vld [vmem:[%s8751_s15 + $0x290] sm:$0xff] }
 0x3f1   : > { %4863 = vst [vmem:[%s9316_s24 + $0x4a0] sm:$0xff] %v4862_v43  ;;  %4865 = vst [vmem:[%s9316_s24 + $0x4a8] sm:$0xff] %v4864_v45  ;;  %v4924_v22 = vld [vmem:[%s8751_s15 + $0x298] sm:$0xff]  ;;  %v4926_v31 = vld [vmem:[%s8751_s15 + $0x2a0] sm:$0xff] }
 0x3f2   : > { %4867 = vst [vmem:[%s9316_s24 + $0x4b0] sm:$0xff] %v4866_v24  ;;  %4869 = vst [vmem:[%s9316_s24 + $0x4b8] sm:$0xff] %v4868_v57  ;;  %v4928_v33 = vld [vmem:[%s8751_s15 + $0x2a8] sm:$0xff]  ;;  %v4930_v0 = vld [vmem:[%s8751_s15 + $0x2b0] sm:$0xff] }
 0x3f3   : > { %4871 = vst [vmem:[%s9316_s24 + $0x4c0] sm:$0xff] %v4870_v7  ;;  %4873 = vst [vmem:[%s9316_s24 + $0x4c8] sm:$0xff] %v4872_v27  ;;  %v4932_v41 = vld [vmem:[%s8751_s15 + $0x2b8] sm:$0xff]  ;;  %v4934_v8 = vld [vmem:[%s8751_s15 + $0x2c0] sm:$0xff] }
 0x3f4   : > { %4875 = vst [vmem:[%s9316_s24 + $0x4d0] sm:$0xff] %v4874_v15  ;;  %4877 = vst [vmem:[%s9316_s24 + $0x4d8] sm:$0xff] %v4876_v9  ;;  %v4936_v53 = vld [vmem:[%s8751_s15 + $0x2c8] sm:$0xff]  ;;  %v4938_v2 = vld [vmem:[%s8751_s15 + $0x2d0] sm:$0xff] }
 0x3f5   : > { %4879 = vst [vmem:[%s9316_s24 + $0x4e0] sm:$0xff] %v4878_v51  ;;  %4881 = vst [vmem:[%s9316_s24 + $0x4e8] sm:$0xff] %v4880_v32  ;;  %v4940_v52 = vld [vmem:[%s8751_s15 + $0x2d8] sm:$0xff]  ;;  %v4942_v14 = vld [vmem:[%s8751_s15 + $0x2e0] sm:$0xff] }
 0x3f6   : > { %4883 = vst [vmem:[%s9316_s24 + $0x4f0] sm:$0xff] %v4882_v61  ;;  %4885 = vst [vmem:[%s9316_s24 + $0x4f8] sm:$0xff] %v4884_v47  ;;  %v4944_v42 = vld [vmem:[%s8751_s15 + $0x2e8] sm:$0xff]  ;;  %v4946_v56 = vld [vmem:[%s8751_s15 + $0x2f0] sm:$0xff] }
 0x3f7   : > { %4887 = vst [vmem:[%s9316_s24 + $0x800] sm:$0xff] %v4886_v46  ;;  %4889 = vst [vmem:[%s9316_s24 + $0x808] sm:$0xff] %v4888_v44  ;;  %v4948_v18 = vld [vmem:[%s8751_s15 + $0x2f8] sm:$0xff] }
 0x3f8   : > { %4891 = vst [vmem:[%s9316_s24 + $0x810] sm:$0xff] %v4890_v19  ;;  %4893 = vst [vmem:[%s9316_s24 + $0x818] sm:$0xff] %v4892_v26 }
 0x3f9   : > { %4895 = vst [vmem:[%s9316_s24 + $0x820] sm:$0xff] %v4894_v39  ;;  %4897 = vst [vmem:[%s9316_s24 + $0x828] sm:$0xff] %v4896_v29 }
 0x3fa   : > { %4899 = vst [vmem:[%s9316_s24 + $0x830] sm:$0xff] %v4898_v48  ;;  %4901 = vst [vmem:[%s9316_s24 + $0x838] sm:$0xff] %v4900_v49 }
 0x3fb   : > { %4903 = vst [vmem:[%s9316_s24 + $0x840] sm:$0xff] %v4902_v63  ;;  %4905 = vst [vmem:[%s9316_s24 + $0x848] sm:$0xff] %v4904_v13 }
 0x3fc   : > { %4907 = vst [vmem:[%s9316_s24 + $0x850] sm:$0xff] %v4906_v17  ;;  %4909 = vst [vmem:[%s9316_s24 + $0x858] sm:$0xff] %v4908_v55 }
 0x3fd   : > { %4911 = vst [vmem:[%s9316_s24 + $0x860] sm:$0xff] %v4910_v38  ;;  %4913 = vst [vmem:[%s9316_s24 + $0x868] sm:$0xff] %v4912_v20 }
 0x3fe   : > { %4915 = vst [vmem:[%s9316_s24 + $0x870] sm:$0xff] %v4914_v60  ;;  %4917 = vst [vmem:[%s9316_s24 + $0x878] sm:$0xff] %v4916_v10 }
 0x3ff   : > { %4919 = vst [vmem:[%s9316_s24 + $0x880] sm:$0xff] %v4918_v11  ;;  %4921 = vst [vmem:[%s9316_s24 + $0x888] sm:$0xff] %v4920_v54 }
 0x400   : > { %4923 = vst [vmem:[%s9316_s24 + $0x890] sm:$0xff] %v4922_v50  ;;  %4925 = vst [vmem:[%s9316_s24 + $0x898] sm:$0xff] %v4924_v22 }
 0x401   : > { %4927 = vst [vmem:[%s9316_s24 + $0x8a0] sm:$0xff] %v4926_v31  ;;  %4929 = vst [vmem:[%s9316_s24 + $0x8a8] sm:$0xff] %v4928_v33 }
 0x402   : > { %4931 = vst [vmem:[%s9316_s24 + $0x8b0] sm:$0xff] %v4930_v0  ;;  %4933 = vst [vmem:[%s9316_s24 + $0x8b8] sm:$0xff] %v4932_v41 }
 0x403   : > { %4935 = vst [vmem:[%s9316_s24 + $0x8c0] sm:$0xff] %v4934_v8  ;;  %4937 = vst [vmem:[%s9316_s24 + $0x8c8] sm:$0xff] %v4936_v53 }
 0x404   : > { %4939 = vst [vmem:[%s9316_s24 + $0x8d0] sm:$0xff] %v4938_v2  ;;  %4941 = vst [vmem:[%s9316_s24 + $0x8d8] sm:$0xff] %v4940_v52 }
 0x405   : > { %4943 = vst [vmem:[%s9316_s24 + $0x8e0] sm:$0xff] %v4942_v14  ;;  %4945 = vst [vmem:[%s9316_s24 + $0x8e8] sm:$0xff] %v4944_v42 }
 0x406   : > { %4947 = vst [vmem:[%s9316_s24 + $0x8f0] sm:$0xff] %v4946_v56  ;;  %4949 = vst [vmem:[%s9316_s24 + $0x8f8] sm:$0xff] %v4948_v18 }
 0x407 PF: > { %p16_p11 = scmp.ge.s32.totalorder %s6392_s9, 6   ;;  %s9927_s27 = smov %s6322_s28 }
 0x408   : > { %s9928_s28 = smov %s6402_s12  ;;  %s9929_s29 = smov %s6392_s9 }
 0x409   :  { %18 = sbr.rel (!%p16_p11) target bundleno = 2 (0x2), region = 174 }

</bundles_post_ra>
